<compile_context>
chip_gen: v6e
topology: v6e:2x2x1
jax: 0.10.0
libtpu: 0.0.40
codegen_flags: <defaults>
</compile_context>

<pallas_src>
import functools

import jax
import jax.numpy as jnp
from jax import lax
from jax.experimental import pallas as pl
from jax.experimental.pallas import tpu as pltpu


# ----------------------------------------------------------------------------
# Hardware-aware sizing helpers
# ----------------------------------------------------------------------------
def _vmem_capacity_bytes():
    try:
        return int(pltpu.get_tpu_info().vmem_capacity_bytes)
    except Exception:
        return 64 * 1024 * 1024          # conservative (v7x-sized) fallback


def _compiler_params():
    cap = _vmem_capacity_bytes()
    return pltpu.CompilerParams(
        dimension_semantics=("parallel",),
        vmem_limit_bytes=int(cap * 0.8),
    )


def _round_up(x, m):
    return ((x + m - 1) // m) * m


def _pick_batch_tile(batch, seq_len, hidden):
    """Batch tile for the fused recurrence kernel.

    Per batch row the kernel holds ~44*T*H bytes in VMEM (bf16 xpf/xpb inputs
    double-buffered + hseq/xp1 scratch); size the tile so that fits in ~half
    of this chip's VMEM, keep it a multiple of 8 rows, and keep it small
    enough that the grid has >=2 'parallel' programs (v7x megacore)."""
    budget = _vmem_capacity_bytes() // 2
    per_row = 44 * seq_len * hidden
    bt = max(8, (budget // max(per_row, 1)) // 8 * 8)
    bt = min(bt, 256)
    bt = min(bt, max(8, _round_up((batch + 1) // 2, 8)))
    return bt


def _pick_row_tile(rows, emb, hidden):
    """Row tile for the hoisted layer-0 projection GEMM."""
    budget = _vmem_capacity_bytes() // 2
    weight_bytes = emb * 8 * hidden * 2 + 8 * hidden * 4
    per_row = 8 * emb + 32 * hidden       # f32 input x2 buf + 2x bf16 out x2 buf
    cap_rows = max(8, (budget - weight_bytes) // max(per_row, 1))
    if rows <= cap_rows:
        return rows
    for t in (4096, 2048, 1024, 512, 256, 128, 64, 32, 16, 8):
        if t <= cap_rows and rows % t == 0:
            return t
    return rows


def _pick_unroll(seq_len, bt, hidden):
    """Unroll the serial time loop only while the live (bt,4H) f32 gate
    intermediates per unrolled step stay within a few vregs."""
    if bt * hidden <= 4096:
        cap = 8
    elif bt * hidden <= 16384:
        cap = 4
    else:
        cap = 2
    return max(u for u in (8, 4, 2, 1) if seq_len % u == 0 and u <= cap)


# ----------------------------------------------------------------------------
# Shared LSTM cell math (used by both the Pallas kernels and the reference)
# ----------------------------------------------------------------------------
def _sigmoid(x):
    # single EUP op (tanh) instead of exp + reciprocal
    return 0.5 * jnp.tanh(0.5 * x) + 0.5


def _lstm_cell(pre, h, c, w_hh, hidden):
    """pre = x_t @ W_ih + b_ih + b_hh (precomputed, bf16).  h bf16, c f32.
    Gate order: i, f, g, o (PyTorch)."""
    g = pre.astype(jnp.float32) + jnp.dot(h, w_hh,
                                          preferred_element_type=jnp.float32)
    H = hidden
    i_g = _sigmoid(g[:, 0 * H:1 * H])
    f_g = _sigmoid(g[:, 1 * H:2 * H])
    g_g = jnp.tanh(g[:, 2 * H:3 * H])
    o_g = _sigmoid(g[:, 3 * H:4 * H])
    c_new = f_g * c + i_g * g_g
    h_new = (o_g * jnp.tanh(c_new)).astype(jnp.bfloat16)
    return h_new, c_new


# ----------------------------------------------------------------------------
# Pallas kernels
# ----------------------------------------------------------------------------
def _proj_l0_kernel(x_ref, w_ref, b_ref, of_ref, ob_ref):
    """Hoisted layer-0 input projection for BOTH directions as one GEMM.

    x_ref: (mt, E) f32   w_ref: (E, 8H) bf16   b_ref: (1, 8H) f32
    of_ref/ob_ref: (mt, 4H) bf16 (forward / backward pre-activations)
    """
    p = jnp.dot(x_ref[...].astype(jnp.bfloat16), w_ref[...],
                preferred_element_type=jnp.float32) + b_ref[...]
    n = of_ref.shape[-1]
    of_ref[...] = p[:, :n].astype(of_ref.dtype)
    ob_ref[...] = p[:, n:].astype(ob_ref.dtype)


def _fused_rec_kernel(xpf_ref, xpb_ref, w0f_ref, w0b_ref,
                      w1f_ref, w1b_ref, b1_ref, w1hh_ref, wl_ref, bl_ref,
                      out_ref, hseq_f, hseq_b, xp1,
                      *, seq_len, hidden, unroll):
    """Fused: layer-0 bidirectional recurrence -> layer-1 input projection ->
    layer-1 backward recurrence -> Linear head.  All intermediates in VMEM.

    xpf/xpb: (T, bt, 4H) bf16      w0*/w1*/w1hh: (H, 4H) bf16
    b1: (1, 4H) f32                wl: (H, Opad) bf16   bl: (1, Opad) f32
    out: (bt, Opad) f32
    scratch: hseq_f/hseq_b (T, bt, H) bf16, xp1 (T, bt, 4H) bf16
    """
    T, H = seq_len, hidden
    bt = xpf_ref.shape[1]

    # ---- phase 1: layer-0 forward + backward recurrence
    w0f = w0f_ref[...]
    w0b = w0b_ref[...]

    def step0(t, carry):
        h_f, c_f, h_b, c_b = carry
        tb = T - 1 - t
        h_f, c_f = _lstm_cell(xpf_ref[t], h_f, c_f, w0f, H)
        h_b, c_b = _lstm_cell(xpb_ref[tb], h_b, c_b, w0b, H)
        hseq_f[t] = h_f
        hseq_b[tb] = h_b
        return h_f, c_f, h_b, c_b

    zh = jnp.zeros((bt, H), jnp.bfloat16)
    zc = jnp.zeros((bt, H), jnp.float32)
    lax.fori_loop(0, T, step0, (zh, zc, zh, zc), unroll=unroll)

    # ---- phase 2: layer-1 input projection on the VMEM-resident hidden
    # sequences (split weights -> no (T,bt,2H) concat is ever materialized)
    pf = hseq_f[...].reshape(T * bt, H)
    pb = hseq_b[...].reshape(T * bt, H)
    proj = (jnp.dot(pf, w1f_ref[...], preferred_element_type=jnp.float32)
            + jnp.dot(pb, w1b_ref[...], preferred_element_type=jnp.float32)
            + b1_ref[...])
    xp1[...] = proj.reshape(T, bt, 4 * H).astype(jnp.bfloat16)

    # ---- phase 3: layer-1 backward recurrence (only direction feeding
    # h_n[-1]) with the Linear head fused into the epilogue
    w1hh = w1hh_ref[...]

    def step1(t, carry):
        h, c = carry
        return _lstm_cell(xp1[T - 1 - t], h, c, w1hh, H)

    h_fin, _ = lax.fori_loop(0, T, step1, (zh, zc), unroll=unroll)
    out_ref[...] = (jnp.dot(h_fin, wl_ref[...],
                            preferred_element_type=jnp.float32) + bl_ref[...])


# ----------------------------------------------------------------------------
# Wrappers
# ----------------------------------------------------------------------------
def input_projection_l0(x2d, w_cat, b_cat, hidden):
    M, E = x2d.shape
    n4h = 4 * hidden
    mt = _pick_row_tile(M, E, hidden)
    return pl.pallas_call(
        _proj_l0_kernel,
        grid=(M // mt,),
        in_specs=[
            pl.BlockSpec((mt, E), lambda i: (i, 0)),
            pl.BlockSpec(w_cat.shape, lambda i: (0, 0)),
            pl.BlockSpec(b_cat.shape, lambda i: (0, 0)),
        ],
        out_specs=(pl.BlockSpec((mt, n4h), lambda i: (i, 0)),
                   pl.BlockSpec((mt, n4h), lambda i: (i, 0))),
        out_shape=(jax.ShapeDtypeStruct((M, n4h), jnp.bfloat16),
                   jax.ShapeDtypeStruct((M, n4h), jnp.bfloat16)),
        compiler_params=_compiler_params(),
    )(x2d, w_cat, b_cat)


def fused_bilstm_head(xpf, xpb, w0f, w0b, w1f, w1b, b1, w1hh, wl, bl, bt):
    T, B, n4h = xpf.shape
    H = n4h // 4
    Opad = wl.shape[1]
    assert B % bt == 0
    kernel = functools.partial(_fused_rec_kernel, seq_len=T, hidden=H,
                               unroll=_pick_unroll(T, bt, H))

    def _full(a):
        return pl.BlockSpec(a.shape, lambda i: (0,) * len(a.shape))

    return pl.pallas_call(
        kernel,
        grid=(B // bt,),
        in_specs=[
            pl.BlockSpec((T, bt, n4h), lambda i: (0, i, 0)),
            pl.BlockSpec((T, bt, n4h), lambda i: (0, i, 0)),
            _full(w0f), _full(w0b), _full(w1f), _full(w1b), _full(b1),
            _full(w1hh), _full(wl), _full(bl),
        ],
        out_specs=pl.BlockSpec((bt, Opad), lambda i: (i, 0)),
        out_shape=jax.ShapeDtypeStruct((B, Opad), jnp.float32),
        scratch_shapes=[
            pltpu.VMEM((T, bt, H), jnp.bfloat16),      # layer-0 fwd hidden seq
            pltpu.VMEM((T, bt, H), jnp.bfloat16),      # layer-0 bwd hidden seq
            pltpu.VMEM((T, bt, n4h), jnp.bfloat16),    # layer-1 pre-activations
        ],
        compiler_params=_compiler_params(),
    )(xpf, xpb, w0f, w0b, w1f, w1b, b1, w1hh, wl, bl)


def bilstm_forward(x, p):
    """x: (T, B, E) float32 -> logits (B, output_size) float32."""
    T, B, E = x.shape
    H = p["w_hh_l0_f"].shape[0]
    O = p["w_label"].shape[1]

    # --- batch padding: multiple of 8 rows (unmasked sublane stores, full MXU
    # rows) and >=2 grid programs (v7x megacore).  Padded rows are zeros and
    # sliced away at the end.
    bt = _pick_batch_tile(B, T, H)
    B_pad = max(_round_up(B, bt), 2 * bt)
    if B_pad != B:
        x = jnp.pad(x, ((0, 0), (0, B_pad - B), (0, 0)))

    # --- head output padded to a full 128-lane tile (unmasked final store)
    O_pad = _round_up(O, 128)
    wl = jnp.pad(p["w_label"], ((0, 0), (0, O_pad - O)))
    bl = jnp.pad(p["b_label"], ((0, 0), (0, O_pad - O)))

    # --- layer-0 input projection (both directions in one GEMM, bf16 out)
    xpf, xpb = input_projection_l0(x.reshape(T * B_pad, E),
                                   p["w_ih_l0"], p["b_l0"], H)

    # --- fused layer-0 recurrence + layer-1 projection + layer-1 backward
    #     recurrence + Linear head
    logits = fused_bilstm_head(
        xpf.reshape(T, B_pad, 4 * H), xpb.reshape(T, B_pad, 4 * H),
        p["w_hh_l0_f"], p["w_hh_l0_b"],
        p["w_ih_l1_hf"], p["w_ih_l1_hb"], p["b_l1"],
        p["w_hh_l1"], wl, bl, bt)
    return logits[:B, :O]


# ----------------------------------------------------------------------------
# Pure-JAX reference (same math, same bf16 casts) for correctness check
# ----------------------------------------------------------------------------
def bilstm_ref(x, p):
    T, B, E = x.shape
    H = p["w_hh_l0_f"].shape[0]

    proj = (jnp.dot(x.reshape(T * B, E).astype(jnp.bfloat16), p["w_ih_l0"],
                    preferred_element_type=jnp.float32) + p["b_l0"])
    proj = proj.astype(jnp.bfloat16).reshape(T, B, 8 * H)
    pf, pb = proj[..., :4 * H], proj[..., 4 * H:]

    def run_dir(pre, w_hh, reverse):
        h = jnp.zeros((B, H), jnp.bfloat16)
        c = jnp.zeros((B, H), jnp.float32)
        out = [None] * T
        order = range(T - 1, -1, -1) if reverse else range(T)
        for t in order:
            h, c = _lstm_cell(pre[t], h, c, w_hh, H)
            out[t] = h
        return jnp.stack(out), h

    hf, _ = run_dir(pf, p["w_hh_l0_f"], reverse=False)
    hb, _ = run_dir(pb, p["w_hh_l0_b"], reverse=True)

    proj1 = (jnp.dot(hf.reshape(T * B, H), p["w_ih_l1_hf"],
                     preferred_element_type=jnp.float32)
             + jnp.dot(hb.reshape(T * B, H), p["w_ih_l1_hb"],
                       preferred_element_type=jnp.float32)
             + p["b_l1"]).astype(jnp.bfloat16).reshape(T, B, 4 * H)
    _, h_fin = run_dir(proj1, p["w_hh_l1"], reverse=True)
    return (jnp.dot(h_fin, p["w_label"],
                    preferred_element_type=jnp.float32) + p["b_label"])


# ----------------------------------------------------------------------------
# Parameter init (deterministic, PyTorch-style uniform(-1/sqrt(H), 1/sqrt(H)))
# ----------------------------------------------------------------------------
def init_params(key, emb, hidden, out_dim):
    bound = 1.0 / float(hidden) ** 0.5
    keys = iter(jax.random.split(key, 16))

    def u(shape, dtype=jnp.float32):
        w = jax.random.uniform(next(keys), shape, jnp.float32,
                               minval=-bound, maxval=bound)
        return w.astype(dtype)

    H = hidden
    p = {}
    # layer 0: forward + backward input weights packed into one (E, 8H) matrix
    p["w_ih_l0"] = u((emb, 8 * H), jnp.bfloat16)     # [ fwd 0:4H | bwd 4H:8H ]
    p["b_l0"] = u((1, 8 * H))                        # b_ih + b_hh, both dirs
    p["w_hh_l0_f"] = u((H, 4 * H), jnp.bfloat16)
    p["w_hh_l0_b"] = u((H, 4 * H), jnp.bfloat16)
    # layer 1, backward direction only (forward output never reaches the head);
    # its (2H, 4H) input weight is stored as two (H, 4H) halves so the layer-0
    # forward / backward hidden sequences need never be concatenated.
    p["w_ih_l1_hf"] = u((H, 4 * H), jnp.bfloat16)
    p["w_ih_l1_hb"] = u((H, 4 * H), jnp.bfloat16)
    p["b_l1"] = u((1, 4 * H))
    p["w_hh_l1"] = u((H, 4 * H), jnp.bfloat16)
    # label head
    p["w_label"] = u((H, out_dim), jnp.bfloat16)
    p["b_label"] = u((1, out_dim))
    return p


# ----------------------------------------------------------------------------
if __name__ == "__main__":
    SEQ, BATCH, EMB, HIDDEN, OUT = 8, 4, 16, 32, 8

    key = jax.random.PRNGKey(0)
    k_x, k_p = jax.random.split(key)
    x = jax.random.normal(k_x, (SEQ, BATCH, EMB), jnp.float32)
    params = init_params(k_p, EMB, HIDDEN, OUT)

    logits = jax.jit(bilstm_forward)(x, params)
    logits = jax.block_until_ready(logits)

    ref = bilstm_ref(x, params)
    assert logits.shape == (BATCH, OUT)
    assert jnp.allclose(logits, ref, atol=2e-2, rtol=2e-2), (
        "Pallas result mismatches pure-JAX reference")

    print("KERNEL_OK")
</pallas_src>

<mosaic_0001>
module attributes {stable_mosaic.version = 11 : i64} {
  func.func @_proj_l0_kernel(%arg0: i32, %arg1: memref<128x16xf32, #tpu.memory_space<vmem>>, %arg2: memref<16x256xbf16, #tpu.memory_space<vmem>>, %arg3: memref<1x256xf32, #tpu.memory_space<vmem>>, %arg4: memref<128x128xbf16, #tpu.memory_space<vmem>>, %arg5: memref<128x128xbf16, #tpu.memory_space<vmem>>) attributes {dimension_semantics = [#tpu.dimension_semantics<parallel>], iteration_bounds = array<i64: 1>, scalar_prefetch = 0 : i64, scratch_operands = 0 : i64, tpu.core_type = #tpu.core_type<tc>, window_params = [{transform_indices = @transform_0, window_bounds = array<i64: 128, 16>}, {pipeline_mode = #tpu.pipeline_mode<synchronous>, transform_indices = @transform_1, window_bounds = array<i64: 16, 256>}, {pipeline_mode = #tpu.pipeline_mode<synchronous>, transform_indices = @transform_2, window_bounds = array<i64: 1, 256>}, {transform_indices = @transform_3, window_bounds = array<i64: 128, 128>}, {transform_indices = @transform_4, window_bounds = array<i64: 128, 128>}]} {
    %c0 = arith.constant 0 : index
    %c0_0 = arith.constant 0 : index
    %0 = vector.load %arg1[%c0, %c0_0] : memref<128x16xf32, #tpu.memory_space<vmem>>, vector<128x16xf32>
    %1 = arith.truncf %0 : vector<128x16xf32> to vector<128x16xbf16>
    %c0_1 = arith.constant 0 : index
    %c0_2 = arith.constant 0 : index
    %2 = vector.load %arg2[%c0_1, %c0_2] : memref<16x256xbf16, #tpu.memory_space<vmem>>, vector<16x256xbf16>
    %cst = arith.constant dense<0.000000e+00> : vector<128x256xf32>
    %3 = tpu.matmul %1, %2, %cst {dimension_numbers = #tpu.dot_dimension_numbers<[1], [0], [0], [1], [0, 0, 1, 1], [], []>} : vector<128x16xbf16>, vector<16x256xbf16>, vector<128x256xf32> -> vector<128x256xf32>
    %c0_3 = arith.constant 0 : index
    %c0_4 = arith.constant 0 : index
    %4 = vector.load %arg3[%c0_3, %c0_4] : memref<1x256xf32, #tpu.memory_space<vmem>>, vector<1x256xf32>
    %5 = vector.broadcast %4 : vector<1x256xf32> to vector<128x256xf32>
    %6 = arith.addf %3, %5 : vector<128x256xf32>
    %7 = vector.extract_strided_slice %6 {offsets = [0, 0], sizes = [128, 128], strides = [1, 1]} : vector<128x256xf32> to vector<128x128xf32>
    %8 = arith.truncf %7 : vector<128x128xf32> to vector<128x128xbf16>
    %c0_5 = arith.constant 0 : index
    %c0_6 = arith.constant 0 : index
    %9 = vector.load %arg4[%c0_5, %c0_6] : memref<128x128xbf16, #tpu.memory_space<vmem>>, vector<128x128xbf16>
    tpu.vector_store %arg4[%c0_5, %c0_6], %8 {strides = array<i32>} : memref<128x128xbf16, #tpu.memory_space<vmem>>, vector<128x128xbf16>,
    %10 = vector.extract_strided_slice %6 {offsets = [0, 128], sizes = [128, 128], strides = [1, 1]} : vector<128x256xf32> to vector<128x128xf32>
    %11 = arith.truncf %10 : vector<128x128xf32> to vector<128x128xbf16>
    %c0_7 = arith.constant 0 : index
    %c0_8 = arith.constant 0 : index
    %12 = vector.load %arg5[%c0_7, %c0_8] : memref<128x128xbf16, #tpu.memory_space<vmem>>, vector<128x128xbf16>
    tpu.vector_store %arg5[%c0_7, %c0_8], %11 {strides = array<i32>} : memref<128x128xbf16, #tpu.memory_space<vmem>>, vector<128x128xbf16>,
    return
  }
  func.func @transform_0(%arg0: i32) -> (i32, i32) {
    %c0_i32 = arith.constant 0 : i32
    %c0_i32_0 = arith.constant 0 : i32
    return %arg0, %c0_i32 : i32, i32
  }
  func.func @transform_1(%arg0: i32) -> (i32, i32) {
    %c0_i32 = arith.constant 0 : i32
    %c0_i32_0 = arith.constant 0 : i32
    %c0_i32_1 = arith.constant 0 : i32
    return %c0_i32, %c0_i32_0 : i32, i32
  }
  func.func @transform_2(%arg0: i32) -> (i32, i32) {
    %c0_i32 = arith.constant 0 : i32
    %c0_i32_0 = arith.constant 0 : i32
    %c0_i32_1 = arith.constant 0 : i32
    return %c0_i32, %c0_i32_0 : i32, i32
  }
  func.func @transform_3(%arg0: i32) -> (i32, i32) {
    %c0_i32 = arith.constant 0 : i32
    %c0_i32_0 = arith.constant 0 : i32
    return %arg0, %c0_i32 : i32, i32
  }
  func.func @transform_4(%arg0: i32) -> (i32, i32) {
    %c0_i32 = arith.constant 0 : i32
    %c0_i32_0 = arith.constant 0 : i32
    return %arg0, %c0_i32 : i32, i32
  }
}

module attributes {stable_mosaic.version = 11 : i64} {
  func.func @_fused_rec_kernel(%arg0: i32, %arg1: memref<8x8x128xbf16, #tpu.memory_space<vmem>>, %arg2: memref<8x8x128xbf16, #tpu.memory_space<vmem>>, %arg3: memref<32x128xbf16, #tpu.memory_space<vmem>>, %arg4: memref<32x128xbf16, #tpu.memory_space<vmem>>, %arg5: memref<32x128xbf16, #tpu.memory_space<vmem>>, %arg6: memref<32x128xbf16, #tpu.memory_space<vmem>>, %arg7: memref<1x128xf32, #tpu.memory_space<vmem>>, %arg8: memref<32x128xbf16, #tpu.memory_space<vmem>>, %arg9: memref<32x128xbf16, #tpu.memory_space<vmem>>, %arg10: memref<1x128xf32, #tpu.memory_space<vmem>>, %arg11: memref<8x128xf32, #tpu.memory_space<vmem>>, %arg12: memref<8x8x32xbf16, #tpu.memory_space<vmem>>, %arg13: memref<8x8x32xbf16, #tpu.memory_space<vmem>>, %arg14: memref<8x8x128xbf16, #tpu.memory_space<vmem>>) attributes {dimension_semantics = [#tpu.dimension_semantics<parallel>], iteration_bounds = array<i64: 2>, scalar_prefetch = 0 : i64, scratch_operands = 3 : i64, tpu.core_type = #tpu.core_type<tc>, window_params = [{transform_indices = @transform_0, window_bounds = array<i64: 8, 8, 128>}, {transform_indices = @transform_1, window_bounds = array<i64: 8, 8, 128>}, {pipeline_mode = #tpu.pipeline_mode<synchronous>, transform_indices = @transform_2, window_bounds = array<i64: 32, 128>}, {pipeline_mode = #tpu.pipeline_mode<synchronous>, transform_indices = @transform_3, window_bounds = array<i64: 32, 128>}, {pipeline_mode = #tpu.pipeline_mode<synchronous>, transform_indices = @transform_4, window_bounds = array<i64: 32, 128>}, {pipeline_mode = #tpu.pipeline_mode<synchronous>, transform_indices = @transform_5, window_bounds = array<i64: 32, 128>}, {pipeline_mode = #tpu.pipeline_mode<synchronous>, transform_indices = @transform_6, window_bounds = array<i64: 1, 128>}, {pipeline_mode = #tpu.pipeline_mode<synchronous>, transform_indices = @transform_7, window_bounds = array<i64: 32, 128>}, {pipeline_mode = #tpu.pipeline_mode<synchronous>, transform_indices = @transform_8, window_bounds = array<i64: 32, 128>}, {pipeline_mode = #tpu.pipeline_mode<synchronous>, transform_indices = @transform_9, window_bounds = array<i64: 1, 128>}, {transform_indices = @transform_10, window_bounds = array<i64: 8, 128>}]} {
    %c0 = arith.constant 0 : index
    %c0_0 = arith.constant 0 : index
    %0 = vector.load %arg3[%c0, %c0_0] : memref<32x128xbf16, #tpu.memory_space<vmem>>, vector<32x128xbf16>
    %c0_1 = arith.constant 0 : index
    %c0_2 = arith.constant 0 : index
    %1 = vector.load %arg4[%c0_1, %c0_2] : memref<32x128xbf16, #tpu.memory_space<vmem>>, vector<32x128xbf16>
    %cst = arith.constant 0.000000e+00 : bf16
    %2 = vector.broadcast %cst : bf16 to vector<8x32xbf16>
    %cst_3 = arith.constant 0.000000e+00 : f32
    %3 = vector.broadcast %cst_3 : f32 to vector<8x32xf32>
    %c0_i32 = arith.constant 0 : i32
    %c7_i32 = arith.constant 7 : i32
    %4 = arith.subi %c7_i32, %c0_i32 : i32
    %5 = arith.index_cast %c0_i32 : i32 to index
    %c0_4 = arith.constant 0 : index
    %c0_5 = arith.constant 0 : index
    %6 = vector.load %arg1[%5, %c0_4, %c0_5] : memref<8x8x128xbf16, #tpu.memory_space<vmem>>, vector<1x8x128xbf16>
    %7 = vector.shape_cast %6 : vector<1x8x128xbf16> to vector<8x128xbf16>
    %8 = arith.extf %7 : vector<8x128xbf16> to vector<8x128xf32>
    %cst_6 = arith.constant dense<0.000000e+00> : vector<8x128xf32>
    %9 = tpu.matmul %2, %0, %cst_6 {dimension_numbers = #tpu.dot_dimension_numbers<[1], [0], [0], [1], [0, 0, 1, 1], [], []>} : vector<8x32xbf16>, vector<32x128xbf16>, vector<8x128xf32> -> vector<8x128xf32>
    %10 = arith.addf %8, %9 : vector<8x128xf32>
    %11 = vector.extract_strided_slice %10 {offsets = [0, 0], sizes = [8, 32], strides = [1, 1]} : vector<8x128xf32> to vector<8x32xf32>
    %cst_7 = arith.constant 5.000000e-01 : f32
    %12 = vector.broadcast %cst_7 : f32 to vector<8x32xf32>
    %13 = arith.mulf %12, %11 : vector<8x32xf32>
    %14 = math.tanh %13 : vector<8x32xf32>
    %cst_8 = arith.constant 5.000000e-01 : f32
    %15 = vector.broadcast %cst_8 : f32 to vector<8x32xf32>
    %16 = arith.mulf %15, %14 : vector<8x32xf32>
    %cst_9 = arith.constant 5.000000e-01 : f32
    %17 = vector.broadcast %cst_9 : f32 to vector<8x32xf32>
    %18 = arith.addf %16, %17 : vector<8x32xf32>
    %19 = vector.extract_strided_slice %10 {offsets = [0, 32], sizes = [8, 32], strides = [1, 1]} : vector<8x128xf32> to vector<8x32xf32>
    %cst_10 = arith.constant 5.000000e-01 : f32
    %20 = vector.broadcast %cst_10 : f32 to vector<8x32xf32>
    %21 = arith.mulf %20, %19 : vector<8x32xf32>
    %22 = math.tanh %21 : vector<8x32xf32>
    %cst_11 = arith.constant 5.000000e-01 : f32
    %23 = vector.broadcast %cst_11 : f32 to vector<8x32xf32>
    %24 = arith.mulf %23, %22 : vector<8x32xf32>
    %cst_12 = arith.constant 5.000000e-01 : f32
    %25 = vector.broadcast %cst_12 : f32 to vector<8x32xf32>
    %26 = arith.addf %24, %25 : vector<8x32xf32>
    %27 = vector.extract_strided_slice %10 {offsets = [0, 64], sizes = [8, 32], strides = [1, 1]} : vector<8x128xf32> to vector<8x32xf32>
    %28 = math.tanh %27 : vector<8x32xf32>
    %29 = vector.extract_strided_slice %10 {offsets = [0, 96], sizes = [8, 32], strides = [1, 1]} : vector<8x128xf32> to vector<8x32xf32>
    %cst_13 = arith.constant 5.000000e-01 : f32
    %30 = vector.broadcast %cst_13 : f32 to vector<8x32xf32>
    %31 = arith.mulf %30, %29 : vector<8x32xf32>
    %32 = math.tanh %31 : vector<8x32xf32>
    %cst_14 = arith.constant 5.000000e-01 : f32
    %33 = vector.broadcast %cst_14 : f32 to vector<8x32xf32>
    %34 = arith.mulf %33, %32 : vector<8x32xf32>
    %cst_15 = arith.constant 5.000000e-01 : f32
    %35 = vector.broadcast %cst_15 : f32 to vector<8x32xf32>
    %36 = arith.addf %34, %35 : vector<8x32xf32>
    %37 = arith.mulf %26, %3 : vector<8x32xf32>
    %38 = arith.mulf %18, %28 : vector<8x32xf32>
    %39 = arith.addf %37, %38 : vector<8x32xf32>
    %40 = math.tanh %39 : vector<8x32xf32>
    %41 = arith.mulf %36, %40 : vector<8x32xf32>
    %42 = arith.truncf %41 : vector<8x32xf32> to vector<8x32xbf16>
    %43 = arith.index_cast %4 : i32 to index
    %c0_16 = arith.constant 0 : index
    %c0_17 = arith.constant 0 : index
    %44 = vector.load %arg2[%43, %c0_16, %c0_17] : memref<8x8x128xbf16, #tpu.memory_space<vmem>>, vector<1x8x128xbf16>
    %45 = vector.shape_cast %44 : vector<1x8x128xbf16> to vector<8x128xbf16>
    %46 = arith.extf %45 : vector<8x128xbf16> to vector<8x128xf32>
    %cst_18 = arith.constant dense<0.000000e+00> : vector<8x128xf32>
    %47 = tpu.matmul %2, %1, %cst_18 {dimension_numbers = #tpu.dot_dimension_numbers<[1], [0], [0], [1], [0, 0, 1, 1], [], []>} : vector<8x32xbf16>, vector<32x128xbf16>, vector<8x128xf32> -> vector<8x128xf32>
    %48 = arith.addf %46, %47 : vector<8x128xf32>
    %49 = vector.extract_strided_slice %48 {offsets = [0, 0], sizes = [8, 32], strides = [1, 1]} : vector<8x128xf32> to vector<8x32xf32>
    %cst_19 = arith.constant 5.000000e-01 : f32
    %50 = vector.broadcast %cst_19 : f32 to vector<8x32xf32>
    %51 = arith.mulf %50, %49 : vector<8x32xf32>
    %52 = math.tanh %51 : vector<8x32xf32>
    %cst_20 = arith.constant 5.000000e-01 : f32
    %53 = vector.broadcast %cst_20 : f32 to vector<8x32xf32>
    %54 = arith.mulf %53, %52 : vector<8x32xf32>
    %cst_21 = arith.constant 5.000000e-01 : f32
    %55 = vector.broadcast %cst_21 : f32 to vector<8x32xf32>
    %56 = arith.addf %54, %55 : vector<8x32xf32>
    %57 = vector.extract_strided_slice %48 {offsets = [0, 32], sizes = [8, 32], strides = [1, 1]} : vector<8x128xf32> to vector<8x32xf32>
    %cst_22 = arith.constant 5.000000e-01 : f32
    %58 = vector.broadcast %cst_22 : f32 to vector<8x32xf32>
    %59 = arith.mulf %58, %57 : vector<8x32xf32>
    %60 = math.tanh %59 : vector<8x32xf32>
    %cst_23 = arith.constant 5.000000e-01 : f32
    %61 = vector.broadcast %cst_23 : f32 to vector<8x32xf32>
    %62 = arith.mulf %61, %60 : vector<8x32xf32>
    %cst_24 = arith.constant 5.000000e-01 : f32
    %63 = vector.broadcast %cst_24 : f32 to vector<8x32xf32>
    %64 = arith.addf %62, %63 : vector<8x32xf32>
    %65 = vector.extract_strided_slice %48 {offsets = [0, 64], sizes = [8, 32], strides = [1, 1]} : vector<8x128xf32> to vector<8x32xf32>
    %66 = math.tanh %65 : vector<8x32xf32>
    %67 = vector.extract_strided_slice %48 {offsets = [0, 96], sizes = [8, 32], strides = [1, 1]} : vector<8x128xf32> to vector<8x32xf32>
    %cst_25 = arith.constant 5.000000e-01 : f32
    %68 = vector.broadcast %cst_25 : f32 to vector<8x32xf32>
    %69 = arith.mulf %68, %67 : vector<8x32xf32>
    %70 = math.tanh %69 : vector<8x32xf32>
    %cst_26 = arith.constant 5.000000e-01 : f32
    %71 = vector.broadcast %cst_26 : f32 to vector<8x32xf32>
    %72 = arith.mulf %71, %70 : vector<8x32xf32>
    %cst_27 = arith.constant 5.000000e-01 : f32
    %73 = vector.broadcast %cst_27 : f32 to vector<8x32xf32>
    %74 = arith.addf %72, %73 : vector<8x32xf32>
    %75 = arith.mulf %64, %3 : vector<8x32xf32>
    %76 = arith.mulf %56, %66 : vector<8x32xf32>
    %77 = arith.addf %75, %76 : vector<8x32xf32>
    %78 = math.tanh %77 : vector<8x32xf32>
    %79 = arith.mulf %74, %78 : vector<8x32xf32>
    %80 = arith.truncf %79 : vector<8x32xf32> to vector<8x32xbf16>
    %81 = arith.index_cast %c0_i32 : i32 to index
    %c0_28 = arith.constant 0 : index
    %c0_29 = arith.constant 0 : index
    %82 = vector.load %arg12[%81, %c0_28, %c0_29] : memref<8x8x32xbf16, #tpu.memory_space<vmem>>, vector<1x8x32xbf16>
    %83 = vector.shape_cast %82 : vector<1x8x32xbf16> to vector<8x32xbf16>
    %84 = vector.shape_cast %42 : vector<8x32xbf16> to vector<1x8x32xbf16>
    tpu.vector_store %arg12[%81, %c0_28, %c0_29], %84 {strides = array<i32>} : memref<8x8x32xbf16, #tpu.memory_space<vmem>>, vector<1x8x32xbf16>,
    %85 = arith.index_cast %4 : i32 to index
    %c0_30 = arith.constant 0 : index
    %c0_31 = arith.constant 0 : index
    %86 = vector.load %arg13[%85, %c0_30, %c0_31] : memref<8x8x32xbf16, #tpu.memory_space<vmem>>, vector<1x8x32xbf16>
    %87 = vector.shape_cast %86 : vector<1x8x32xbf16> to vector<8x32xbf16>
    %88 = vector.shape_cast %80 : vector<8x32xbf16> to vector<1x8x32xbf16>
    tpu.vector_store %arg13[%85, %c0_30, %c0_31], %88 {strides = array<i32>} : memref<8x8x32xbf16, #tpu.memory_space<vmem>>, vector<1x8x32xbf16>,
    %c1_i32 = arith.constant 1 : i32
    %c7_i32_32 = arith.constant 7 : i32
    %89 = arith.subi %c7_i32_32, %c1_i32 : i32
    %90 = arith.index_cast %c1_i32 : i32 to index
    %c0_33 = arith.constant 0 : index
    %c0_34 = arith.constant 0 : index
    %91 = vector.load %arg1[%90, %c0_33, %c0_34] : memref<8x8x128xbf16, #tpu.memory_space<vmem>>, vector<1x8x128xbf16>
    %92 = vector.shape_cast %91 : vector<1x8x128xbf16> to vector<8x128xbf16>
    %93 = arith.extf %92 : vector<8x128xbf16> to vector<8x128xf32>
    %cst_35 = arith.constant dense<0.000000e+00> : vector<8x128xf32>
    %94 = tpu.matmul %42, %0, %cst_35 {dimension_numbers = #tpu.dot_dimension_numbers<[1], [0], [0], [1], [0, 0, 1, 1], [], []>} : vector<8x32xbf16>, vector<32x128xbf16>, vector<8x128xf32> -> vector<8x128xf32>
    %95 = arith.addf %93, %94 : vector<8x128xf32>
    %96 = vector.extract_strided_slice %95 {offsets = [0, 0], sizes = [8, 32], strides = [1, 1]} : vector<8x128xf32> to vector<8x32xf32>
    %cst_36 = arith.constant 5.000000e-01 : f32
    %97 = vector.broadcast %cst_36 : f32 to vector<8x32xf32>
    %98 = arith.mulf %97, %96 : vector<8x32xf32>
    %99 = math.tanh %98 : vector<8x32xf32>
    %cst_37 = arith.constant 5.000000e-01 : f32
    %100 = vector.broadcast %cst_37 : f32 to vector<8x32xf32>
    %101 = arith.mulf %100, %99 : vector<8x32xf32>
    %cst_38 = arith.constant 5.000000e-01 : f32
    %102 = vector.broadcast %cst_38 : f32 to vector<8x32xf32>
    %103 = arith.addf %101, %102 : vector<8x32xf32>
    %104 = vector.extract_strided_slice %95 {offsets = [0, 32], sizes = [8, 32], strides = [1, 1]} : vector<8x128xf32> to vector<8x32xf32>
    %cst_39 = arith.constant 5.000000e-01 : f32
    %105 = vector.broadcast %cst_39 : f32 to vector<8x32xf32>
    %106 = arith.mulf %105, %104 : vector<8x32xf32>
    %107 = math.tanh %106 : vector<8x32xf32>
    %cst_40 = arith.constant 5.000000e-01 : f32
    %108 = vector.broadcast %cst_40 : f32 to vector<8x32xf32>
    %109 = arith.mulf %108, %107 : vector<8x32xf32>
    %cst_41 = arith.constant 5.000000e-01 : f32
    %110 = vector.broadcast %cst_41 : f32 to vector<8x32xf32>
    %111 = arith.addf %109, %110 : vector<8x32xf32>
    %112 = vector.extract_strided_slice %95 {offsets = [0, 64], sizes = [8, 32], strides = [1, 1]} : vector<8x128xf32> to vector<8x32xf32>
    %113 = math.tanh %112 : vector<8x32xf32>
    %114 = vector.extract_strided_slice %95 {offsets = [0, 96], sizes = [8, 32], strides = [1, 1]} : vector<8x128xf32> to vector<8x32xf32>
    %cst_42 = arith.constant 5.000000e-01 : f32
    %115 = vector.broadcast %cst_42 : f32 to vector<8x32xf32>
    %116 = arith.mulf %115, %114 : vector<8x32xf32>
    %117 = math.tanh %116 : vector<8x32xf32>
    %cst_43 = arith.constant 5.000000e-01 : f32
    %118 = vector.broadcast %cst_43 : f32 to vector<8x32xf32>
    %119 = arith.mulf %118, %117 : vector<8x32xf32>
    %cst_44 = arith.constant 5.000000e-01 : f32
    %120 = vector.broadcast %cst_44 : f32 to vector<8x32xf32>
    %121 = arith.addf %119, %120 : vector<8x32xf32>
    %122 = arith.mulf %111, %39 : vector<8x32xf32>
    %123 = arith.mulf %103, %113 : vector<8x32xf32>
    %124 = arith.addf %122, %123 : vector<8x32xf32>
    %125 = math.tanh %124 : vector<8x32xf32>
    %126 = arith.mulf %121, %125 : vector<8x32xf32>
    %127 = arith.truncf %126 : vector<8x32xf32> to vector<8x32xbf16>
    %128 = arith.index_cast %89 : i32 to index
    %c0_45 = arith.constant 0 : index
    %c0_46 = arith.constant 0 : index
    %129 = vector.load %arg2[%128, %c0_45, %c0_46] : memref<8x8x128xbf16, #tpu.memory_space<vmem>>, vector<1x8x128xbf16>
    %130 = vector.shape_cast %129 : vector<1x8x128xbf16> to vector<8x128xbf16>
    %131 = arith.extf %130 : vector<8x128xbf16> to vector<8x128xf32>
    %cst_47 = arith.constant dense<0.000000e+00> : vector<8x128xf32>
    %132 = tpu.matmul %80, %1, %cst_47 {dimension_numbers = #tpu.dot_dimension_numbers<[1], [0], [0], [1], [0, 0, 1, 1], [], []>} : vector<8x32xbf16>, vector<32x128xbf16>, vector<8x128xf32> -> vector<8x128xf32>
    %133 = arith.addf %131, %132 : vector<8x128xf32>
    %134 = vector.extract_strided_slice %133 {offsets = [0, 0], sizes = [8, 32], strides = [1, 1]} : vector<8x128xf32> to vector<8x32xf32>
    %cst_48 = arith.constant 5.000000e-01 : f32
    %135 = vector.broadcast %cst_48 : f32 to vector<8x32xf32>
    %136 = arith.mulf %135, %134 : vector<8x32xf32>
    %137 = math.tanh %136 : vector<8x32xf32>
    %cst_49 = arith.constant 5.000000e-01 : f32
    %138 = vector.broadcast %cst_49 : f32 to vector<8x32xf32>
    %139 = arith.mulf %138, %137 : vector<8x32xf32>
    %cst_50 = arith.constant 5.000000e-01 : f32
    %140 = vector.broadcast %cst_50 : f32 to vector<8x32xf32>
    %141 = arith.addf %139, %140 : vector<8x32xf32>
    %142 = vector.extract_strided_slice %133 {offsets = [0, 32], sizes = [8, 32], strides = [1, 1]} : vector<8x128xf32> to vector<8x32xf32>
    %cst_51 = arith.constant 5.000000e-01 : f32
    %143 = vector.broadcast %cst_51 : f32 to vector<8x32xf32>
    %144 = arith.mulf %143, %142 : vector<8x32xf32>
    %145 = math.tanh %144 : vector<8x32xf32>
    %cst_52 = arith.constant 5.000000e-01 : f32
    %146 = vector.broadcast %cst_52 : f32 to vector<8x32xf32>
    %147 = arith.mulf %146, %145 : vector<8x32xf32>
    %cst_53 = arith.constant 5.000000e-01 : f32
    %148 = vector.broadcast %cst_53 : f32 to vector<8x32xf32>
    %149 = arith.addf %147, %148 : vector<8x32xf32>
    %150 = vector.extract_strided_slice %133 {offsets = [0, 64], sizes = [8, 32], strides = [1, 1]} : vector<8x128xf32> to vector<8x32xf32>
    %151 = math.tanh %150 : vector<8x32xf32>
    %152 = vector.extract_strided_slice %133 {offsets = [0, 96], sizes = [8, 32], strides = [1, 1]} : vector<8x128xf32> to vector<8x32xf32>
    %cst_54 = arith.constant 5.000000e-01 : f32
    %153 = vector.broadcast %cst_54 : f32 to vector<8x32xf32>
    %154 = arith.mulf %153, %152 : vector<8x32xf32>
    %155 = math.tanh %154 : vector<8x32xf32>
    %cst_55 = arith.constant 5.000000e-01 : f32
    %156 = vector.broadcast %cst_55 : f32 to vector<8x32xf32>
    %157 = arith.mulf %156, %155 : vector<8x32xf32>
    %cst_56 = arith.constant 5.000000e-01 : f32
    %158 = vector.broadcast %cst_56 : f32 to vector<8x32xf32>
    %159 = arith.addf %157, %158 : vector<8x32xf32>
    %160 = arith.mulf %149, %77 : vector<8x32xf32>
    %161 = arith.mulf %141, %151 : vector<8x32xf32>
    %162 = arith.addf %160, %161 : vector<8x32xf32>
    %163 = math.tanh %162 : vector<8x32xf32>
    %164 = arith.mulf %159, %163 : vector<8x32xf32>
    %165 = arith.truncf %164 : vector<8x32xf32> to vector<8x32xbf16>
    %166 = arith.index_cast %c1_i32 : i32 to index
    %c0_57 = arith.constant 0 : index
    %c0_58 = arith.constant 0 : index
    %167 = vector.load %arg12[%166, %c0_57, %c0_58] : memref<8x8x32xbf16, #tpu.memory_space<vmem>>, vector<1x8x32xbf16>
    %168 = vector.shape_cast %167 : vector<1x8x32xbf16> to vector<8x32xbf16>
    %169 = vector.shape_cast %127 : vector<8x32xbf16> to vector<1x8x32xbf16>
    tpu.vector_store %arg12[%166, %c0_57, %c0_58], %169 {strides = array<i32>} : memref<8x8x32xbf16, #tpu.memory_space<vmem>>, vector<1x8x32xbf16>,
    %170 = arith.index_cast %89 : i32 to index
    %c0_59 = arith.constant 0 : index
    %c0_60 = arith.constant 0 : index
    %171 = vector.load %arg13[%170, %c0_59, %c0_60] : memref<8x8x32xbf16, #tpu.memory_space<vmem>>, vector<1x8x32xbf16>
    %172 = vector.shape_cast %171 : vector<1x8x32xbf16> to vector<8x32xbf16>
    %173 = vector.shape_cast %165 : vector<8x32xbf16> to vector<1x8x32xbf16>
    tpu.vector_store %arg13[%170, %c0_59, %c0_60], %173 {strides = array<i32>} : memref<8x8x32xbf16, #tpu.memory_space<vmem>>, vector<1x8x32xbf16>,
    %c2_i32 = arith.constant 2 : i32
    %c7_i32_61 = arith.constant 7 : i32
    %174 = arith.subi %c7_i32_61, %c2_i32 : i32
    %175 = arith.index_cast %c2_i32 : i32 to index
    %c0_62 = arith.constant 0 : index
    %c0_63 = arith.constant 0 : index
    %176 = vector.load %arg1[%175, %c0_62, %c0_63] : memref<8x8x128xbf16, #tpu.memory_space<vmem>>, vector<1x8x128xbf16>
    %177 = vector.shape_cast %176 : vector<1x8x128xbf16> to vector<8x128xbf16>
    %178 = arith.extf %177 : vector<8x128xbf16> to vector<8x128xf32>
    %cst_64 = arith.constant dense<0.000000e+00> : vector<8x128xf32>
    %179 = tpu.matmul %127, %0, %cst_64 {dimension_numbers = #tpu.dot_dimension_numbers<[1], [0], [0], [1], [0, 0, 1, 1], [], []>} : vector<8x32xbf16>, vector<32x128xbf16>, vector<8x128xf32> -> vector<8x128xf32>
    %180 = arith.addf %178, %179 : vector<8x128xf32>
    %181 = vector.extract_strided_slice %180 {offsets = [0, 0], sizes = [8, 32], strides = [1, 1]} : vector<8x128xf32> to vector<8x32xf32>
    %cst_65 = arith.constant 5.000000e-01 : f32
    %182 = vector.broadcast %cst_65 : f32 to vector<8x32xf32>
    %183 = arith.mulf %182, %181 : vector<8x32xf32>
    %184 = math.tanh %183 : vector<8x32xf32>
    %cst_66 = arith.constant 5.000000e-01 : f32
    %185 = vector.broadcast %cst_66 : f32 to vector<8x32xf32>
    %186 = arith.mulf %185, %184 : vector<8x32xf32>
    %cst_67 = arith.constant 5.000000e-01 : f32
    %187 = vector.broadcast %cst_67 : f32 to vector<8x32xf32>
    %188 = arith.addf %186, %187 : vector<8x32xf32>
    %189 = vector.extract_strided_slice %180 {offsets = [0, 32], sizes = [8, 32], strides = [1, 1]} : vector<8x128xf32> to vector<8x32xf32>
    %cst_68 = arith.constant 5.000000e-01 : f32
    %190 = vector.broadcast %cst_68 : f32 to vector<8x32xf32>
    %191 = arith.mulf %190, %189 : vector<8x32xf32>
    %192 = math.tanh %191 : vector<8x32xf32>
    %cst_69 = arith.constant 5.000000e-01 : f32
    %193 = vector.broadcast %cst_69 : f32 to vector<8x32xf32>
    %194 = arith.mulf %193, %192 : vector<8x32xf32>
    %cst_70 = arith.constant 5.000000e-01 : f32
    %195 = vector.broadcast %cst_70 : f32 to vector<8x32xf32>
    %196 = arith.addf %194, %195 : vector<8x32xf32>
    %197 = vector.extract_strided_slice %180 {offsets = [0, 64], sizes = [8, 32], strides = [1, 1]} : vector<8x128xf32> to vector<8x32xf32>
    %198 = math.tanh %197 : vector<8x32xf32>
    %199 = vector.extract_strided_slice %180 {offsets = [0, 96], sizes = [8, 32], strides = [1, 1]} : vector<8x128xf32> to vector<8x32xf32>
    %cst_71 = arith.constant 5.000000e-01 : f32
    %200 = vector.broadcast %cst_71 : f32 to vector<8x32xf32>
    %201 = arith.mulf %200, %199 : vector<8x32xf32>
    %202 = math.tanh %201 : vector<8x32xf32>
    %cst_72 = arith.constant 5.000000e-01 : f32
    %203 = vector.broadcast %cst_72 : f32 to vector<8x32xf32>
    %204 = arith.mulf %203, %202 : vector<8x32xf32>
    %cst_73 = arith.constant 5.000000e-01 : f32
    %205 = vector.broadcast %cst_73 : f32 to vector<8x32xf32>
    %206 = arith.addf %204, %205 : vector<8x32xf32>
    %207 = arith.mulf %196, %124 : vector<8x32xf32>
    %208 = arith.mulf %188, %198 : vector<8x32xf32>
    %209 = arith.addf %207, %208 : vector<8x32xf32>
    %210 = math.tanh %209 : vector<8x32xf32>
    %211 = arith.mulf %206, %210 : vector<8x32xf32>
    %212 = arith.truncf %211 : vector<8x32xf32> to vector<8x32xbf16>
    %213 = arith.index_cast %174 : i32 to index
    %c0_74 = arith.constant 0 : index
    %c0_75 = arith.constant 0 : index
    %214 = vector.load %arg2[%213, %c0_74, %c0_75] : memref<8x8x128xbf16, #tpu.memory_space<vmem>>, vector<1x8x128xbf16>
    %215 = vector.shape_cast %214 : vector<1x8x128xbf16> to vector<8x128xbf16>
    %216 = arith.extf %215 : vector<8x128xbf16> to vector<8x128xf32>
    %cst_76 = arith.constant dense<0.000000e+00> : vector<8x128xf32>
    %217 = tpu.matmul %165, %1, %cst_76 {dimension_numbers = #tpu.dot_dimension_numbers<[1], [0], [0], [1], [0, 0, 1, 1], [], []>} : vector<8x32xbf16>, vector<32x128xbf16>, vector<8x128xf32> -> vector<8x128xf32>
    %218 = arith.addf %216, %217 : vector<8x128xf32>
    %219 = vector.extract_strided_slice %218 {offsets = [0, 0], sizes = [8, 32], strides = [1, 1]} : vector<8x128xf32> to vector<8x32xf32>
    %cst_77 = arith.constant 5.000000e-01 : f32
    %220 = vector.broadcast %cst_77 : f32 to vector<8x32xf32>
    %221 = arith.mulf %220, %219 : vector<8x32xf32>
    %222 = math.tanh %221 : vector<8x32xf32>
    %cst_78 = arith.constant 5.000000e-01 : f32
    %223 = vector.broadcast %cst_78 : f32 to vector<8x32xf32>
    %224 = arith.mulf %223, %222 : vector<8x32xf32>
    %cst_79 = arith.constant 5.000000e-01 : f32
    %225 = vector.broadcast %cst_79 : f32 to vector<8x32xf32>
    %226 = arith.addf %224, %225 : vector<8x32xf32>
    %227 = vector.extract_strided_slice %218 {offsets = [0, 32], sizes = [8, 32], strides = [1, 1]} : vector<8x128xf32> to vector<8x32xf32>
    %cst_80 = arith.constant 5.000000e-01 : f32
    %228 = vector.broadcast %cst_80 : f32 to vector<8x32xf32>
    %229 = arith.mulf %228, %227 : vector<8x32xf32>
    %230 = math.tanh %229 : vector<8x32xf32>
    %cst_81 = arith.constant 5.000000e-01 : f32
    %231 = vector.broadcast %cst_81 : f32 to vector<8x32xf32>
    %232 = arith.mulf %231, %230 : vector<8x32xf32>
    %cst_82 = arith.constant 5.000000e-01 : f32
    %233 = vector.broadcast %cst_82 : f32 to vector<8x32xf32>
    %234 = arith.addf %232, %233 : vector<8x32xf32>
    %235 = vector.extract_strided_slice %218 {offsets = [0, 64], sizes = [8, 32], strides = [1, 1]} : vector<8x128xf32> to vector<8x32xf32>
    %236 = math.tanh %235 : vector<8x32xf32>
    %237 = vector.extract_strided_slice %218 {offsets = [0, 96], sizes = [8, 32], strides = [1, 1]} : vector<8x128xf32> to vector<8x32xf32>
    %cst_83 = arith.constant 5.000000e-01 : f32
    %238 = vector.broadcast %cst_83 : f32 to vector<8x32xf32>
    %239 = arith.mulf %238, %237 : vector<8x32xf32>
    %240 = math.tanh %239 : vector<8x32xf32>
    %cst_84 = arith.constant 5.000000e-01 : f32
    %241 = vector.broadcast %cst_84 : f32 to vector<8x32xf32>
    %242 = arith.mulf %241, %240 : vector<8x32xf32>
    %cst_85 = arith.constant 5.000000e-01 : f32
    %243 = vector.broadcast %cst_85 : f32 to vector<8x32xf32>
    %244 = arith.addf %242, %243 : vector<8x32xf32>
    %245 = arith.mulf %234, %162 : vector<8x32xf32>
    %246 = arith.mulf %226, %236 : vector<8x32xf32>
    %247 = arith.addf %245, %246 : vector<8x32xf32>
    %248 = math.tanh %247 : vector<8x32xf32>
    %249 = arith.mulf %244, %248 : vector<8x32xf32>
    %250 = arith.truncf %249 : vector<8x32xf32> to vector<8x32xbf16>
    %251 = arith.index_cast %c2_i32 : i32 to index
    %c0_86 = arith.constant 0 : index
    %c0_87 = arith.constant 0 : index
    %252 = vector.load %arg12[%251, %c0_86, %c0_87] : memref<8x8x32xbf16, #tpu.memory_space<vmem>>, vector<1x8x32xbf16>
    %253 = vector.shape_cast %252 : vector<1x8x32xbf16> to vector<8x32xbf16>
    %254 = vector.shape_cast %212 : vector<8x32xbf16> to vector<1x8x32xbf16>
    tpu.vector_store %arg12[%251, %c0_86, %c0_87], %254 {strides = array<i32>} : memref<8x8x32xbf16, #tpu.memory_space<vmem>>, vector<1x8x32xbf16>,
    %255 = arith.index_cast %174 : i32 to index
    %c0_88 = arith.constant 0 : index
    %c0_89 = arith.constant 0 : index
    %256 = vector.load %arg13[%255, %c0_88, %c0_89] : memref<8x8x32xbf16, #tpu.memory_space<vmem>>, vector<1x8x32xbf16>
    %257 = vector.shape_cast %256 : vector<1x8x32xbf16> to vector<8x32xbf16>
    %258 = vector.shape_cast %250 : vector<8x32xbf16> to vector<1x8x32xbf16>
    tpu.vector_store %arg13[%255, %c0_88, %c0_89], %258 {strides = array<i32>} : memref<8x8x32xbf16, #tpu.memory_space<vmem>>, vector<1x8x32xbf16>,
    %c3_i32 = arith.constant 3 : i32
    %c7_i32_90 = arith.constant 7 : i32
    %259 = arith.subi %c7_i32_90, %c3_i32 : i32
    %260 = arith.index_cast %c3_i32 : i32 to index
    %c0_91 = arith.constant 0 : index
    %c0_92 = arith.constant 0 : index
    %261 = vector.load %arg1[%260, %c0_91, %c0_92] : memref<8x8x128xbf16, #tpu.memory_space<vmem>>, vector<1x8x128xbf16>
    %262 = vector.shape_cast %261 : vector<1x8x128xbf16> to vector<8x128xbf16>
    %263 = arith.extf %262 : vector<8x128xbf16> to vector<8x128xf32>
    %cst_93 = arith.constant dense<0.000000e+00> : vector<8x128xf32>
    %264 = tpu.matmul %212, %0, %cst_93 {dimension_numbers = #tpu.dot_dimension_numbers<[1], [0], [0], [1], [0, 0, 1, 1], [], []>} : vector<8x32xbf16>, vector<32x128xbf16>, vector<8x128xf32> -> vector<8x128xf32>
    %265 = arith.addf %263, %264 : vector<8x128xf32>
    %266 = vector.extract_strided_slice %265 {offsets = [0, 0], sizes = [8, 32], strides = [1, 1]} : vector<8x128xf32> to vector<8x32xf32>
    %cst_94 = arith.constant 5.000000e-01 : f32
    %267 = vector.broadcast %cst_94 : f32 to vector<8x32xf32>
    %268 = arith.mulf %267, %266 : vector<8x32xf32>
    %269 = math.tanh %268 : vector<8x32xf32>
    %cst_95 = arith.constant 5.000000e-01 : f32
    %270 = vector.broadcast %cst_95 : f32 to vector<8x32xf32>
    %271 = arith.mulf %270, %269 : vector<8x32xf32>
    %cst_96 = arith.constant 5.000000e-01 : f32
    %272 = vector.broadcast %cst_96 : f32 to vector<8x32xf32>
    %273 = arith.addf %271, %272 : vector<8x32xf32>
    %274 = vector.extract_strided_slice %265 {offsets = [0, 32], sizes = [8, 32], strides = [1, 1]} : vector<8x128xf32> to vector<8x32xf32>
    %cst_97 = arith.constant 5.000000e-01 : f32
    %275 = vector.broadcast %cst_97 : f32 to vector<8x32xf32>
    %276 = arith.mulf %275, %274 : vector<8x32xf32>
    %277 = math.tanh %276 : vector<8x32xf32>
    %cst_98 = arith.constant 5.000000e-01 : f32
    %278 = vector.broadcast %cst_98 : f32 to vector<8x32xf32>
    %279 = arith.mulf %278, %277 : vector<8x32xf32>
    %cst_99 = arith.constant 5.000000e-01 : f32
    %280 = vector.broadcast %cst_99 : f32 to vector<8x32xf32>
    %281 = arith.addf %279, %280 : vector<8x32xf32>
    %282 = vector.extract_strided_slice %265 {offsets = [0, 64], sizes = [8, 32], strides = [1, 1]} : vector<8x128xf32> to vector<8x32xf32>
    %283 = math.tanh %282 : vector<8x32xf32>
    %284 = vector.extract_strided_slice %265 {offsets = [0, 96], sizes = [8, 32], strides = [1, 1]} : vector<8x128xf32> to vector<8x32xf32>
    %cst_100 = arith.constant 5.000000e-01 : f32
    %285 = vector.broadcast %cst_100 : f32 to vector<8x32xf32>
    %286 = arith.mulf %285, %284 : vector<8x32xf32>
    %287 = math.tanh %286 : vector<8x32xf32>
    %cst_101 = arith.constant 5.000000e-01 : f32
    %288 = vector.broadcast %cst_101 : f32 to vector<8x32xf32>
    %289 = arith.mulf %288, %287 : vector<8x32xf32>
    %cst_102 = arith.constant 5.000000e-01 : f32
    %290 = vector.broadcast %cst_102 : f32 to vector<8x32xf32>
    %291 = arith.addf %289, %290 : vector<8x32xf32>
    %292 = arith.mulf %281, %209 : vector<8x32xf32>
    %293 = arith.mulf %273, %283 : vector<8x32xf32>
    %294 = arith.addf %292, %293 : vector<8x32xf32>
    %295 = math.tanh %294 : vector<8x32xf32>
    %296 = arith.mulf %291, %295 : vector<8x32xf32>
    %297 = arith.truncf %296 : vector<8x32xf32> to vector<8x32xbf16>
    %298 = arith.index_cast %259 : i32 to index
    %c0_103 = arith.constant 0 : index
    %c0_104 = arith.constant 0 : index
    %299 = vector.load %arg2[%298, %c0_103, %c0_104] : memref<8x8x128xbf16, #tpu.memory_space<vmem>>, vector<1x8x128xbf16>
    %300 = vector.shape_cast %299 : vector<1x8x128xbf16> to vector<8x128xbf16>
    %301 = arith.extf %300 : vector<8x128xbf16> to vector<8x128xf32>
    %cst_105 = arith.constant dense<0.000000e+00> : vector<8x128xf32>
    %302 = tpu.matmul %250, %1, %cst_105 {dimension_numbers = #tpu.dot_dimension_numbers<[1], [0], [0], [1], [0, 0, 1, 1], [], []>} : vector<8x32xbf16>, vector<32x128xbf16>, vector<8x128xf32> -> vector<8x128xf32>
    %303 = arith.addf %301, %302 : vector<8x128xf32>
    %304 = vector.extract_strided_slice %303 {offsets = [0, 0], sizes = [8, 32], strides = [1, 1]} : vector<8x128xf32> to vector<8x32xf32>
    %cst_106 = arith.constant 5.000000e-01 : f32
    %305 = vector.broadcast %cst_106 : f32 to vector<8x32xf32>
    %306 = arith.mulf %305, %304 : vector<8x32xf32>
    %307 = math.tanh %306 : vector<8x32xf32>
    %cst_107 = arith.constant 5.000000e-01 : f32
    %308 = vector.broadcast %cst_107 : f32 to vector<8x32xf32>
    %309 = arith.mulf %308, %307 : vector<8x32xf32>
    %cst_108 = arith.constant 5.000000e-01 : f32
    %310 = vector.broadcast %cst_108 : f32 to vector<8x32xf32>
    %311 = arith.addf %309, %310 : vector<8x32xf32>
    %312 = vector.extract_strided_slice %303 {offsets = [0, 32], sizes = [8, 32], strides = [1, 1]} : vector<8x128xf32> to vector<8x32xf32>
    %cst_109 = arith.constant 5.000000e-01 : f32
    %313 = vector.broadcast %cst_109 : f32 to vector<8x32xf32>
    %314 = arith.mulf %313, %312 : vector<8x32xf32>
    %315 = math.tanh %314 : vector<8x32xf32>
    %cst_110 = arith.constant 5.000000e-01 : f32
    %316 = vector.broadcast %cst_110 : f32 to vector<8x32xf32>
    %317 = arith.mulf %316, %315 : vector<8x32xf32>
    %cst_111 = arith.constant 5.000000e-01 : f32
    %318 = vector.broadcast %cst_111 : f32 to vector<8x32xf32>
    %319 = arith.addf %317, %318 : vector<8x32xf32>
    %320 = vector.extract_strided_slice %303 {offsets = [0, 64], sizes = [8, 32], strides = [1, 1]} : vector<8x128xf32> to vector<8x32xf32>
    %321 = math.tanh %320 : vector<8x32xf32>
    %322 = vector.extract_strided_slice %303 {offsets = [0, 96], sizes = [8, 32], strides = [1, 1]} : vector<8x128xf32> to vector<8x32xf32>
    %cst_112 = arith.constant 5.000000e-01 : f32
    %323 = vector.broadcast %cst_112 : f32 to vector<8x32xf32>
    %324 = arith.mulf %323, %322 : vector<8x32xf32>
    %325 = math.tanh %324 : vector<8x32xf32>
    %cst_113 = arith.constant 5.000000e-01 : f32
    %326 = vector.broadcast %cst_113 : f32 to vector<8x32xf32>
    %327 = arith.mulf %326, %325 : vector<8x32xf32>
    %cst_114 = arith.constant 5.000000e-01 : f32
    %328 = vector.broadcast %cst_114 : f32 to vector<8x32xf32>
    %329 = arith.addf %327, %328 : vector<8x32xf32>
    %330 = arith.mulf %319, %247 : vector<8x32xf32>
    %331 = arith.mulf %311, %321 : vector<8x32xf32>
    %332 = arith.addf %330, %331 : vector<8x32xf32>
    %333 = math.tanh %332 : vector<8x32xf32>
    %334 = arith.mulf %329, %333 : vector<8x32xf32>
    %335 = arith.truncf %334 : vector<8x32xf32> to vector<8x32xbf16>
    %336 = arith.index_cast %c3_i32 : i32 to index
    %c0_115 = arith.constant 0 : index
    %c0_116 = arith.constant 0 : index
    %337 = vector.load %arg12[%336, %c0_115, %c0_116] : memref<8x8x32xbf16, #tpu.memory_space<vmem>>, vector<1x8x32xbf16>
    %338 = vector.shape_cast %337 : vector<1x8x32xbf16> to vector<8x32xbf16>
    %339 = vector.shape_cast %297 : vector<8x32xbf16> to vector<1x8x32xbf16>
    tpu.vector_store %arg12[%336, %c0_115, %c0_116], %339 {strides = array<i32>} : memref<8x8x32xbf16, #tpu.memory_space<vmem>>, vector<1x8x32xbf16>,
    %340 = arith.index_cast %259 : i32 to index
    %c0_117 = arith.constant 0 : index
    %c0_118 = arith.constant 0 : index
    %341 = vector.load %arg13[%340, %c0_117, %c0_118] : memref<8x8x32xbf16, #tpu.memory_space<vmem>>, vector<1x8x32xbf16>
    %342 = vector.shape_cast %341 : vector<1x8x32xbf16> to vector<8x32xbf16>
    %343 = vector.shape_cast %335 : vector<8x32xbf16> to vector<1x8x32xbf16>
    tpu.vector_store %arg13[%340, %c0_117, %c0_118], %343 {strides = array<i32>} : memref<8x8x32xbf16, #tpu.memory_space<vmem>>, vector<1x8x32xbf16>,
    %c4_i32 = arith.constant 4 : i32
    %c7_i32_119 = arith.constant 7 : i32
    %344 = arith.subi %c7_i32_119, %c4_i32 : i32
    %345 = arith.index_cast %c4_i32 : i32 to index
    %c0_120 = arith.constant 0 : index
    %c0_121 = arith.constant 0 : index
    %346 = vector.load %arg1[%345, %c0_120, %c0_121] : memref<8x8x128xbf16, #tpu.memory_space<vmem>>, vector<1x8x128xbf16>
    %347 = vector.shape_cast %346 : vector<1x8x128xbf16> to vector<8x128xbf16>
    %348 = arith.extf %347 : vector<8x128xbf16> to vector<8x128xf32>
    %cst_122 = arith.constant dense<0.000000e+00> : vector<8x128xf32>
    %349 = tpu.matmul %297, %0, %cst_122 {dimension_numbers = #tpu.dot_dimension_numbers<[1], [0], [0], [1], [0, 0, 1, 1], [], []>} : vector<8x32xbf16>, vector<32x128xbf16>, vector<8x128xf32> -> vector<8x128xf32>
    %350 = arith.addf %348, %349 : vector<8x128xf32>
    %351 = vector.extract_strided_slice %350 {offsets = [0, 0], sizes = [8, 32], strides = [1, 1]} : vector<8x128xf32> to vector<8x32xf32>
    %cst_123 = arith.constant 5.000000e-01 : f32
    %352 = vector.broadcast %cst_123 : f32 to vector<8x32xf32>
    %353 = arith.mulf %352, %351 : vector<8x32xf32>
    %354 = math.tanh %353 : vector<8x32xf32>
    %cst_124 = arith.constant 5.000000e-01 : f32
    %355 = vector.broadcast %cst_124 : f32 to vector<8x32xf32>
    %356 = arith.mulf %355, %354 : vector<8x32xf32>
    %cst_125 = arith.constant 5.000000e-01 : f32
    %357 = vector.broadcast %cst_125 : f32 to vector<8x32xf32>
    %358 = arith.addf %356, %357 : vector<8x32xf32>
    %359 = vector.extract_strided_slice %350 {offsets = [0, 32], sizes = [8, 32], strides = [1, 1]} : vector<8x128xf32> to vector<8x32xf32>
    %cst_126 = arith.constant 5.000000e-01 : f32
    %360 = vector.broadcast %cst_126 : f32 to vector<8x32xf32>
    %361 = arith.mulf %360, %359 : vector<8x32xf32>
    %362 = math.tanh %361 : vector<8x32xf32>
    %cst_127 = arith.constant 5.000000e-01 : f32
    %363 = vector.broadcast %cst_127 : f32 to vector<8x32xf32>
    %364 = arith.mulf %363, %362 : vector<8x32xf32>
    %cst_128 = arith.constant 5.000000e-01 : f32
    %365 = vector.broadcast %cst_128 : f32 to vector<8x32xf32>
    %366 = arith.addf %364, %365 : vector<8x32xf32>
    %367 = vector.extract_strided_slice %350 {offsets = [0, 64], sizes = [8, 32], strides = [1, 1]} : vector<8x128xf32> to vector<8x32xf32>
    %368 = math.tanh %367 : vector<8x32xf32>
    %369 = vector.extract_strided_slice %350 {offsets = [0, 96], sizes = [8, 32], strides = [1, 1]} : vector<8x128xf32> to vector<8x32xf32>
    %cst_129 = arith.constant 5.000000e-01 : f32
    %370 = vector.broadcast %cst_129 : f32 to vector<8x32xf32>
    %371 = arith.mulf %370, %369 : vector<8x32xf32>
    %372 = math.tanh %371 : vector<8x32xf32>
    %cst_130 = arith.constant 5.000000e-01 : f32
    %373 = vector.broadcast %cst_130 : f32 to vector<8x32xf32>
    %374 = arith.mulf %373, %372 : vector<8x32xf32>
    %cst_131 = arith.constant 5.000000e-01 : f32
    %375 = vector.broadcast %cst_131 : f32 to vector<8x32xf32>
    %376 = arith.addf %374, %375 : vector<8x32xf32>
    %377 = arith.mulf %366, %294 : vector<8x32xf32>
    %378 = arith.mulf %358, %368 : vector<8x32xf32>
    %379 = arith.addf %377, %378 : vector<8x32xf32>
    %380 = math.tanh %379 : vector<8x32xf32>
    %381 = arith.mulf %376, %380 : vector<8x32xf32>
    %382 = arith.truncf %381 : vector<8x32xf32> to vector<8x32xbf16>
    %383 = arith.index_cast %344 : i32 to index
    %c0_132 = arith.constant 0 : index
    %c0_133 = arith.constant 0 : index
    %384 = vector.load %arg2[%383, %c0_132, %c0_133] : memref<8x8x128xbf16, #tpu.memory_space<vmem>>, vector<1x8x128xbf16>
    %385 = vector.shape_cast %384 : vector<1x8x128xbf16> to vector<8x128xbf16>
    %386 = arith.extf %385 : vector<8x128xbf16> to vector<8x128xf32>
    %cst_134 = arith.constant dense<0.000000e+00> : vector<8x128xf32>
    %387 = tpu.matmul %335, %1, %cst_134 {dimension_numbers = #tpu.dot_dimension_numbers<[1], [0], [0], [1], [0, 0, 1, 1], [], []>} : vector<8x32xbf16>, vector<32x128xbf16>, vector<8x128xf32> -> vector<8x128xf32>
    %388 = arith.addf %386, %387 : vector<8x128xf32>
    %389 = vector.extract_strided_slice %388 {offsets = [0, 0], sizes = [8, 32], strides = [1, 1]} : vector<8x128xf32> to vector<8x32xf32>
    %cst_135 = arith.constant 5.000000e-01 : f32
    %390 = vector.broadcast %cst_135 : f32 to vector<8x32xf32>
    %391 = arith.mulf %390, %389 : vector<8x32xf32>
    %392 = math.tanh %391 : vector<8x32xf32>
    %cst_136 = arith.constant 5.000000e-01 : f32
    %393 = vector.broadcast %cst_136 : f32 to vector<8x32xf32>
    %394 = arith.mulf %393, %392 : vector<8x32xf32>
    %cst_137 = arith.constant 5.000000e-01 : f32
    %395 = vector.broadcast %cst_137 : f32 to vector<8x32xf32>
    %396 = arith.addf %394, %395 : vector<8x32xf32>
    %397 = vector.extract_strided_slice %388 {offsets = [0, 32], sizes = [8, 32], strides = [1, 1]} : vector<8x128xf32> to vector<8x32xf32>
    %cst_138 = arith.constant 5.000000e-01 : f32
    %398 = vector.broadcast %cst_138 : f32 to vector<8x32xf32>
    %399 = arith.mulf %398, %397 : vector<8x32xf32>
    %400 = math.tanh %399 : vector<8x32xf32>
    %cst_139 = arith.constant 5.000000e-01 : f32
    %401 = vector.broadcast %cst_139 : f32 to vector<8x32xf32>
    %402 = arith.mulf %401, %400 : vector<8x32xf32>
    %cst_140 = arith.constant 5.000000e-01 : f32
    %403 = vector.broadcast %cst_140 : f32 to vector<8x32xf32>
    %404 = arith.addf %402, %403 : vector<8x32xf32>
    %405 = vector.extract_strided_slice %388 {offsets = [0, 64], sizes = [8, 32], strides = [1, 1]} : vector<8x128xf32> to vector<8x32xf32>
    %406 = math.tanh %405 : vector<8x32xf32>
    %407 = vector.extract_strided_slice %388 {offsets = [0, 96], sizes = [8, 32], strides = [1, 1]} : vector<8x128xf32> to vector<8x32xf32>
    %cst_141 = arith.constant 5.000000e-01 : f32
    %408 = vector.broadcast %cst_141 : f32 to vector<8x32xf32>
    %409 = arith.mulf %408, %407 : vector<8x32xf32>
    %410 = math.tanh %409 : vector<8x32xf32>
    %cst_142 = arith.constant 5.000000e-01 : f32
    %411 = vector.broadcast %cst_142 : f32 to vector<8x32xf32>
    %412 = arith.mulf %411, %410 : vector<8x32xf32>
    %cst_143 = arith.constant 5.000000e-01 : f32
    %413 = vector.broadcast %cst_143 : f32 to vector<8x32xf32>
    %414 = arith.addf %412, %413 : vector<8x32xf32>
    %415 = arith.mulf %404, %332 : vector<8x32xf32>
    %416 = arith.mulf %396, %406 : vector<8x32xf32>
    %417 = arith.addf %415, %416 : vector<8x32xf32>
    %418 = math.tanh %417 : vector<8x32xf32>
    %419 = arith.mulf %414, %418 : vector<8x32xf32>
    %420 = arith.truncf %419 : vector<8x32xf32> to vector<8x32xbf16>
    %421 = arith.index_cast %c4_i32 : i32 to index
    %c0_144 = arith.constant 0 : index
    %c0_145 = arith.constant 0 : index
    %422 = vector.load %arg12[%421, %c0_144, %c0_145] : memref<8x8x32xbf16, #tpu.memory_space<vmem>>, vector<1x8x32xbf16>
    %423 = vector.shape_cast %422 : vector<1x8x32xbf16> to vector<8x32xbf16>
    %424 = vector.shape_cast %382 : vector<8x32xbf16> to vector<1x8x32xbf16>
    tpu.vector_store %arg12[%421, %c0_144, %c0_145], %424 {strides = array<i32>} : memref<8x8x32xbf16, #tpu.memory_space<vmem>>, vector<1x8x32xbf16>,
    %425 = arith.index_cast %344 : i32 to index
    %c0_146 = arith.constant 0 : index
    %c0_147 = arith.constant 0 : index
    %426 = vector.load %arg13[%425, %c0_146, %c0_147] : memref<8x8x32xbf16, #tpu.memory_space<vmem>>, vector<1x8x32xbf16>
    %427 = vector.shape_cast %426 : vector<1x8x32xbf16> to vector<8x32xbf16>
    %428 = vector.shape_cast %420 : vector<8x32xbf16> to vector<1x8x32xbf16>
    tpu.vector_store %arg13[%425, %c0_146, %c0_147], %428 {strides = array<i32>} : memref<8x8x32xbf16, #tpu.memory_space<vmem>>, vector<1x8x32xbf16>,
    %c5_i32 = arith.constant 5 : i32
    %c7_i32_148 = arith.constant 7 : i32
    %429 = arith.subi %c7_i32_148, %c5_i32 : i32
    %430 = arith.index_cast %c5_i32 : i32 to index
    %c0_149 = arith.constant 0 : index
    %c0_150 = arith.constant 0 : index
    %431 = vector.load %arg1[%430, %c0_149, %c0_150] : memref<8x8x128xbf16, #tpu.memory_space<vmem>>, vector<1x8x128xbf16>
    %432 = vector.shape_cast %431 : vector<1x8x128xbf16> to vector<8x128xbf16>
    %433 = arith.extf %432 : vector<8x128xbf16> to vector<8x128xf32>
    %cst_151 = arith.constant dense<0.000000e+00> : vector<8x128xf32>
    %434 = tpu.matmul %382, %0, %cst_151 {dimension_numbers = #tpu.dot_dimension_numbers<[1], [0], [0], [1], [0, 0, 1, 1], [], []>} : vector<8x32xbf16>, vector<32x128xbf16>, vector<8x128xf32> -> vector<8x128xf32>
    %435 = arith.addf %433, %434 : vector<8x128xf32>
    %436 = vector.extract_strided_slice %435 {offsets = [0, 0], sizes = [8, 32], strides = [1, 1]} : vector<8x128xf32> to vector<8x32xf32>
    %cst_152 = arith.constant 5.000000e-01 : f32
    %437 = vector.broadcast %cst_152 : f32 to vector<8x32xf32>
    %438 = arith.mulf %437, %436 : vector<8x32xf32>
    %439 = math.tanh %438 : vector<8x32xf32>
    %cst_153 = arith.constant 5.000000e-01 : f32
    %440 = vector.broadcast %cst_153 : f32 to vector<8x32xf32>
    %441 = arith.mulf %440, %439 : vector<8x32xf32>
    %cst_154 = arith.constant 5.000000e-01 : f32
    %442 = vector.broadcast %cst_154 : f32 to vector<8x32xf32>
    %443 = arith.addf %441, %442 : vector<8x32xf32>
    %444 = vector.extract_strided_slice %435 {offsets = [0, 32], sizes = [8, 32], strides = [1, 1]} : vector<8x128xf32> to vector<8x32xf32>
    %cst_155 = arith.constant 5.000000e-01 : f32
    %445 = vector.broadcast %cst_155 : f32 to vector<8x32xf32>
    %446 = arith.mulf %445, %444 : vector<8x32xf32>
    %447 = math.tanh %446 : vector<8x32xf32>
    %cst_156 = arith.constant 5.000000e-01 : f32
    %448 = vector.broadcast %cst_156 : f32 to vector<8x32xf32>
    %449 = arith.mulf %448, %447 : vector<8x32xf32>
    %cst_157 = arith.constant 5.000000e-01 : f32
    %450 = vector.broadcast %cst_157 : f32 to vector<8x32xf32>
    %451 = arith.addf %449, %450 : vector<8x32xf32>
    %452 = vector.extract_strided_slice %435 {offsets = [0, 64], sizes = [8, 32], strides = [1, 1]} : vector<8x128xf32> to vector<8x32xf32>
    %453 = math.tanh %452 : vector<8x32xf32>
    %454 = vector.extract_strided_slice %435 {offsets = [0, 96], sizes = [8, 32], strides = [1, 1]} : vector<8x128xf32> to vector<8x32xf32>
    %cst_158 = arith.constant 5.000000e-01 : f32
    %455 = vector.broadcast %cst_158 : f32 to vector<8x32xf32>
    %456 = arith.mulf %455, %454 : vector<8x32xf32>
    %457 = math.tanh %456 : vector<8x32xf32>
    %cst_159 = arith.constant 5.000000e-01 : f32
    %458 = vector.broadcast %cst_159 : f32 to vector<8x32xf32>
    %459 = arith.mulf %458, %457 : vector<8x32xf32>
    %cst_160 = arith.constant 5.000000e-01 : f32
    %460 = vector.broadcast %cst_160 : f32 to vector<8x32xf32>
    %461 = arith.addf %459, %460 : vector<8x32xf32>
    %462 = arith.mulf %451, %379 : vector<8x32xf32>
    %463 = arith.mulf %443, %453 : vector<8x32xf32>
    %464 = arith.addf %462, %463 : vector<8x32xf32>
    %465 = math.tanh %464 : vector<8x32xf32>
    %466 = arith.mulf %461, %465 : vector<8x32xf32>
    %467 = arith.truncf %466 : vector<8x32xf32> to vector<8x32xbf16>
    %468 = arith.index_cast %429 : i32 to index
    %c0_161 = arith.constant 0 : index
    %c0_162 = arith.constant 0 : index
    %469 = vector.load %arg2[%468, %c0_161, %c0_162] : memref<8x8x128xbf16, #tpu.memory_space<vmem>>, vector<1x8x128xbf16>
    %470 = vector.shape_cast %469 : vector<1x8x128xbf16> to vector<8x128xbf16>
    %471 = arith.extf %470 : vector<8x128xbf16> to vector<8x128xf32>
    %cst_163 = arith.constant dense<0.000000e+00> : vector<8x128xf32>
    %472 = tpu.matmul %420, %1, %cst_163 {dimension_numbers = #tpu.dot_dimension_numbers<[1], [0], [0], [1], [0, 0, 1, 1], [], []>} : vector<8x32xbf16>, vector<32x128xbf16>, vector<8x128xf32> -> vector<8x128xf32>
    %473 = arith.addf %471, %472 : vector<8x128xf32>
    %474 = vector.extract_strided_slice %473 {offsets = [0, 0], sizes = [8, 32], strides = [1, 1]} : vector<8x128xf32> to vector<8x32xf32>
    %cst_164 = arith.constant 5.000000e-01 : f32
    %475 = vector.broadcast %cst_164 : f32 to vector<8x32xf32>
    %476 = arith.mulf %475, %474 : vector<8x32xf32>
    %477 = math.tanh %476 : vector<8x32xf32>
    %cst_165 = arith.constant 5.000000e-01 : f32
    %478 = vector.broadcast %cst_165 : f32 to vector<8x32xf32>
    %479 = arith.mulf %478, %477 : vector<8x32xf32>
    %cst_166 = arith.constant 5.000000e-01 : f32
    %480 = vector.broadcast %cst_166 : f32 to vector<8x32xf32>
    %481 = arith.addf %479, %480 : vector<8x32xf32>
    %482 = vector.extract_strided_slice %473 {offsets = [0, 32], sizes = [8, 32], strides = [1, 1]} : vector<8x128xf32> to vector<8x32xf32>
    %cst_167 = arith.constant 5.000000e-01 : f32
    %483 = vector.broadcast %cst_167 : f32 to vector<8x32xf32>
    %484 = arith.mulf %483, %482 : vector<8x32xf32>
    %485 = math.tanh %484 : vector<8x32xf32>
    %cst_168 = arith.constant 5.000000e-01 : f32
    %486 = vector.broadcast %cst_168 : f32 to vector<8x32xf32>
    %487 = arith.mulf %486, %485 : vector<8x32xf32>
    %cst_169 = arith.constant 5.000000e-01 : f32
    %488 = vector.broadcast %cst_169 : f32 to vector<8x32xf32>
    %489 = arith.addf %487, %488 : vector<8x32xf32>
    %490 = vector.extract_strided_slice %473 {offsets = [0, 64], sizes = [8, 32], strides = [1, 1]} : vector<8x128xf32> to vector<8x32xf32>
    %491 = math.tanh %490 : vector<8x32xf32>
    %492 = vector.extract_strided_slice %473 {offsets = [0, 96], sizes = [8, 32], strides = [1, 1]} : vector<8x128xf32> to vector<8x32xf32>
    %cst_170 = arith.constant 5.000000e-01 : f32
    %493 = vector.broadcast %cst_170 : f32 to vector<8x32xf32>
    %494 = arith.mulf %493, %492 : vector<8x32xf32>
    %495 = math.tanh %494 : vector<8x32xf32>
    %cst_171 = arith.constant 5.000000e-01 : f32
    %496 = vector.broadcast %cst_171 : f32 to vector<8x32xf32>
    %497 = arith.mulf %496, %495 : vector<8x32xf32>
    %cst_172 = arith.constant 5.000000e-01 : f32
    %498 = vector.broadcast %cst_172 : f32 to vector<8x32xf32>
    %499 = arith.addf %497, %498 : vector<8x32xf32>
    %500 = arith.mulf %489, %417 : vector<8x32xf32>
    %501 = arith.mulf %481, %491 : vector<8x32xf32>
    %502 = arith.addf %500, %501 : vector<8x32xf32>
    %503 = math.tanh %502 : vector<8x32xf32>
    %504 = arith.mulf %499, %503 : vector<8x32xf32>
    %505 = arith.truncf %504 : vector<8x32xf32> to vector<8x32xbf16>
    %506 = arith.index_cast %c5_i32 : i32 to index
    %c0_173 = arith.constant 0 : index
    %c0_174 = arith.constant 0 : index
    %507 = vector.load %arg12[%506, %c0_173, %c0_174] : memref<8x8x32xbf16, #tpu.memory_space<vmem>>, vector<1x8x32xbf16>
    %508 = vector.shape_cast %507 : vector<1x8x32xbf16> to vector<8x32xbf16>
    %509 = vector.shape_cast %467 : vector<8x32xbf16> to vector<1x8x32xbf16>
    tpu.vector_store %arg12[%506, %c0_173, %c0_174], %509 {strides = array<i32>} : memref<8x8x32xbf16, #tpu.memory_space<vmem>>, vector<1x8x32xbf16>,
    %510 = arith.index_cast %429 : i32 to index
    %c0_175 = arith.constant 0 : index
    %c0_176 = arith.constant 0 : index
    %511 = vector.load %arg13[%510, %c0_175, %c0_176] : memref<8x8x32xbf16, #tpu.memory_space<vmem>>, vector<1x8x32xbf16>
    %512 = vector.shape_cast %511 : vector<1x8x32xbf16> to vector<8x32xbf16>
    %513 = vector.shape_cast %505 : vector<8x32xbf16> to vector<1x8x32xbf16>
    tpu.vector_store %arg13[%510, %c0_175, %c0_176], %513 {strides = array<i32>} : memref<8x8x32xbf16, #tpu.memory_space<vmem>>, vector<1x8x32xbf16>,
    %c6_i32 = arith.constant 6 : i32
    %c7_i32_177 = arith.constant 7 : i32
    %514 = arith.subi %c7_i32_177, %c6_i32 : i32
    %515 = arith.index_cast %c6_i32 : i32 to index
    %c0_178 = arith.constant 0 : index
    %c0_179 = arith.constant 0 : index
    %516 = vector.load %arg1[%515, %c0_178, %c0_179] : memref<8x8x128xbf16, #tpu.memory_space<vmem>>, vector<1x8x128xbf16>
    %517 = vector.shape_cast %516 : vector<1x8x128xbf16> to vector<8x128xbf16>
    %518 = arith.extf %517 : vector<8x128xbf16> to vector<8x128xf32>
    %cst_180 = arith.constant dense<0.000000e+00> : vector<8x128xf32>
    %519 = tpu.matmul %467, %0, %cst_180 {dimension_numbers = #tpu.dot_dimension_numbers<[1], [0], [0], [1], [0, 0, 1, 1], [], []>} : vector<8x32xbf16>, vector<32x128xbf16>, vector<8x128xf32> -> vector<8x128xf32>
    %520 = arith.addf %518, %519 : vector<8x128xf32>
    %521 = vector.extract_strided_slice %520 {offsets = [0, 0], sizes = [8, 32], strides = [1, 1]} : vector<8x128xf32> to vector<8x32xf32>
    %cst_181 = arith.constant 5.000000e-01 : f32
    %522 = vector.broadcast %cst_181 : f32 to vector<8x32xf32>
    %523 = arith.mulf %522, %521 : vector<8x32xf32>
    %524 = math.tanh %523 : vector<8x32xf32>
    %cst_182 = arith.constant 5.000000e-01 : f32
    %525 = vector.broadcast %cst_182 : f32 to vector<8x32xf32>
    %526 = arith.mulf %525, %524 : vector<8x32xf32>
    %cst_183 = arith.constant 5.000000e-01 : f32
    %527 = vector.broadcast %cst_183 : f32 to vector<8x32xf32>
    %528 = arith.addf %526, %527 : vector<8x32xf32>
    %529 = vector.extract_strided_slice %520 {offsets = [0, 32], sizes = [8, 32], strides = [1, 1]} : vector<8x128xf32> to vector<8x32xf32>
    %cst_184 = arith.constant 5.000000e-01 : f32
    %530 = vector.broadcast %cst_184 : f32 to vector<8x32xf32>
    %531 = arith.mulf %530, %529 : vector<8x32xf32>
    %532 = math.tanh %531 : vector<8x32xf32>
    %cst_185 = arith.constant 5.000000e-01 : f32
    %533 = vector.broadcast %cst_185 : f32 to vector<8x32xf32>
    %534 = arith.mulf %533, %532 : vector<8x32xf32>
    %cst_186 = arith.constant 5.000000e-01 : f32
    %535 = vector.broadcast %cst_186 : f32 to vector<8x32xf32>
    %536 = arith.addf %534, %535 : vector<8x32xf32>
    %537 = vector.extract_strided_slice %520 {offsets = [0, 64], sizes = [8, 32], strides = [1, 1]} : vector<8x128xf32> to vector<8x32xf32>
    %538 = math.tanh %537 : vector<8x32xf32>
    %539 = vector.extract_strided_slice %520 {offsets = [0, 96], sizes = [8, 32], strides = [1, 1]} : vector<8x128xf32> to vector<8x32xf32>
    %cst_187 = arith.constant 5.000000e-01 : f32
    %540 = vector.broadcast %cst_187 : f32 to vector<8x32xf32>
    %541 = arith.mulf %540, %539 : vector<8x32xf32>
    %542 = math.tanh %541 : vector<8x32xf32>
    %cst_188 = arith.constant 5.000000e-01 : f32
    %543 = vector.broadcast %cst_188 : f32 to vector<8x32xf32>
    %544 = arith.mulf %543, %542 : vector<8x32xf32>
    %cst_189 = arith.constant 5.000000e-01 : f32
    %545 = vector.broadcast %cst_189 : f32 to vector<8x32xf32>
    %546 = arith.addf %544, %545 : vector<8x32xf32>
    %547 = arith.mulf %536, %464 : vector<8x32xf32>
    %548 = arith.mulf %528, %538 : vector<8x32xf32>
    %549 = arith.addf %547, %548 : vector<8x32xf32>
    %550 = math.tanh %549 : vector<8x32xf32>
    %551 = arith.mulf %546, %550 : vector<8x32xf32>
    %552 = arith.truncf %551 : vector<8x32xf32> to vector<8x32xbf16>
    %553 = arith.index_cast %514 : i32 to index
    %c0_190 = arith.constant 0 : index
    %c0_191 = arith.constant 0 : index
    %554 = vector.load %arg2[%553, %c0_190, %c0_191] : memref<8x8x128xbf16, #tpu.memory_space<vmem>>, vector<1x8x128xbf16>
    %555 = vector.shape_cast %554 : vector<1x8x128xbf16> to vector<8x128xbf16>
    %556 = arith.extf %555 : vector<8x128xbf16> to vector<8x128xf32>
    %cst_192 = arith.constant dense<0.000000e+00> : vector<8x128xf32>
    %557 = tpu.matmul %505, %1, %cst_192 {dimension_numbers = #tpu.dot_dimension_numbers<[1], [0], [0], [1], [0, 0, 1, 1], [], []>} : vector<8x32xbf16>, vector<32x128xbf16>, vector<8x128xf32> -> vector<8x128xf32>
    %558 = arith.addf %556, %557 : vector<8x128xf32>
    %559 = vector.extract_strided_slice %558 {offsets = [0, 0], sizes = [8, 32], strides = [1, 1]} : vector<8x128xf32> to vector<8x32xf32>
    %cst_193 = arith.constant 5.000000e-01 : f32
    %560 = vector.broadcast %cst_193 : f32 to vector<8x32xf32>
    %561 = arith.mulf %560, %559 : vector<8x32xf32>
    %562 = math.tanh %561 : vector<8x32xf32>
    %cst_194 = arith.constant 5.000000e-01 : f32
    %563 = vector.broadcast %cst_194 : f32 to vector<8x32xf32>
    %564 = arith.mulf %563, %562 : vector<8x32xf32>
    %cst_195 = arith.constant 5.000000e-01 : f32
    %565 = vector.broadcast %cst_195 : f32 to vector<8x32xf32>
    %566 = arith.addf %564, %565 : vector<8x32xf32>
    %567 = vector.extract_strided_slice %558 {offsets = [0, 32], sizes = [8, 32], strides = [1, 1]} : vector<8x128xf32> to vector<8x32xf32>
    %cst_196 = arith.constant 5.000000e-01 : f32
    %568 = vector.broadcast %cst_196 : f32 to vector<8x32xf32>
    %569 = arith.mulf %568, %567 : vector<8x32xf32>
    %570 = math.tanh %569 : vector<8x32xf32>
    %cst_197 = arith.constant 5.000000e-01 : f32
    %571 = vector.broadcast %cst_197 : f32 to vector<8x32xf32>
    %572 = arith.mulf %571, %570 : vector<8x32xf32>
    %cst_198 = arith.constant 5.000000e-01 : f32
    %573 = vector.broadcast %cst_198 : f32 to vector<8x32xf32>
    %574 = arith.addf %572, %573 : vector<8x32xf32>
    %575 = vector.extract_strided_slice %558 {offsets = [0, 64], sizes = [8, 32], strides = [1, 1]} : vector<8x128xf32> to vector<8x32xf32>
    %576 = math.tanh %575 : vector<8x32xf32>
    %577 = vector.extract_strided_slice %558 {offsets = [0, 96], sizes = [8, 32], strides = [1, 1]} : vector<8x128xf32> to vector<8x32xf32>
    %cst_199 = arith.constant 5.000000e-01 : f32
    %578 = vector.broadcast %cst_199 : f32 to vector<8x32xf32>
    %579 = arith.mulf %578, %577 : vector<8x32xf32>
    %580 = math.tanh %579 : vector<8x32xf32>
    %cst_200 = arith.constant 5.000000e-01 : f32
    %581 = vector.broadcast %cst_200 : f32 to vector<8x32xf32>
    %582 = arith.mulf %581, %580 : vector<8x32xf32>
    %cst_201 = arith.constant 5.000000e-01 : f32
    %583 = vector.broadcast %cst_201 : f32 to vector<8x32xf32>
    %584 = arith.addf %582, %583 : vector<8x32xf32>
    %585 = arith.mulf %574, %502 : vector<8x32xf32>
    %586 = arith.mulf %566, %576 : vector<8x32xf32>
    %587 = arith.addf %585, %586 : vector<8x32xf32>
    %588 = math.tanh %587 : vector<8x32xf32>
    %589 = arith.mulf %584, %588 : vector<8x32xf32>
    %590 = arith.truncf %589 : vector<8x32xf32> to vector<8x32xbf16>
    %591 = arith.index_cast %c6_i32 : i32 to index
    %c0_202 = arith.constant 0 : index
    %c0_203 = arith.constant 0 : index
    %592 = vector.load %arg12[%591, %c0_202, %c0_203] : memref<8x8x32xbf16, #tpu.memory_space<vmem>>, vector<1x8x32xbf16>
    %593 = vector.shape_cast %592 : vector<1x8x32xbf16> to vector<8x32xbf16>
    %594 = vector.shape_cast %552 : vector<8x32xbf16> to vector<1x8x32xbf16>
    tpu.vector_store %arg12[%591, %c0_202, %c0_203], %594 {strides = array<i32>} : memref<8x8x32xbf16, #tpu.memory_space<vmem>>, vector<1x8x32xbf16>,
    %595 = arith.index_cast %514 : i32 to index
    %c0_204 = arith.constant 0 : index
    %c0_205 = arith.constant 0 : index
    %596 = vector.load %arg13[%595, %c0_204, %c0_205] : memref<8x8x32xbf16, #tpu.memory_space<vmem>>, vector<1x8x32xbf16>
    %597 = vector.shape_cast %596 : vector<1x8x32xbf16> to vector<8x32xbf16>
    %598 = vector.shape_cast %590 : vector<8x32xbf16> to vector<1x8x32xbf16>
    tpu.vector_store %arg13[%595, %c0_204, %c0_205], %598 {strides = array<i32>} : memref<8x8x32xbf16, #tpu.memory_space<vmem>>, vector<1x8x32xbf16>,
    %c7_i32_206 = arith.constant 7 : i32
    %c7_i32_207 = arith.constant 7 : i32
    %599 = arith.subi %c7_i32_207, %c7_i32_206 : i32
    %600 = arith.index_cast %c7_i32_206 : i32 to index
    %c0_208 = arith.constant 0 : index
    %c0_209 = arith.constant 0 : index
    %601 = vector.load %arg1[%600, %c0_208, %c0_209] : memref<8x8x128xbf16, #tpu.memory_space<vmem>>, vector<1x8x128xbf16>
    %602 = vector.shape_cast %601 : vector<1x8x128xbf16> to vector<8x128xbf16>
    %603 = arith.extf %602 : vector<8x128xbf16> to vector<8x128xf32>
    %cst_210 = arith.constant dense<0.000000e+00> : vector<8x128xf32>
    %604 = tpu.matmul %552, %0, %cst_210 {dimension_numbers = #tpu.dot_dimension_numbers<[1], [0], [0], [1], [0, 0, 1, 1], [], []>} : vector<8x32xbf16>, vector<32x128xbf16>, vector<8x128xf32> -> vector<8x128xf32>
    %605 = arith.addf %603, %604 : vector<8x128xf32>
    %606 = vector.extract_strided_slice %605 {offsets = [0, 0], sizes = [8, 32], strides = [1, 1]} : vector<8x128xf32> to vector<8x32xf32>
    %cst_211 = arith.constant 5.000000e-01 : f32
    %607 = vector.broadcast %cst_211 : f32 to vector<8x32xf32>
    %608 = arith.mulf %607, %606 : vector<8x32xf32>
    %609 = math.tanh %608 : vector<8x32xf32>
    %cst_212 = arith.constant 5.000000e-01 : f32
    %610 = vector.broadcast %cst_212 : f32 to vector<8x32xf32>
    %611 = arith.mulf %610, %609 : vector<8x32xf32>
    %cst_213 = arith.constant 5.000000e-01 : f32
    %612 = vector.broadcast %cst_213 : f32 to vector<8x32xf32>
    %613 = arith.addf %611, %612 : vector<8x32xf32>
    %614 = vector.extract_strided_slice %605 {offsets = [0, 32], sizes = [8, 32], strides = [1, 1]} : vector<8x128xf32> to vector<8x32xf32>
    %cst_214 = arith.constant 5.000000e-01 : f32
    %615 = vector.broadcast %cst_214 : f32 to vector<8x32xf32>
    %616 = arith.mulf %615, %614 : vector<8x32xf32>
    %617 = math.tanh %616 : vector<8x32xf32>
    %cst_215 = arith.constant 5.000000e-01 : f32
    %618 = vector.broadcast %cst_215 : f32 to vector<8x32xf32>
    %619 = arith.mulf %618, %617 : vector<8x32xf32>
    %cst_216 = arith.constant 5.000000e-01 : f32
    %620 = vector.broadcast %cst_216 : f32 to vector<8x32xf32>
    %621 = arith.addf %619, %620 : vector<8x32xf32>
    %622 = vector.extract_strided_slice %605 {offsets = [0, 64], sizes = [8, 32], strides = [1, 1]} : vector<8x128xf32> to vector<8x32xf32>
    %623 = math.tanh %622 : vector<8x32xf32>
    %624 = vector.extract_strided_slice %605 {offsets = [0, 96], sizes = [8, 32], strides = [1, 1]} : vector<8x128xf32> to vector<8x32xf32>
    %cst_217 = arith.constant 5.000000e-01 : f32
    %625 = vector.broadcast %cst_217 : f32 to vector<8x32xf32>
    %626 = arith.mulf %625, %624 : vector<8x32xf32>
    %627 = math.tanh %626 : vector<8x32xf32>
    %cst_218 = arith.constant 5.000000e-01 : f32
    %628 = vector.broadcast %cst_218 : f32 to vector<8x32xf32>
    %629 = arith.mulf %628, %627 : vector<8x32xf32>
    %cst_219 = arith.constant 5.000000e-01 : f32
    %630 = vector.broadcast %cst_219 : f32 to vector<8x32xf32>
    %631 = arith.addf %629, %630 : vector<8x32xf32>
    %632 = arith.mulf %621, %549 : vector<8x32xf32>
    %633 = arith.mulf %613, %623 : vector<8x32xf32>
    %634 = arith.addf %632, %633 : vector<8x32xf32>
    %635 = math.tanh %634 : vector<8x32xf32>
    %636 = arith.mulf %631, %635 : vector<8x32xf32>
    %637 = arith.truncf %636 : vector<8x32xf32> to vector<8x32xbf16>
    %638 = arith.index_cast %599 : i32 to index
    %c0_220 = arith.constant 0 : index
    %c0_221 = arith.constant 0 : index
    %639 = vector.load %arg2[%638, %c0_220, %c0_221] : memref<8x8x128xbf16, #tpu.memory_space<vmem>>, vector<1x8x128xbf16>
    %640 = vector.shape_cast %639 : vector<1x8x128xbf16> to vector<8x128xbf16>
    %641 = arith.extf %640 : vector<8x128xbf16> to vector<8x128xf32>
    %cst_222 = arith.constant dense<0.000000e+00> : vector<8x128xf32>
    %642 = tpu.matmul %590, %1, %cst_222 {dimension_numbers = #tpu.dot_dimension_numbers<[1], [0], [0], [1], [0, 0, 1, 1], [], []>} : vector<8x32xbf16>, vector<32x128xbf16>, vector<8x128xf32> -> vector<8x128xf32>
    %643 = arith.addf %641, %642 : vector<8x128xf32>
    %644 = vector.extract_strided_slice %643 {offsets = [0, 0], sizes = [8, 32], strides = [1, 1]} : vector<8x128xf32> to vector<8x32xf32>
    %cst_223 = arith.constant 5.000000e-01 : f32
    %645 = vector.broadcast %cst_223 : f32 to vector<8x32xf32>
    %646 = arith.mulf %645, %644 : vector<8x32xf32>
    %647 = math.tanh %646 : vector<8x32xf32>
    %cst_224 = arith.constant 5.000000e-01 : f32
    %648 = vector.broadcast %cst_224 : f32 to vector<8x32xf32>
    %649 = arith.mulf %648, %647 : vector<8x32xf32>
    %cst_225 = arith.constant 5.000000e-01 : f32
    %650 = vector.broadcast %cst_225 : f32 to vector<8x32xf32>
    %651 = arith.addf %649, %650 : vector<8x32xf32>
    %652 = vector.extract_strided_slice %643 {offsets = [0, 32], sizes = [8, 32], strides = [1, 1]} : vector<8x128xf32> to vector<8x32xf32>
    %cst_226 = arith.constant 5.000000e-01 : f32
    %653 = vector.broadcast %cst_226 : f32 to vector<8x32xf32>
    %654 = arith.mulf %653, %652 : vector<8x32xf32>
    %655 = math.tanh %654 : vector<8x32xf32>
    %cst_227 = arith.constant 5.000000e-01 : f32
    %656 = vector.broadcast %cst_227 : f32 to vector<8x32xf32>
    %657 = arith.mulf %656, %655 : vector<8x32xf32>
    %cst_228 = arith.constant 5.000000e-01 : f32
    %658 = vector.broadcast %cst_228 : f32 to vector<8x32xf32>
    %659 = arith.addf %657, %658 : vector<8x32xf32>
    %660 = vector.extract_strided_slice %643 {offsets = [0, 64], sizes = [8, 32], strides = [1, 1]} : vector<8x128xf32> to vector<8x32xf32>
    %661 = math.tanh %660 : vector<8x32xf32>
    %662 = vector.extract_strided_slice %643 {offsets = [0, 96], sizes = [8, 32], strides = [1, 1]} : vector<8x128xf32> to vector<8x32xf32>
    %cst_229 = arith.constant 5.000000e-01 : f32
    %663 = vector.broadcast %cst_229 : f32 to vector<8x32xf32>
    %664 = arith.mulf %663, %662 : vector<8x32xf32>
    %665 = math.tanh %664 : vector<8x32xf32>
    %cst_230 = arith.constant 5.000000e-01 : f32
    %666 = vector.broadcast %cst_230 : f32 to vector<8x32xf32>
    %667 = arith.mulf %666, %665 : vector<8x32xf32>
    %cst_231 = arith.constant 5.000000e-01 : f32
    %668 = vector.broadcast %cst_231 : f32 to vector<8x32xf32>
    %669 = arith.addf %667, %668 : vector<8x32xf32>
    %670 = arith.mulf %659, %587 : vector<8x32xf32>
    %671 = arith.mulf %651, %661 : vector<8x32xf32>
    %672 = arith.addf %670, %671 : vector<8x32xf32>
    %673 = math.tanh %672 : vector<8x32xf32>
    %674 = arith.mulf %669, %673 : vector<8x32xf32>
    %675 = arith.truncf %674 : vector<8x32xf32> to vector<8x32xbf16>
    %676 = arith.index_cast %c7_i32_206 : i32 to index
    %c0_232 = arith.constant 0 : index
    %c0_233 = arith.constant 0 : index
    %677 = vector.load %arg12[%676, %c0_232, %c0_233] : memref<8x8x32xbf16, #tpu.memory_space<vmem>>, vector<1x8x32xbf16>
    %678 = vector.shape_cast %677 : vector<1x8x32xbf16> to vector<8x32xbf16>
    %679 = vector.shape_cast %637 : vector<8x32xbf16> to vector<1x8x32xbf16>
    tpu.vector_store %arg12[%676, %c0_232, %c0_233], %679 {strides = array<i32>} : memref<8x8x32xbf16, #tpu.memory_space<vmem>>, vector<1x8x32xbf16>,
    %680 = arith.index_cast %599 : i32 to index
    %c0_234 = arith.constant 0 : index
    %c0_235 = arith.constant 0 : index
    %681 = vector.load %arg13[%680, %c0_234, %c0_235] : memref<8x8x32xbf16, #tpu.memory_space<vmem>>, vector<1x8x32xbf16>
    %682 = vector.shape_cast %681 : vector<1x8x32xbf16> to vector<8x32xbf16>
    %683 = vector.shape_cast %675 : vector<8x32xbf16> to vector<1x8x32xbf16>
    tpu.vector_store %arg13[%680, %c0_234, %c0_235], %683 {strides = array<i32>} : memref<8x8x32xbf16, #tpu.memory_space<vmem>>, vector<1x8x32xbf16>,
    %c8_i32 = arith.constant 8 : i32
    %c0_236 = arith.constant 0 : index
    %c0_237 = arith.constant 0 : index
    %c0_238 = arith.constant 0 : index
    %684 = vector.load %arg12[%c0_236, %c0_237, %c0_238] : memref<8x8x32xbf16, #tpu.memory_space<vmem>>, vector<8x8x32xbf16>
    %685 = vector.shape_cast %684 : vector<8x8x32xbf16> to vector<64x32xbf16>
    %c0_239 = arith.constant 0 : index
    %c0_240 = arith.constant 0 : index
    %c0_241 = arith.constant 0 : index
    %686 = vector.load %arg13[%c0_239, %c0_240, %c0_241] : memref<8x8x32xbf16, #tpu.memory_space<vmem>>, vector<8x8x32xbf16>
    %687 = vector.shape_cast %686 : vector<8x8x32xbf16> to vector<64x32xbf16>
    %c0_242 = arith.constant 0 : index
    %c0_243 = arith.constant 0 : index
    %688 = vector.load %arg5[%c0_242, %c0_243] : memref<32x128xbf16, #tpu.memory_space<vmem>>, vector<32x128xbf16>
    %cst_244 = arith.constant dense<0.000000e+00> : vector<64x128xf32>
    %689 = tpu.matmul %685, %688, %cst_244 {dimension_numbers = #tpu.dot_dimension_numbers<[1], [0], [0], [1], [0, 0, 1, 1], [], []>} : vector<64x32xbf16>, vector<32x128xbf16>, vector<64x128xf32> -> vector<64x128xf32>
    %c0_245 = arith.constant 0 : index
    %c0_246 = arith.constant 0 : index
    %690 = vector.load %arg6[%c0_245, %c0_246] : memref<32x128xbf16, #tpu.memory_space<vmem>>, vector<32x128xbf16>
    %cst_247 = arith.constant dense<0.000000e+00> : vector<64x128xf32>
    %691 = tpu.matmul %687, %690, %cst_247 {dimension_numbers = #tpu.dot_dimension_numbers<[1], [0], [0], [1], [0, 0, 1, 1], [], []>} : vector<64x32xbf16>, vector<32x128xbf16>, vector<64x128xf32> -> vector<64x128xf32>
    %692 = arith.addf %689, %691 : vector<64x128xf32>
    %c0_248 = arith.constant 0 : index
    %c0_249 = arith.constant 0 : index
    %693 = vector.load %arg7[%c0_248, %c0_249] : memref<1x128xf32, #tpu.memory_space<vmem>>, vector<1x128xf32>
    %694 = vector.broadcast %693 : vector<1x128xf32> to vector<64x128xf32>
    %695 = arith.addf %692, %694 : vector<64x128xf32>
    %696 = vector.shape_cast %695 : vector<64x128xf32> to vector<8x8x128xf32>
    %697 = arith.truncf %696 : vector<8x8x128xf32> to vector<8x8x128xbf16>
    %c0_250 = arith.constant 0 : index
    %c0_251 = arith.constant 0 : index
    %c0_252 = arith.constant 0 : index
    %698 = vector.load %arg14[%c0_250, %c0_251, %c0_252] : memref<8x8x128xbf16, #tpu.memory_space<vmem>>, vector<8x8x128xbf16>
    tpu.vector_store %arg14[%c0_250, %c0_251, %c0_252], %697 {strides = array<i32>} : memref<8x8x128xbf16, #tpu.memory_space<vmem>>, vector<8x8x128xbf16>,
    %c0_253 = arith.constant 0 : index
    %c0_254 = arith.constant 0 : index
    %699 = vector.load %arg8[%c0_253, %c0_254] : memref<32x128xbf16, #tpu.memory_space<vmem>>, vector<32x128xbf16>
    %c0_i32_255 = arith.constant 0 : i32
    %c7_i32_256 = arith.constant 7 : i32
    %700 = arith.subi %c7_i32_256, %c0_i32_255 : i32
    %701 = arith.index_cast %700 : i32 to index
    %c0_257 = arith.constant 0 : index
    %c0_258 = arith.constant 0 : index
    %702 = vector.load %arg14[%701, %c0_257, %c0_258] : memref<8x8x128xbf16, #tpu.memory_space<vmem>>, vector<1x8x128xbf16>
    %703 = vector.shape_cast %702 : vector<1x8x128xbf16> to vector<8x128xbf16>
    %704 = arith.extf %703 : vector<8x128xbf16> to vector<8x128xf32>
    %cst_259 = arith.constant dense<0.000000e+00> : vector<8x128xf32>
    %705 = tpu.matmul %2, %699, %cst_259 {dimension_numbers = #tpu.dot_dimension_numbers<[1], [0], [0], [1], [0, 0, 1, 1], [], []>} : vector<8x32xbf16>, vector<32x128xbf16>, vector<8x128xf32> -> vector<8x128xf32>
    %706 = arith.addf %704, %705 : vector<8x128xf32>
    %707 = vector.extract_strided_slice %706 {offsets = [0, 0], sizes = [8, 32], strides = [1, 1]} : vector<8x128xf32> to vector<8x32xf32>
    %cst_260 = arith.constant 5.000000e-01 : f32
    %708 = vector.broadcast %cst_260 : f32 to vector<8x32xf32>
    %709 = arith.mulf %708, %707 : vector<8x32xf32>
    %710 = math.tanh %709 : vector<8x32xf32>
    %cst_261 = arith.constant 5.000000e-01 : f32
    %711 = vector.broadcast %cst_261 : f32 to vector<8x32xf32>
    %712 = arith.mulf %711, %710 : vector<8x32xf32>
    %cst_262 = arith.constant 5.000000e-01 : f32
    %713 = vector.broadcast %cst_262 : f32 to vector<8x32xf32>
    %714 = arith.addf %712, %713 : vector<8x32xf32>
    %715 = vector.extract_strided_slice %706 {offsets = [0, 32], sizes = [8, 32], strides = [1, 1]} : vector<8x128xf32> to vector<8x32xf32>
    %cst_263 = arith.constant 5.000000e-01 : f32
    %716 = vector.broadcast %cst_263 : f32 to vector<8x32xf32>
    %717 = arith.mulf %716, %715 : vector<8x32xf32>
    %718 = math.tanh %717 : vector<8x32xf32>
    %cst_264 = arith.constant 5.000000e-01 : f32
    %719 = vector.broadcast %cst_264 : f32 to vector<8x32xf32>
    %720 = arith.mulf %719, %718 : vector<8x32xf32>
    %cst_265 = arith.constant 5.000000e-01 : f32
    %721 = vector.broadcast %cst_265 : f32 to vector<8x32xf32>
    %722 = arith.addf %720, %721 : vector<8x32xf32>
    %723 = vector.extract_strided_slice %706 {offsets = [0, 64], sizes = [8, 32], strides = [1, 1]} : vector<8x128xf32> to vector<8x32xf32>
    %724 = math.tanh %723 : vector<8x32xf32>
    %725 = vector.extract_strided_slice %706 {offsets = [0, 96], sizes = [8, 32], strides = [1, 1]} : vector<8x128xf32> to vector<8x32xf32>
    %cst_266 = arith.constant 5.000000e-01 : f32
    %726 = vector.broadcast %cst_266 : f32 to vector<8x32xf32>
    %727 = arith.mulf %726, %725 : vector<8x32xf32>
    %728 = math.tanh %727 : vector<8x32xf32>
    %cst_267 = arith.constant 5.000000e-01 : f32
    %729 = vector.broadcast %cst_267 : f32 to vector<8x32xf32>
    %730 = arith.mulf %729, %728 : vector<8x32xf32>
    %cst_268 = arith.constant 5.000000e-01 : f32
    %731 = vector.broadcast %cst_268 : f32 to vector<8x32xf32>
    %732 = arith.addf %730, %731 : vector<8x32xf32>
    %733 = arith.mulf %722, %3 : vector<8x32xf32>
    %734 = arith.mulf %714, %724 : vector<8x32xf32>
    %735 = arith.addf %733, %734 : vector<8x32xf32>
    %736 = math.tanh %735 : vector<8x32xf32>
    %737 = arith.mulf %732, %736 : vector<8x32xf32>
    %738 = arith.truncf %737 : vector<8x32xf32> to vector<8x32xbf16>
    %c1_i32_269 = arith.constant 1 : i32
    %c7_i32_270 = arith.constant 7 : i32
    %739 = arith.subi %c7_i32_270, %c1_i32_269 : i32
    %740 = arith.index_cast %739 : i32 to index
    %c0_271 = arith.constant 0 : index
    %c0_272 = arith.constant 0 : index
    %741 = vector.load %arg14[%740, %c0_271, %c0_272] : memref<8x8x128xbf16, #tpu.memory_space<vmem>>, vector<1x8x128xbf16>
    %742 = vector.shape_cast %741 : vector<1x8x128xbf16> to vector<8x128xbf16>
    %743 = arith.extf %742 : vector<8x128xbf16> to vector<8x128xf32>
    %cst_273 = arith.constant dense<0.000000e+00> : vector<8x128xf32>
    %744 = tpu.matmul %738, %699, %cst_273 {dimension_numbers = #tpu.dot_dimension_numbers<[1], [0], [0], [1], [0, 0, 1, 1], [], []>} : vector<8x32xbf16>, vector<32x128xbf16>, vector<8x128xf32> -> vector<8x128xf32>
    %745 = arith.addf %743, %744 : vector<8x128xf32>
    %746 = vector.extract_strided_slice %745 {offsets = [0, 0], sizes = [8, 32], strides = [1, 1]} : vector<8x128xf32> to vector<8x32xf32>
    %cst_274 = arith.constant 5.000000e-01 : f32
    %747 = vector.broadcast %cst_274 : f32 to vector<8x32xf32>
    %748 = arith.mulf %747, %746 : vector<8x32xf32>
    %749 = math.tanh %748 : vector<8x32xf32>
    %cst_275 = arith.constant 5.000000e-01 : f32
    %750 = vector.broadcast %cst_275 : f32 to vector<8x32xf32>
    %751 = arith.mulf %750, %749 : vector<8x32xf32>
    %cst_276 = arith.constant 5.000000e-01 : f32
    %752 = vector.broadcast %cst_276 : f32 to vector<8x32xf32>
    %753 = arith.addf %751, %752 : vector<8x32xf32>
    %754 = vector.extract_strided_slice %745 {offsets = [0, 32], sizes = [8, 32], strides = [1, 1]} : vector<8x128xf32> to vector<8x32xf32>
    %cst_277 = arith.constant 5.000000e-01 : f32
    %755 = vector.broadcast %cst_277 : f32 to vector<8x32xf32>
    %756 = arith.mulf %755, %754 : vector<8x32xf32>
    %757 = math.tanh %756 : vector<8x32xf32>
    %cst_278 = arith.constant 5.000000e-01 : f32
    %758 = vector.broadcast %cst_278 : f32 to vector<8x32xf32>
    %759 = arith.mulf %758, %757 : vector<8x32xf32>
    %cst_279 = arith.constant 5.000000e-01 : f32
    %760 = vector.broadcast %cst_279 : f32 to vector<8x32xf32>
    %761 = arith.addf %759, %760 : vector<8x32xf32>
    %762 = vector.extract_strided_slice %745 {offsets = [0, 64], sizes = [8, 32], strides = [1, 1]} : vector<8x128xf32> to vector<8x32xf32>
    %763 = math.tanh %762 : vector<8x32xf32>
    %764 = vector.extract_strided_slice %745 {offsets = [0, 96], sizes = [8, 32], strides = [1, 1]} : vector<8x128xf32> to vector<8x32xf32>
    %cst_280 = arith.constant 5.000000e-01 : f32
    %765 = vector.broadcast %cst_280 : f32 to vector<8x32xf32>
    %766 = arith.mulf %765, %764 : vector<8x32xf32>
    %767 = math.tanh %766 : vector<8x32xf32>
    %cst_281 = arith.constant 5.000000e-01 : f32
    %768 = vector.broadcast %cst_281 : f32 to vector<8x32xf32>
    %769 = arith.mulf %768, %767 : vector<8x32xf32>
    %cst_282 = arith.constant 5.000000e-01 : f32
    %770 = vector.broadcast %cst_282 : f32 to vector<8x32xf32>
    %771 = arith.addf %769, %770 : vector<8x32xf32>
    %772 = arith.mulf %761, %735 : vector<8x32xf32>
    %773 = arith.mulf %753, %763 : vector<8x32xf32>
    %774 = arith.addf %772, %773 : vector<8x32xf32>
    %775 = math.tanh %774 : vector<8x32xf32>
    %776 = arith.mulf %771, %775 : vector<8x32xf32>
    %777 = arith.truncf %776 : vector<8x32xf32> to vector<8x32xbf16>
    %c2_i32_283 = arith.constant 2 : i32
    %c7_i32_284 = arith.constant 7 : i32
    %778 = arith.subi %c7_i32_284, %c2_i32_283 : i32
    %779 = arith.index_cast %778 : i32 to index
    %c0_285 = arith.constant 0 : index
    %c0_286 = arith.constant 0 : index
    %780 = vector.load %arg14[%779, %c0_285, %c0_286] : memref<8x8x128xbf16, #tpu.memory_space<vmem>>, vector<1x8x128xbf16>
    %781 = vector.shape_cast %780 : vector<1x8x128xbf16> to vector<8x128xbf16>
    %782 = arith.extf %781 : vector<8x128xbf16> to vector<8x128xf32>
    %cst_287 = arith.constant dense<0.000000e+00> : vector<8x128xf32>
    %783 = tpu.matmul %777, %699, %cst_287 {dimension_numbers = #tpu.dot_dimension_numbers<[1], [0], [0], [1], [0, 0, 1, 1], [], []>} : vector<8x32xbf16>, vector<32x128xbf16>, vector<8x128xf32> -> vector<8x128xf32>
    %784 = arith.addf %782, %783 : vector<8x128xf32>
    %785 = vector.extract_strided_slice %784 {offsets = [0, 0], sizes = [8, 32], strides = [1, 1]} : vector<8x128xf32> to vector<8x32xf32>
    %cst_288 = arith.constant 5.000000e-01 : f32
    %786 = vector.broadcast %cst_288 : f32 to vector<8x32xf32>
    %787 = arith.mulf %786, %785 : vector<8x32xf32>
    %788 = math.tanh %787 : vector<8x32xf32>
    %cst_289 = arith.constant 5.000000e-01 : f32
    %789 = vector.broadcast %cst_289 : f32 to vector<8x32xf32>
    %790 = arith.mulf %789, %788 : vector<8x32xf32>
    %cst_290 = arith.constant 5.000000e-01 : f32
    %791 = vector.broadcast %cst_290 : f32 to vector<8x32xf32>
    %792 = arith.addf %790, %791 : vector<8x32xf32>
    %793 = vector.extract_strided_slice %784 {offsets = [0, 32], sizes = [8, 32], strides = [1, 1]} : vector<8x128xf32> to vector<8x32xf32>
    %cst_291 = arith.constant 5.000000e-01 : f32
    %794 = vector.broadcast %cst_291 : f32 to vector<8x32xf32>
    %795 = arith.mulf %794, %793 : vector<8x32xf32>
    %796 = math.tanh %795 : vector<8x32xf32>
    %cst_292 = arith.constant 5.000000e-01 : f32
    %797 = vector.broadcast %cst_292 : f32 to vector<8x32xf32>
    %798 = arith.mulf %797, %796 : vector<8x32xf32>
    %cst_293 = arith.constant 5.000000e-01 : f32
    %799 = vector.broadcast %cst_293 : f32 to vector<8x32xf32>
    %800 = arith.addf %798, %799 : vector<8x32xf32>
    %801 = vector.extract_strided_slice %784 {offsets = [0, 64], sizes = [8, 32], strides = [1, 1]} : vector<8x128xf32> to vector<8x32xf32>
    %802 = math.tanh %801 : vector<8x32xf32>
    %803 = vector.extract_strided_slice %784 {offsets = [0, 96], sizes = [8, 32], strides = [1, 1]} : vector<8x128xf32> to vector<8x32xf32>
    %cst_294 = arith.constant 5.000000e-01 : f32
    %804 = vector.broadcast %cst_294 : f32 to vector<8x32xf32>
    %805 = arith.mulf %804, %803 : vector<8x32xf32>
    %806 = math.tanh %805 : vector<8x32xf32>
    %cst_295 = arith.constant 5.000000e-01 : f32
    %807 = vector.broadcast %cst_295 : f32 to vector<8x32xf32>
    %808 = arith.mulf %807, %806 : vector<8x32xf32>
    %cst_296 = arith.constant 5.000000e-01 : f32
    %809 = vector.broadcast %cst_296 : f32 to vector<8x32xf32>
    %810 = arith.addf %808, %809 : vector<8x32xf32>
    %811 = arith.mulf %800, %774 : vector<8x32xf32>
    %812 = arith.mulf %792, %802 : vector<8x32xf32>
    %813 = arith.addf %811, %812 : vector<8x32xf32>
    %814 = math.tanh %813 : vector<8x32xf32>
    %815 = arith.mulf %810, %814 : vector<8x32xf32>
    %816 = arith.truncf %815 : vector<8x32xf32> to vector<8x32xbf16>
    %c3_i32_297 = arith.constant 3 : i32
    %c7_i32_298 = arith.constant 7 : i32
    %817 = arith.subi %c7_i32_298, %c3_i32_297 : i32
    %818 = arith.index_cast %817 : i32 to index
    %c0_299 = arith.constant 0 : index
    %c0_300 = arith.constant 0 : index
    %819 = vector.load %arg14[%818, %c0_299, %c0_300] : memref<8x8x128xbf16, #tpu.memory_space<vmem>>, vector<1x8x128xbf16>
    %820 = vector.shape_cast %819 : vector<1x8x128xbf16> to vector<8x128xbf16>
    %821 = arith.extf %820 : vector<8x128xbf16> to vector<8x128xf32>
    %cst_301 = arith.constant dense<0.000000e+00> : vector<8x128xf32>
    %822 = tpu.matmul %816, %699, %cst_301 {dimension_numbers = #tpu.dot_dimension_numbers<[1], [0], [0], [1], [0, 0, 1, 1], [], []>} : vector<8x32xbf16>, vector<32x128xbf16>, vector<8x128xf32> -> vector<8x128xf32>
    %823 = arith.addf %821, %822 : vector<8x128xf32>
    %824 = vector.extract_strided_slice %823 {offsets = [0, 0], sizes = [8, 32], strides = [1, 1]} : vector<8x128xf32> to vector<8x32xf32>
    %cst_302 = arith.constant 5.000000e-01 : f32
    %825 = vector.broadcast %cst_302 : f32 to vector<8x32xf32>
    %826 = arith.mulf %825, %824 : vector<8x32xf32>
    %827 = math.tanh %826 : vector<8x32xf32>
    %cst_303 = arith.constant 5.000000e-01 : f32
    %828 = vector.broadcast %cst_303 : f32 to vector<8x32xf32>
    %829 = arith.mulf %828, %827 : vector<8x32xf32>
    %cst_304 = arith.constant 5.000000e-01 : f32
    %830 = vector.broadcast %cst_304 : f32 to vector<8x32xf32>
    %831 = arith.addf %829, %830 : vector<8x32xf32>
    %832 = vector.extract_strided_slice %823 {offsets = [0, 32], sizes = [8, 32], strides = [1, 1]} : vector<8x128xf32> to vector<8x32xf32>
    %cst_305 = arith.constant 5.000000e-01 : f32
    %833 = vector.broadcast %cst_305 : f32 to vector<8x32xf32>
    %834 = arith.mulf %833, %832 : vector<8x32xf32>
    %835 = math.tanh %834 : vector<8x32xf32>
    %cst_306 = arith.constant 5.000000e-01 : f32
    %836 = vector.broadcast %cst_306 : f32 to vector<8x32xf32>
    %837 = arith.mulf %836, %835 : vector<8x32xf32>
    %cst_307 = arith.constant 5.000000e-01 : f32
    %838 = vector.broadcast %cst_307 : f32 to vector<8x32xf32>
    %839 = arith.addf %837, %838 : vector<8x32xf32>
    %840 = vector.extract_strided_slice %823 {offsets = [0, 64], sizes = [8, 32], strides = [1, 1]} : vector<8x128xf32> to vector<8x32xf32>
    %841 = math.tanh %840 : vector<8x32xf32>
    %842 = vector.extract_strided_slice %823 {offsets = [0, 96], sizes = [8, 32], strides = [1, 1]} : vector<8x128xf32> to vector<8x32xf32>
    %cst_308 = arith.constant 5.000000e-01 : f32
    %843 = vector.broadcast %cst_308 : f32 to vector<8x32xf32>
    %844 = arith.mulf %843, %842 : vector<8x32xf32>
    %845 = math.tanh %844 : vector<8x32xf32>
    %cst_309 = arith.constant 5.000000e-01 : f32
    %846 = vector.broadcast %cst_309 : f32 to vector<8x32xf32>
    %847 = arith.mulf %846, %845 : vector<8x32xf32>
    %cst_310 = arith.constant 5.000000e-01 : f32
    %848 = vector.broadcast %cst_310 : f32 to vector<8x32xf32>
    %849 = arith.addf %847, %848 : vector<8x32xf32>
    %850 = arith.mulf %839, %813 : vector<8x32xf32>
    %851 = arith.mulf %831, %841 : vector<8x32xf32>
    %852 = arith.addf %850, %851 : vector<8x32xf32>
    %853 = math.tanh %852 : vector<8x32xf32>
    %854 = arith.mulf %849, %853 : vector<8x32xf32>
    %855 = arith.truncf %854 : vector<8x32xf32> to vector<8x32xbf16>
    %c4_i32_311 = arith.constant 4 : i32
    %c7_i32_312 = arith.constant 7 : i32
    %856 = arith.subi %c7_i32_312, %c4_i32_311 : i32
    %857 = arith.index_cast %856 : i32 to index
    %c0_313 = arith.constant 0 : index
    %c0_314 = arith.constant 0 : index
    %858 = vector.load %arg14[%857, %c0_313, %c0_314] : memref<8x8x128xbf16, #tpu.memory_space<vmem>>, vector<1x8x128xbf16>
    %859 = vector.shape_cast %858 : vector<1x8x128xbf16> to vector<8x128xbf16>
    %860 = arith.extf %859 : vector<8x128xbf16> to vector<8x128xf32>
    %cst_315 = arith.constant dense<0.000000e+00> : vector<8x128xf32>
    %861 = tpu.matmul %855, %699, %cst_315 {dimension_numbers = #tpu.dot_dimension_numbers<[1], [0], [0], [1], [0, 0, 1, 1], [], []>} : vector<8x32xbf16>, vector<32x128xbf16>, vector<8x128xf32> -> vector<8x128xf32>
    %862 = arith.addf %860, %861 : vector<8x128xf32>
    %863 = vector.extract_strided_slice %862 {offsets = [0, 0], sizes = [8, 32], strides = [1, 1]} : vector<8x128xf32> to vector<8x32xf32>
    %cst_316 = arith.constant 5.000000e-01 : f32
    %864 = vector.broadcast %cst_316 : f32 to vector<8x32xf32>
    %865 = arith.mulf %864, %863 : vector<8x32xf32>
    %866 = math.tanh %865 : vector<8x32xf32>
    %cst_317 = arith.constant 5.000000e-01 : f32
    %867 = vector.broadcast %cst_317 : f32 to vector<8x32xf32>
    %868 = arith.mulf %867, %866 : vector<8x32xf32>
    %cst_318 = arith.constant 5.000000e-01 : f32
    %869 = vector.broadcast %cst_318 : f32 to vector<8x32xf32>
    %870 = arith.addf %868, %869 : vector<8x32xf32>
    %871 = vector.extract_strided_slice %862 {offsets = [0, 32], sizes = [8, 32], strides = [1, 1]} : vector<8x128xf32> to vector<8x32xf32>
    %cst_319 = arith.constant 5.000000e-01 : f32
    %872 = vector.broadcast %cst_319 : f32 to vector<8x32xf32>
    %873 = arith.mulf %872, %871 : vector<8x32xf32>
    %874 = math.tanh %873 : vector<8x32xf32>
    %cst_320 = arith.constant 5.000000e-01 : f32
    %875 = vector.broadcast %cst_320 : f32 to vector<8x32xf32>
    %876 = arith.mulf %875, %874 : vector<8x32xf32>
    %cst_321 = arith.constant 5.000000e-01 : f32
    %877 = vector.broadcast %cst_321 : f32 to vector<8x32xf32>
    %878 = arith.addf %876, %877 : vector<8x32xf32>
    %879 = vector.extract_strided_slice %862 {offsets = [0, 64], sizes = [8, 32], strides = [1, 1]} : vector<8x128xf32> to vector<8x32xf32>
    %880 = math.tanh %879 : vector<8x32xf32>
    %881 = vector.extract_strided_slice %862 {offsets = [0, 96], sizes = [8, 32], strides = [1, 1]} : vector<8x128xf32> to vector<8x32xf32>
    %cst_322 = arith.constant 5.000000e-01 : f32
    %882 = vector.broadcast %cst_322 : f32 to vector<8x32xf32>
    %883 = arith.mulf %882, %881 : vector<8x32xf32>
    %884 = math.tanh %883 : vector<8x32xf32>
    %cst_323 = arith.constant 5.000000e-01 : f32
    %885 = vector.broadcast %cst_323 : f32 to vector<8x32xf32>
    %886 = arith.mulf %885, %884 : vector<8x32xf32>
    %cst_324 = arith.constant 5.000000e-01 : f32
    %887 = vector.broadcast %cst_324 : f32 to vector<8x32xf32>
    %888 = arith.addf %886, %887 : vector<8x32xf32>
    %889 = arith.mulf %878, %852 : vector<8x32xf32>
    %890 = arith.mulf %870, %880 : vector<8x32xf32>
    %891 = arith.addf %889, %890 : vector<8x32xf32>
    %892 = math.tanh %891 : vector<8x32xf32>
    %893 = arith.mulf %888, %892 : vector<8x32xf32>
    %894 = arith.truncf %893 : vector<8x32xf32> to vector<8x32xbf16>
    %c5_i32_325 = arith.constant 5 : i32
    %c7_i32_326 = arith.constant 7 : i32
    %895 = arith.subi %c7_i32_326, %c5_i32_325 : i32
    %896 = arith.index_cast %895 : i32 to index
    %c0_327 = arith.constant 0 : index
    %c0_328 = arith.constant 0 : index
    %897 = vector.load %arg14[%896, %c0_327, %c0_328] : memref<8x8x128xbf16, #tpu.memory_space<vmem>>, vector<1x8x128xbf16>
    %898 = vector.shape_cast %897 : vector<1x8x128xbf16> to vector<8x128xbf16>
    %899 = arith.extf %898 : vector<8x128xbf16> to vector<8x128xf32>
    %cst_329 = arith.constant dense<0.000000e+00> : vector<8x128xf32>
    %900 = tpu.matmul %894, %699, %cst_329 {dimension_numbers = #tpu.dot_dimension_numbers<[1], [0], [0], [1], [0, 0, 1, 1], [], []>} : vector<8x32xbf16>, vector<32x128xbf16>, vector<8x128xf32> -> vector<8x128xf32>
    %901 = arith.addf %899, %900 : vector<8x128xf32>
    %902 = vector.extract_strided_slice %901 {offsets = [0, 0], sizes = [8, 32], strides = [1, 1]} : vector<8x128xf32> to vector<8x32xf32>
    %cst_330 = arith.constant 5.000000e-01 : f32
    %903 = vector.broadcast %cst_330 : f32 to vector<8x32xf32>
    %904 = arith.mulf %903, %902 : vector<8x32xf32>
    %905 = math.tanh %904 : vector<8x32xf32>
    %cst_331 = arith.constant 5.000000e-01 : f32
    %906 = vector.broadcast %cst_331 : f32 to vector<8x32xf32>
    %907 = arith.mulf %906, %905 : vector<8x32xf32>
    %cst_332 = arith.constant 5.000000e-01 : f32
    %908 = vector.broadcast %cst_332 : f32 to vector<8x32xf32>
    %909 = arith.addf %907, %908 : vector<8x32xf32>
    %910 = vector.extract_strided_slice %901 {offsets = [0, 32], sizes = [8, 32], strides = [1, 1]} : vector<8x128xf32> to vector<8x32xf32>
    %cst_333 = arith.constant 5.000000e-01 : f32
    %911 = vector.broadcast %cst_333 : f32 to vector<8x32xf32>
    %912 = arith.mulf %911, %910 : vector<8x32xf32>
    %913 = math.tanh %912 : vector<8x32xf32>
    %cst_334 = arith.constant 5.000000e-01 : f32
    %914 = vector.broadcast %cst_334 : f32 to vector<8x32xf32>
    %915 = arith.mulf %914, %913 : vector<8x32xf32>
    %cst_335 = arith.constant 5.000000e-01 : f32
    %916 = vector.broadcast %cst_335 : f32 to vector<8x32xf32>
    %917 = arith.addf %915, %916 : vector<8x32xf32>
    %918 = vector.extract_strided_slice %901 {offsets = [0, 64], sizes = [8, 32], strides = [1, 1]} : vector<8x128xf32> to vector<8x32xf32>
    %919 = math.tanh %918 : vector<8x32xf32>
    %920 = vector.extract_strided_slice %901 {offsets = [0, 96], sizes = [8, 32], strides = [1, 1]} : vector<8x128xf32> to vector<8x32xf32>
    %cst_336 = arith.constant 5.000000e-01 : f32
    %921 = vector.broadcast %cst_336 : f32 to vector<8x32xf32>
    %922 = arith.mulf %921, %920 : vector<8x32xf32>
    %923 = math.tanh %922 : vector<8x32xf32>
    %cst_337 = arith.constant 5.000000e-01 : f32
    %924 = vector.broadcast %cst_337 : f32 to vector<8x32xf32>
    %925 = arith.mulf %924, %923 : vector<8x32xf32>
    %cst_338 = arith.constant 5.000000e-01 : f32
    %926 = vector.broadcast %cst_338 : f32 to vector<8x32xf32>
    %927 = arith.addf %925, %926 : vector<8x32xf32>
    %928 = arith.mulf %917, %891 : vector<8x32xf32>
    %929 = arith.mulf %909, %919 : vector<8x32xf32>
    %930 = arith.addf %928, %929 : vector<8x32xf32>
    %931 = math.tanh %930 : vector<8x32xf32>
    %932 = arith.mulf %927, %931 : vector<8x32xf32>
    %933 = arith.truncf %932 : vector<8x32xf32> to vector<8x32xbf16>
    %c6_i32_339 = arith.constant 6 : i32
    %c7_i32_340 = arith.constant 7 : i32
    %934 = arith.subi %c7_i32_340, %c6_i32_339 : i32
    %935 = arith.index_cast %934 : i32 to index
    %c0_341 = arith.constant 0 : index
    %c0_342 = arith.constant 0 : index
    %936 = vector.load %arg14[%935, %c0_341, %c0_342] : memref<8x8x128xbf16, #tpu.memory_space<vmem>>, vector<1x8x128xbf16>
    %937 = vector.shape_cast %936 : vector<1x8x128xbf16> to vector<8x128xbf16>
    %938 = arith.extf %937 : vector<8x128xbf16> to vector<8x128xf32>
    %cst_343 = arith.constant dense<0.000000e+00> : vector<8x128xf32>
    %939 = tpu.matmul %933, %699, %cst_343 {dimension_numbers = #tpu.dot_dimension_numbers<[1], [0], [0], [1], [0, 0, 1, 1], [], []>} : vector<8x32xbf16>, vector<32x128xbf16>, vector<8x128xf32> -> vector<8x128xf32>
    %940 = arith.addf %938, %939 : vector<8x128xf32>
    %941 = vector.extract_strided_slice %940 {offsets = [0, 0], sizes = [8, 32], strides = [1, 1]} : vector<8x128xf32> to vector<8x32xf32>
    %cst_344 = arith.constant 5.000000e-01 : f32
    %942 = vector.broadcast %cst_344 : f32 to vector<8x32xf32>
    %943 = arith.mulf %942, %941 : vector<8x32xf32>
    %944 = math.tanh %943 : vector<8x32xf32>
    %cst_345 = arith.constant 5.000000e-01 : f32
    %945 = vector.broadcast %cst_345 : f32 to vector<8x32xf32>
    %946 = arith.mulf %945, %944 : vector<8x32xf32>
    %cst_346 = arith.constant 5.000000e-01 : f32
    %947 = vector.broadcast %cst_346 : f32 to vector<8x32xf32>
    %948 = arith.addf %946, %947 : vector<8x32xf32>
    %949 = vector.extract_strided_slice %940 {offsets = [0, 32], sizes = [8, 32], strides = [1, 1]} : vector<8x128xf32> to vector<8x32xf32>
    %cst_347 = arith.constant 5.000000e-01 : f32
    %950 = vector.broadcast %cst_347 : f32 to vector<8x32xf32>
    %951 = arith.mulf %950, %949 : vector<8x32xf32>
    %952 = math.tanh %951 : vector<8x32xf32>
    %cst_348 = arith.constant 5.000000e-01 : f32
    %953 = vector.broadcast %cst_348 : f32 to vector<8x32xf32>
    %954 = arith.mulf %953, %952 : vector<8x32xf32>
    %cst_349 = arith.constant 5.000000e-01 : f32
    %955 = vector.broadcast %cst_349 : f32 to vector<8x32xf32>
    %956 = arith.addf %954, %955 : vector<8x32xf32>
    %957 = vector.extract_strided_slice %940 {offsets = [0, 64], sizes = [8, 32], strides = [1, 1]} : vector<8x128xf32> to vector<8x32xf32>
    %958 = math.tanh %957 : vector<8x32xf32>
    %959 = vector.extract_strided_slice %940 {offsets = [0, 96], sizes = [8, 32], strides = [1, 1]} : vector<8x128xf32> to vector<8x32xf32>
    %cst_350 = arith.constant 5.000000e-01 : f32
    %960 = vector.broadcast %cst_350 : f32 to vector<8x32xf32>
    %961 = arith.mulf %960, %959 : vector<8x32xf32>
    %962 = math.tanh %961 : vector<8x32xf32>
    %cst_351 = arith.constant 5.000000e-01 : f32
    %963 = vector.broadcast %cst_351 : f32 to vector<8x32xf32>
    %964 = arith.mulf %963, %962 : vector<8x32xf32>
    %cst_352 = arith.constant 5.000000e-01 : f32
    %965 = vector.broadcast %cst_352 : f32 to vector<8x32xf32>
    %966 = arith.addf %964, %965 : vector<8x32xf32>
    %967 = arith.mulf %956, %930 : vector<8x32xf32>
    %968 = arith.mulf %948, %958 : vector<8x32xf32>
    %969 = arith.addf %967, %968 : vector<8x32xf32>
    %970 = math.tanh %969 : vector<8x32xf32>
    %971 = arith.mulf %966, %970 : vector<8x32xf32>
    %972 = arith.truncf %971 : vector<8x32xf32> to vector<8x32xbf16>
    %c7_i32_353 = arith.constant 7 : i32
    %c7_i32_354 = arith.constant 7 : i32
    %973 = arith.subi %c7_i32_354, %c7_i32_353 : i32
    %974 = arith.index_cast %973 : i32 to index
    %c0_355 = arith.constant 0 : index
    %c0_356 = arith.constant 0 : index
    %975 = vector.load %arg14[%974, %c0_355, %c0_356] : memref<8x8x128xbf16, #tpu.memory_space<vmem>>, vector<1x8x128xbf16>
    %976 = vector.shape_cast %975 : vector<1x8x128xbf16> to vector<8x128xbf16>
    %977 = arith.extf %976 : vector<8x128xbf16> to vector<8x128xf32>
    %cst_357 = arith.constant dense<0.000000e+00> : vector<8x128xf32>
    %978 = tpu.matmul %972, %699, %cst_357 {dimension_numbers = #tpu.dot_dimension_numbers<[1], [0], [0], [1], [0, 0, 1, 1], [], []>} : vector<8x32xbf16>, vector<32x128xbf16>, vector<8x128xf32> -> vector<8x128xf32>
    %979 = arith.addf %977, %978 : vector<8x128xf32>
    %980 = vector.extract_strided_slice %979 {offsets = [0, 0], sizes = [8, 32], strides = [1, 1]} : vector<8x128xf32> to vector<8x32xf32>
    %cst_358 = arith.constant 5.000000e-01 : f32
    %981 = vector.broadcast %cst_358 : f32 to vector<8x32xf32>
    %982 = arith.mulf %981, %980 : vector<8x32xf32>
    %983 = math.tanh %982 : vector<8x32xf32>
    %cst_359 = arith.constant 5.000000e-01 : f32
    %984 = vector.broadcast %cst_359 : f32 to vector<8x32xf32>
    %985 = arith.mulf %984, %983 : vector<8x32xf32>
    %cst_360 = arith.constant 5.000000e-01 : f32
    %986 = vector.broadcast %cst_360 : f32 to vector<8x32xf32>
    %987 = arith.addf %985, %986 : vector<8x32xf32>
    %988 = vector.extract_strided_slice %979 {offsets = [0, 32], sizes = [8, 32], strides = [1, 1]} : vector<8x128xf32> to vector<8x32xf32>
    %cst_361 = arith.constant 5.000000e-01 : f32
    %989 = vector.broadcast %cst_361 : f32 to vector<8x32xf32>
    %990 = arith.mulf %989, %988 : vector<8x32xf32>
    %991 = math.tanh %990 : vector<8x32xf32>
    %cst_362 = arith.constant 5.000000e-01 : f32
    %992 = vector.broadcast %cst_362 : f32 to vector<8x32xf32>
    %993 = arith.mulf %992, %991 : vector<8x32xf32>
    %cst_363 = arith.constant 5.000000e-01 : f32
    %994 = vector.broadcast %cst_363 : f32 to vector<8x32xf32>
    %995 = arith.addf %993, %994 : vector<8x32xf32>
    %996 = vector.extract_strided_slice %979 {offsets = [0, 64], sizes = [8, 32], strides = [1, 1]} : vector<8x128xf32> to vector<8x32xf32>
    %997 = math.tanh %996 : vector<8x32xf32>
    %998 = vector.extract_strided_slice %979 {offsets = [0, 96], sizes = [8, 32], strides = [1, 1]} : vector<8x128xf32> to vector<8x32xf32>
    %cst_364 = arith.constant 5.000000e-01 : f32
    %999 = vector.broadcast %cst_364 : f32 to vector<8x32xf32>
    %1000 = arith.mulf %999, %998 : vector<8x32xf32>
    %1001 = math.tanh %1000 : vector<8x32xf32>
    %cst_365 = arith.constant 5.000000e-01 : f32
    %1002 = vector.broadcast %cst_365 : f32 to vector<8x32xf32>
    %1003 = arith.mulf %1002, %1001 : vector<8x32xf32>
    %cst_366 = arith.constant 5.000000e-01 : f32
    %1004 = vector.broadcast %cst_366 : f32 to vector<8x32xf32>
    %1005 = arith.addf %1003, %1004 : vector<8x32xf32>
    %1006 = arith.mulf %995, %969 : vector<8x32xf32>
    %1007 = arith.mulf %987, %997 : vector<8x32xf32>
    %1008 = arith.addf %1006, %1007 : vector<8x32xf32>
    %1009 = math.tanh %1008 : vector<8x32xf32>
    %1010 = arith.mulf %1005, %1009 : vector<8x32xf32>
    %1011 = arith.truncf %1010 : vector<8x32xf32> to vector<8x32xbf16>
    %c8_i32_367 = arith.constant 8 : i32
    %c0_368 = arith.constant 0 : index
    %c0_369 = arith.constant 0 : index
    %1012 = vector.load %arg9[%c0_368, %c0_369] : memref<32x128xbf16, #tpu.memory_space<vmem>>, vector<32x128xbf16>
    %cst_370 = arith.constant dense<0.000000e+00> : vector<8x128xf32>
    %1013 = tpu.matmul %1011, %1012, %cst_370 {dimension_numbers = #tpu.dot_dimension_numbers<[1], [0], [0], [1], [0, 0, 1, 1], [], []>} : vector<8x32xbf16>, vector<32x128xbf16>, vector<8x128xf32> -> vector<8x128xf32>
    %c0_371 = arith.constant 0 : index
    %c0_372 = arith.constant 0 : index
    %1014 = vector.load %arg10[%c0_371, %c0_372] : memref<1x128xf32, #tpu.memory_space<vmem>>, vector<1x128xf32>
    %1015 = vector.broadcast %1014 : vector<1x128xf32> to vector<8x128xf32>
    %1016 = arith.addf %1013, %1015 : vector<8x128xf32>
    %c0_373 = arith.constant 0 : index
    %c0_374 = arith.constant 0 : index
    %1017 = vector.load %arg11[%c0_373, %c0_374] : memref<8x128xf32, #tpu.memory_space<vmem>>, vector<8x128xf32>
    tpu.vector_store %arg11[%c0_373, %c0_374], %1016 {strides = array<i32>} : memref<8x128xf32, #tpu.memory_space<vmem>>, vector<8x128xf32>,
    return
  }
  func.func @transform_0(%arg0: i32) -> (i32, i32, i32) {
    %c0_i32 = arith.constant 0 : i32
    %c0_i32_0 = arith.constant 0 : i32
    %c0_i32_1 = arith.constant 0 : i32
    return %c0_i32, %arg0, %c0_i32_0 : i32, i32, i32
  }
  func.func @transform_1(%arg0: i32) -> (i32, i32, i32) {
    %c0_i32 = arith.constant 0 : i32
    %c0_i32_0 = arith.constant 0 : i32
    %c0_i32_1 = arith.constant 0 : i32
    return %c0_i32, %arg0, %c0_i32_0 : i32, i32, i32
  }
  func.func @transform_2(%arg0: i32) -> (i32, i32) {
    %c0_i32 = arith.constant 0 : i32
    %c0_i32_0 = arith.constant 0 : i32
    %c0_i32_1 = arith.constant 0 : i32
    return %c0_i32, %c0_i32_0 : i32, i32
  }
  func.func @transform_3(%arg0: i32) -> (i32, i32) {
    %c0_i32 = arith.constant 0 : i32
    %c0_i32_0 = arith.constant 0 : i32
    %c0_i32_1 = arith.constant 0 : i32
    return %c0_i32, %c0_i32_0 : i32, i32
  }
  func.func @transform_4(%arg0: i32) -> (i32, i32) {
    %c0_i32 = arith.constant 0 : i32
    %c0_i32_0 = arith.constant 0 : i32
    %c0_i32_1 = arith.constant 0 : i32
    return %c0_i32, %c0_i32_0 : i32, i32
  }
  func.func @transform_5(%arg0: i32) -> (i32, i32) {
    %c0_i32 = arith.constant 0 : i32
    %c0_i32_0 = arith.constant 0 : i32
    %c0_i32_1 = arith.constant 0 : i32
    return %c0_i32, %c0_i32_0 : i32, i32
  }
  func.func @transform_6(%arg0: i32) -> (i32, i32) {
    %c0_i32 = arith.constant 0 : i32
    %c0_i32_0 = arith.constant 0 : i32
    %c0_i32_1 = arith.constant 0 : i32
    return %c0_i32, %c0_i32_0 : i32, i32
  }
  func.func @transform_7(%arg0: i32) -> (i32, i32) {
    %c0_i32 = arith.constant 0 : i32
    %c0_i32_0 = arith.constant 0 : i32
    %c0_i32_1 = arith.constant 0 : i32
    return %c0_i32, %c0_i32_0 : i32, i32
  }
  func.func @transform_8(%arg0: i32) -> (i32, i32) {
    %c0_i32 = arith.constant 0 : i32
    %c0_i32_0 = arith.constant 0 : i32
    %c0_i32_1 = arith.constant 0 : i32
    return %c0_i32, %c0_i32_0 : i32, i32
  }
  func.func @transform_9(%arg0: i32) -> (i32, i32) {
    %c0_i32 = arith.constant 0 : i32
    %c0_i32_0 = arith.constant 0 : i32
    %c0_i32_1 = arith.constant 0 : i32
    return %c0_i32, %c0_i32_0 : i32, i32
  }
  func.func @transform_10(%arg0: i32) -> (i32, i32) {
    %c0_i32 = arith.constant 0 : i32
    %c0_i32_0 = arith.constant 0 : i32
    return %arg0, %c0_i32 : i32, i32
  }
}

</mosaic_0001>

<bundles_post_ra>
// kernel: bilstm_forward.2
= control target key start
LH: loop header
LB: loop body
LE: loop exit
PB: predicated region body
PF: predicated region fallthrough
CT: control target
= control target key end

     0   :  { %v545_v1 = vmov 0   ;;  %vm65_vm0 = vcmask 130048   ;;  %v45_v27 = vlaneseq  ;;  %s720_s1 = inlined_call_operand.vmem [shape: bf16[16,256], index: 1, kind: input, shape index: {}]   ;;  %s721_s0 = inlined_call_operand.vmem [shape: f32[128,16], index: 0, kind: input, shape index: {}]   ;;  %s722_s2 = inlined_call_operand.vmem [shape: f32[1,256], index: 2, kind: input, shape index: {}]   ;;  %s723_s3 = inlined_call_operand.vmem [shape: bf16[128,128], index: 3, kind: output, shape index: {0}]   ;;  %s724_s4 = inlined_call_operand.vmem [shape: bf16[128,128], index: 4, kind: output, shape index: {1}]  }
   0x1   :  { %v542_v0 = vld [vmem:[%s720_s1 + $0x4] ss:$8 sps:$4 sm:$0xff]   ;;  %122 = vmatprep.mubr.bf16.mxu0 %v545_v1  ;;  %162 = vmatprep.mubr.bf16.mxu1 %v545_v1  ;;  %v544_v2 = vld [vmem:[%s720_s1] ss:$8 sps:$4 sm:$0xff]   ;;  %v19_v9 = vld [vmem:[%s721_s0 + $0x10] sm:$0xff] }
   0x2   :  { %v17_v3 = vld [vmem:[%s721_s0] sm:$0xff]  ;;  %v18_v4 = vld [vmem:[%s721_s0 + $0x8] sm:$0xff]  ;;  %104 = vmatprep.subr.bf16.mxu0 %v542_v0  ;;  %539 = vmatprep.subr.bf16.mxu1 %v542_v0  ;;  %v20_v10 = vld [vmem:[%s721_s0 + $0x18] sm:$0xff]  ;;  %v46_v28 = vshrl.u32 %v45_v27, 7 }
   0x3   :  { %v33_v5 = vpack.c.bf16 %v18_v4, %v17_v3  ;;  %v25_v6 = vld [vmem:[%s721_s0 + $0x40] sm:$0xff]  ;;  %v26_v7 = vld [vmem:[%s721_s0 + $0x48] sm:$0xff]  ;;  %105 = vmatpush1.bf16.msra.mxu0 %v544_v2  ;;  %540 = vmatpush1.bf16.msra.mxu1 %v544_v2  ;;  %v27_v11 = vld [vmem:[%s721_s0 + $0x50] sm:$0xff]  ;;  %v34_v13 = vpack.c.bf16 %v20_v10, %v19_v9 }
   0x4   :  { %v37_v8 = vpack.c.bf16 %v26_v7, %v25_v6  ;;  %v28_v12 = vld [vmem:[%s721_s0 + $0x58] sm:$0xff]  ;;  %v21_v15 = vld [vmem:[%s721_s0 + $0x20] sm:$0xff]  ;;  %v22_v16 = vld [vmem:[%s721_s0 + $0x28] sm:$0xff]  ;;  %v47_v29 = vsub.s32 0, %v46_v28  ;;  %v51_v31 = vsub.s32 1, %v46_v28 }
   0x5   :  { %v38_v14 = vpack.c.bf16 %v28_v12, %v27_v11  ;;  %v29_v17 = vld [vmem:[%s721_s0 + $0x60] sm:$0xff]  ;;  %v30_v18 = vld [vmem:[%s721_s0 + $0x68] sm:$0xff]  ;;  %v35_v19 = vpack.c.bf16 %v22_v16, %v21_v15  ;;  %v23_v21 = vld [vmem:[%s721_s0 + $0x30] sm:$0xff] }
   0x6   :  { %373 = vmatmul.mubr.msk.bf16.vlgmr.msra.gmra.mxu0 %vm65_vm0, %v33_v5  ;;  %377 = vmatmul.mubr.msk.bf16.vlgmr.msra.gmra.mxu1 %vm65_vm0, %v37_v8  ;;  %v39_v20 = vpack.c.bf16 %v30_v18, %v29_v17  ;;  %v24_v22 = vld [vmem:[%s721_s0 + $0x38] sm:$0xff]  ;;  %v31_v23 = vld [vmem:[%s721_s0 + $0x70] sm:$0xff]  ;;  %v43_v30 = vld [vmem:[%s722_s2] sm:$0x3] }
   0x7   :  { %132 = vmatprep.mubr.bf16.mxu0 %v545_v1  ;;  %172 = vmatprep.mubr.bf16.mxu1 %v545_v1  ;;  %v32_v24 = vld [vmem:[%s721_s0 + $0x78] sm:$0xff]  ;;  %v36_v25 = vpack.c.bf16 %v24_v22, %v23_v21  ;;  %v636_v34 = vrot.slane %v43_v30, %v47_v29  ;;  %v638_v35 = vrot.slane %v43_v30, %v51_v31 }
   0x8   :  { %v40_v26 = vpack.c.bf16 %v32_v24, %v31_v23 }
   0xe   :  { %374 = vmatmul.mubr.msk.bf16.gmra.mxu0 %vm65_vm0, %v34_v13  ;;  %378 = vmatmul.mubr.msk.bf16.gmra.mxu1 %vm65_vm0, %v38_v14 }
   0xf   :  { %142 = vmatprep.mubr.bf16.mxu0 %v545_v1  ;;  %182 = vmatprep.mubr.bf16.mxu1 %v545_v1 }
  0x16   :  { %375 = vmatmul.mubr.msk.bf16.gmra.mxu0 %vm65_vm0, %v35_v19  ;;  %379 = vmatmul.mubr.msk.bf16.gmra.mxu1 %vm65_vm0, %v39_v20 }
  0x17   :  { %152 = vmatprep.mubr.bf16.mxu0 %v545_v1  ;;  %192 = vmatprep.mubr.bf16.mxu1 %v545_v1 }
  0x1e   :  { %376 = vmatmul.mubr.msk.bf16.gmra.mxu0 %vm65_vm0, %v36_v25  ;;  %380 = vmatmul.mubr.msk.bf16.gmra.mxu1 %vm65_vm0, %v40_v26 }
  0xc6   :  { %v124_v32 = vpop.f32.mrf.mxu0  ;;  %v164_v33 = vpop.f32.mrf.mxu1 }
  0xc7   :  { %v125_v40 = vadd.f32 %v124_v32, %v636_v34  ;;  %v165_v41 = vadd.f32 %v164_v33, %v636_v34 }
  0xc8   :  { %v126_v36 = vpop.f32.mrf.mxu0  ;;  %v166_v37 = vpop.f32.mrf.mxu1 }
  0xc9   :  { %v127_v44 = vadd.f32 %v126_v36, %v638_v35  ;;  %v167_v45 = vadd.f32 %v166_v37, %v638_v35 }
  0xca   :  { %v128_v38 = vpop.f32.mrf.mxu0  ;;  %v168_v39 = vpop.f32.mrf.mxu1 }
  0xcb   :  { %v129_v42 = vadd.f32 %v128_v38, %v636_v34  ;;  %v169_v43 = vadd.f32 %v168_v39, %v636_v34 }
  0xcc   :  { %v130_v46 = vpop.f32.mrf.mxu0  ;;  %v170_v47 = vpop.f32.mrf.mxu1 }
  0xcd   :  { %v448_v48 = vpack.c.bf16 %v129_v42, %v125_v40  ;;  %v468_v49 = vpack.c.bf16 %v169_v43, %v165_v41  ;;  %v131_v50 = vadd.f32 %v130_v46, %v638_v35  ;;  %v171_v51 = vadd.f32 %v170_v47, %v638_v35 }
  0xce   :  { %v134_v52 = vpop.f32.mrf.mxu0  ;;  %v174_v53 = vpop.f32.mrf.mxu1 }
  0xcf   :  { %449 = vst [vmem:[%s723_s3] sm:$0xff] %v448_v48   ;;  %528 = vst [vmem:[%s723_s3 + $0x20] sm:$0xff] %v468_v49   ;;  %v488_v54 = vpack.c.bf16 %v131_v50, %v127_v44  ;;  %v508_v55 = vpack.c.bf16 %v171_v51, %v167_v45  ;;  %v135_v60 = vadd.f32 %v134_v52, %v636_v34 }
  0xd0   :  { %v136_v56 = vpop.f32.mrf.mxu0  ;;  %v176_v57 = vpop.f32.mrf.mxu1  ;;  %v175_v61 = vadd.f32 %v174_v53, %v636_v34 }
  0xd1   :  { %489 = vst [vmem:[%s724_s4] sm:$0xff] %v488_v54   ;;  %535 = vst [vmem:[%s724_s4 + $0x20] sm:$0xff] %v508_v55   ;;  %v137_v0 = vadd.f32 %v136_v56, %v638_v35  ;;  %v177_v1 = vadd.f32 %v176_v57, %v638_v35 }
  0xd2   :  { %v138_v58 = vpop.f32.mrf.mxu0  ;;  %v178_v59 = vpop.f32.mrf.mxu1 }
  0xd3   :  { %v139_v62 = vadd.f32 %v138_v58, %v636_v34  ;;  %v179_v63 = vadd.f32 %v178_v59, %v636_v34 }
  0xd4   :  { %v140_v2 = vpop.f32.mrf.mxu0  ;;  %v180_v3 = vpop.f32.mrf.mxu1 }
  0xd5   :  { %v453_v4 = vpack.c.bf16 %v139_v62, %v135_v60  ;;  %v473_v5 = vpack.c.bf16 %v179_v63, %v175_v61  ;;  %v141_v6 = vadd.f32 %v140_v2, %v638_v35  ;;  %v181_v7 = vadd.f32 %v180_v3, %v638_v35 }
  0xd6   :  { %v144_v8 = vpop.f32.mrf.mxu0  ;;  %v184_v9 = vpop.f32.mrf.mxu1 }
  0xd7   :  { %525 = vst [vmem:[%s723_s3 + $0x8] sm:$0xff] %v453_v4   ;;  %529 = vst [vmem:[%s723_s3 + $0x28] sm:$0xff] %v473_v5   ;;  %v493_v10 = vpack.c.bf16 %v141_v6, %v137_v0  ;;  %v513_v11 = vpack.c.bf16 %v181_v7, %v177_v1  ;;  %v145_v16 = vadd.f32 %v144_v8, %v636_v34 }
  0xd8   :  { %v146_v12 = vpop.f32.mrf.mxu0  ;;  %v186_v13 = vpop.f32.mrf.mxu1  ;;  %v185_v17 = vadd.f32 %v184_v9, %v636_v34 }
  0xd9   :  { %532 = vst [vmem:[%s724_s4 + $0x8] sm:$0xff] %v493_v10   ;;  %536 = vst [vmem:[%s724_s4 + $0x28] sm:$0xff] %v513_v11   ;;  %v147_v20 = vadd.f32 %v146_v12, %v638_v35  ;;  %v187_v21 = vadd.f32 %v186_v13, %v638_v35 }
  0xda   :  { %v148_v14 = vpop.f32.mrf.mxu0  ;;  %v188_v15 = vpop.f32.mrf.mxu1 }
  0xdb   :  { %v149_v18 = vadd.f32 %v148_v14, %v636_v34  ;;  %v189_v19 = vadd.f32 %v188_v15, %v636_v34 }
  0xdc   :  { %v150_v22 = vpop.f32.mrf.mxu0  ;;  %v190_v23 = vpop.f32.mrf.mxu1 }
  0xdd   :  { %v458_v24 = vpack.c.bf16 %v149_v18, %v145_v16  ;;  %v478_v25 = vpack.c.bf16 %v189_v19, %v185_v17  ;;  %v151_v26 = vadd.f32 %v150_v22, %v638_v35  ;;  %v191_v27 = vadd.f32 %v190_v23, %v638_v35 }
  0xde   :  { %v154_v28 = vpop.f32.mrf.mxu0  ;;  %v194_v29 = vpop.f32.mrf.mxu1 }
  0xdf   :  { %526 = vst [vmem:[%s723_s3 + $0x10] sm:$0xff] %v458_v24   ;;  %530 = vst [vmem:[%s723_s3 + $0x30] sm:$0xff] %v478_v25   ;;  %v498_v30 = vpack.c.bf16 %v151_v26, %v147_v20  ;;  %v518_v31 = vpack.c.bf16 %v191_v27, %v187_v21  ;;  %v155_v38 = vadd.f32 %v154_v28, %v636_v34 }
  0xe0   :  { %v156_v32 = vpop.f32.mrf.mxu0  ;;  %v196_v33 = vpop.f32.mrf.mxu1  ;;  %v195_v39 = vadd.f32 %v194_v29, %v636_v34 }
  0xe1   :  { %533 = vst [vmem:[%s724_s4 + $0x10] sm:$0xff] %v498_v30   ;;  %537 = vst [vmem:[%s724_s4 + $0x30] sm:$0xff] %v518_v31   ;;  %v157_v42 = vadd.f32 %v156_v32, %v638_v35  ;;  %v197_v43 = vadd.f32 %v196_v33, %v638_v35 }
  0xe2   :  { %v158_v36 = vpop.f32.mrf.mxu0  ;;  %v198_v37 = vpop.f32.mrf.mxu1 }
  0xe3   :  { %v159_v40 = vadd.f32 %v158_v36, %v636_v34  ;;  %v199_v41 = vadd.f32 %v198_v37, %v636_v34 }
  0xe4   :  { %v160_v44 = vpop.f32.mrf.mxu0  ;;  %v200_v45 = vpop.f32.mrf.mxu1 }
  0xe5   :  { %v463_v46 = vpack.c.bf16 %v159_v40, %v155_v38  ;;  %v483_v47 = vpack.c.bf16 %v199_v41, %v195_v39  ;;  %v161_v48 = vadd.f32 %v160_v44, %v638_v35  ;;  %v201_v49 = vadd.f32 %v200_v45, %v638_v35 }
  0xe7   :  { %527 = vst [vmem:[%s723_s3 + $0x18] sm:$0xff] %v463_v46   ;;  %531 = vst [vmem:[%s723_s3 + $0x38] sm:$0xff] %v483_v47   ;;  %v503_v34 = vpack.c.bf16 %v161_v48, %v157_v42  ;;  %v523_v50 = vpack.c.bf16 %v201_v49, %v197_v43 }
  0xe9   :  { %534 = vst [vmem:[%s724_s4 + $0x18] sm:$0xff] %v503_v34   ;;  %538 = vst [vmem:[%s724_s4 + $0x38] sm:$0xff] %v523_v50  }

// kernel: bilstm_forward.3
= control target key start
LH: loop header
LB: loop body
LE: loop exit
PB: predicated region body
PF: predicated region fallthrough
CT: control target
= control target key end

     0   :  { %s3560_s13 = smov 0   ;;  %s3562_s14 = smov 0   ;;  %s4136_s0 = inlined_call_operand.vmem [shape: bf16[8,16,128], index: 0, kind: input, shape index: {}]   ;;  %s4137_s1 = inlined_call_operand.vmem [shape: bf16[8,16,128], index: 1, kind: input, shape index: {}]   ;;  %s4138_s2 = inlined_call_operand.vmem [shape: bf16[32,128], index: 2, kind: input, shape index: {}]   ;;  %s4139_s3 = inlined_call_operand.vmem [shape: bf16[32,128], index: 3, kind: input, shape index: {}]   ;;  %s4140_s4 = inlined_call_operand.vmem [shape: bf16[32,128], index: 4, kind: input, shape index: {}]   ;;  %s4141_s5 = inlined_call_operand.vmem [shape: bf16[32,128], index: 5, kind: input, shape index: {}]   ;;  %s4142_s6 = inlined_call_operand.vmem [shape: f32[1,128], index: 6, kind: input, shape index: {}]   ;;  %s4143_s7 = inlined_call_operand.vmem [shape: bf16[32,128], index: 7, kind: input, shape index: {}]   ;;  %s4144_s8 = inlined_call_operand.vmem [shape: bf16[32,128], index: 8, kind: input, shape index: {}]   ;;  %s4145_s9 = inlined_call_operand.vmem [shape: f32[1,128], index: 9, kind: input, shape index: {}]   ;;  %s4146_s10 = inlined_call_operand.vmem [shape: f32[16,128], index: 10, kind: output, shape index: {}]  }
   0x1   :  { %s3564_s15 = smov 0  }
   0x2 LB: > { %s2837_s16 = sadd.s32 4294967295, %s3498_s15   ;;  %s3577_s17 = sadd.s32 1, %s3498_s15   ;;  %s3498_s15 = sphi %s3564_s15, %s4150_s15   ;;  %s3494_s14 = sphi %s3562_s14, %s4149_s14   ;;  %s3490_s13 = sphi %s3560_s13, %s4148_s13  }
   0x3   : > { %s24_s18 = ssub.s32 %s3498_s15, %s3577_s17  ;;  %s27_s19 = sadd.s32 1, %s3494_s14 }
   0x4   : > { %p25_p0 = scmp.eq.s32.totalorder %s24_s18, 0  ;;  %p34_p1 = scmp.ne.s32.totalorder %s3494_s14, %s3490_s13 }
   0x5   : > { %p35_p2 = scmp.eq.s32.totalorder %s3498_s15, 0  ;;  %p2840_p4 = scmp.ge.s32.totalorder %s3498_s15, 2 }
   0x6   : > { %s3586_s20 = scalar_select %p25_p0, %s3494_s14, %s27_s19  }
   0x7   : > { %p3588_p3 = por %p35_p2, %p34_p1  ;;  %304 = sbr.rel (%p2840_p4) target bundleno = 30 (0x1e), region = 48 }
   0xc   : > { %307 = sbr.rel (!%p3588_p3) target bundleno = 21 (0x15), region = 52  ;;  %s309_s22 = sand.u32 (%p3588_p3), 1, %s3494_s14  }
   0xd   : > { %s2842_s23 = sshll.u32 (%p3588_p3), %s3498_s15, 2  ;;  %s2841_s24 = sshll.u32 (%p3588_p3), %s309_s22, 5 }
   0xe   : > { %s313_s27 = scalar_lea.vmem (%p3588_p3), %s4136_s0, %s2842_s23  ;;  %s311_s28 = scalar_lea.vmem (%p3588_p3), [#allocation5], %s2841_s24 }
   0xf   : > { %v330_v0 = vld [vmem:[%s313_s27] sm:$0xf] (%p3588_p3)  ;;  %v332_v1 = vld [vmem:[%s313_s27 + $0x8] sm:$0xf] (%p3588_p3)  ;;  %v334_v2 = vld [vmem:[%s313_s27 + $0x10] sm:$0xf] (%p3588_p3) }
  0x10   : > { %331 = vst [vmem:[%s311_s28] sm:$0xf] (%p3588_p3), %v330_v0  ;;  %333 = vst [vmem:[%s311_s28 + $0x4] sm:$0xf] (%p3588_p3), %v332_v1  ;;  %v336_v3 = vld [vmem:[%s313_s27 + $0x18] sm:$0xf] (%p3588_p3) }
  0x11   : > { %v338_v4 = vld [vmem:[%s313_s27 + $0x20] sm:$0xf]  ;;  %335 = vst [vmem:[%s311_s28 + $0x8] sm:$0xf] %v334_v2  ;;  %337 = vst [vmem:[%s311_s28 + $0xc] sm:$0xf] %v336_v3 }
  0x12   : > { %339 = vst [vmem:[%s311_s28 + $0x10] sm:$0xf] %v338_v4  ;;  %v340_v5 = vld [vmem:[%s313_s27 + $0x28] sm:$0xf]  ;;  %v342_v6 = vld [vmem:[%s313_s27 + $0x30] sm:$0xf] }
  0x13   : > { %v344_v7 = vld [vmem:[%s313_s27 + $0x38] sm:$0xf]  ;;  %341 = vst [vmem:[%s311_s28 + $0x14] sm:$0xf] %v340_v5  ;;  %343 = vst [vmem:[%s311_s28 + $0x18] sm:$0xf] %v342_v6 }
  0x14   : > { %345 = vst [vmem:[%s311_s28 + $0x1c] sm:$0xf] %v344_v7 }
  0x15 PF: > { %385 = sbr.rel (!%p3588_p3) target bundleno = 30 (0x1e), region = 93  ;;  %s387_s29 = sand.u32 (%p3588_p3), 1, %s3494_s14  }
  0x16   : > { %s2844_s30 = sshll.u32 (%p3588_p3), %s3498_s15, 2  ;;  %s2843_s11 = sshll.u32 (%p3588_p3), %s387_s29, 5 }
  0x17   : > { %s391_s19 = scalar_lea.vmem (%p3588_p3), %s4137_s1, %s2844_s30  ;;  %s389_s22 = scalar_lea.vmem (%p3588_p3), [#allocation6], %s2843_s11 }
  0x18   : > { %v408_v8 = vld [vmem:[%s391_s19] sm:$0xf] (%p3588_p3)  ;;  %v410_v9 = vld [vmem:[%s391_s19 + $0x8] sm:$0xf] (%p3588_p3)  ;;  %v412_v10 = vld [vmem:[%s391_s19 + $0x10] sm:$0xf] (%p3588_p3) }
  0x19   : > { %409 = vst [vmem:[%s389_s22] sm:$0xf] (%p3588_p3), %v408_v8  ;;  %411 = vst [vmem:[%s389_s22 + $0x4] sm:$0xf] (%p3588_p3), %v410_v9  ;;  %v414_v11 = vld [vmem:[%s391_s19 + $0x18] sm:$0xf] (%p3588_p3) }
  0x1a   : > { %v416_v12 = vld [vmem:[%s391_s19 + $0x20] sm:$0xf]  ;;  %413 = vst [vmem:[%s389_s22 + $0x8] sm:$0xf] %v412_v10  ;;  %415 = vst [vmem:[%s389_s22 + $0xc] sm:$0xf] %v414_v11 }
  0x1b   : > { %417 = vst [vmem:[%s389_s22 + $0x10] sm:$0xf] %v416_v12  ;;  %v418_v13 = vld [vmem:[%s391_s19 + $0x28] sm:$0xf]  ;;  %v420_v14 = vld [vmem:[%s391_s19 + $0x30] sm:$0xf] }
  0x1c   : > { %v422_v15 = vld [vmem:[%s391_s19 + $0x38] sm:$0xf]  ;;  %419 = vst [vmem:[%s389_s22 + $0x14] sm:$0xf] %v418_v13  ;;  %421 = vst [vmem:[%s389_s22 + $0x18] sm:$0xf] %v420_v14 }
  0x1d   : > { %423 = vst [vmem:[%s389_s22 + $0x1c] sm:$0xf] %v422_v15 }
  0x1e PF: > { %p2845_p5 = scmp.ge.s32.totalorder %s3498_s15, 1  ;;  %p462_p6 = scmp.lt.s32.totalorder %s3498_s15, 3 }
  0x20   : > { %p463_p7 = pnand %p2845_p5, %p462_p6 }
  0x21   : > { %s469_s30 = sand.u32 (!%p463_p7), 1, %s3490_s13   ;;  %s3503_s13 = smov (!%p463_p7), 64  }
  0x22   : > { %466 = sbr.rel (%p463_p7) target bundleno = 11343 (0x2c4f), region = 134  ;;  %s2846_s11 = sshll.u32 (!%p463_p7), %s469_s30, 5 }
  0x23   : > { %s3658_s12 = scalar_lea.vmem (!%p463_p7), [#allocation6], %s2846_s11  ;;  %s3663_s18 = scalar_lea.vmem (!%p463_p7), [#allocation5], %s2846_s11 }
  0x24   : > { %s3504_s19 = smov (!%p463_p7), 32   ;;  %p516_p8 = scmp.lt.s32.totalorder (!%p463_p7), %s2837_s16, 1 }
  0x27   : > { %v3612_v16 = vld [vmem:[%s4139_s3 + $0x8] sm:$0xff]   ;;  %v3500_v17 = vmov 0.0   ;;  %v3625_v19 = vld [vmem:[%s4139_s3] sm:$0xff]   ;;  %vm3501_vm0 = vmmov 0   ;;  %v3502_v21 = vmov 0   ;;  %v3661_v22 = vld [vmem:[%s3658_s12 + $0x18] sm:$0xff]  }
  0x28   : > { %3067 = vmatprep.subr.bf16.mxu1 %v3500_v17  ;;  %3059 = vmatprep.subr.bf16.mxu0 %v3500_v17  ;;  %v3619_v18 = vld [vmem:[%s4138_s2 + $0x8] sm:$0xff]   ;;  %v3634_v20 = vld [vmem:[%s4138_s2] sm:$0xff]   ;;  %v613_v24 = vunpack.c.h.bf16 %v3661_v22  ;;  %vm543_vm1 = vcmask 261120   ;;  %v780_v2 = vunpack.c.l.bf16 %v3661_v22  ;;  %vm696_vm2 = vcmask 257024   ;;  %s4152_s16 = smov (!%p516_p8, %s2837_s16), 1 }
  0x29   : > { %3068 = vmatpush3.bf16.msra.mxu1 %v3612_v16  ;;  %3071 = vmatprep.mubr.msk.bf16.mxu1 %vm3501_vm0, %v3500_v17  ;;  %v3666_v23 = vld [vmem:[%s3663_s18] sm:$0xff]   ;;  %s2848_s26 = sshll.u32 %s4152_s16, 3 }
  0x2a   : > { %3069 = vmatprep.subr.bf16.mxu1 %v3500_v17  ;;  %3060 = vmatpush3.bf16.msra.mxu0 %v3619_v18  ;;  %v530_v25 = vunpack.c.l.bf16 %v3666_v23  ;;  %v708_v5 = vunpack.c.h.bf16 %v3666_v23 }
  0x2b   : > { %3061 = vmatprep.subr.bf16.mxu0 %v3500_v17  ;;  %3063 = vmatprep.mubr.msk.bf16.mxu0 %vm3501_vm0, %v3500_v17 }
  0x2d   : > { %3070 = vmatpush3.bf16.msra.mxu1 %v3625_v19 }
  0x2e   : > { %3062 = vmatpush3.bf16.msra.mxu0 %v3634_v20  ;;  %3083 = vmatprep.subr.bf16.mxu1 %v3500_v17 }
  0x2f   : > { %3075 = vmatprep.subr.bf16.mxu0 %v3500_v17 }
  0x30   : > { %3072 = vmatmul.mubr.bf16.vlgmr.msra.gmra.mxu1 %v3502_v21 }
  0x31   : > { %3064 = vmatmul.mubr.bf16.vlgmr.msra.gmra.mxu0 %v3502_v21  ;;  %3084 = vmatpush3.bf16.msra.mxu1 %v3612_v16 }
  0x32   : > { %3085 = vmatprep.subr.bf16.mxu1 %v3500_v17  ;;  %3076 = vmatpush3.bf16.msra.mxu0 %v3619_v18 }
  0x33   : > { %3087 = vmatprep.mubr.msk.bf16.mxu1 %vm3501_vm0, %v3500_v17  ;;  %3077 = vmatprep.subr.bf16.mxu0 %v3500_v17 }
  0x34   : > { %3079 = vmatprep.mubr.msk.bf16.mxu0 %vm3501_vm0, %v3500_v17 }
  0x35   : > { %3086 = vmatpush3.bf16.msra.mxu1 %v3625_v19 }
  0x36   : > { %3078 = vmatpush3.bf16.msra.mxu0 %v3634_v20  ;;  %3099 = vmatprep.subr.bf16.mxu1 %v3500_v17 }
  0x37   : > { %3091 = vmatprep.subr.bf16.mxu0 %v3500_v17 }
  0xf0   : > { %v660_v26 = vpop.f32.mrf.mxu1 }
  0xf1   : > { %v666_v27 = vadd.f32 %v660_v26, %v613_v24  ;;  %v581_v28 = vpop.f32.mrf.mxu0 }
  0xf2   : > { %v3073_v29 = vpop.f32.mrf.mxu1  ;;  %v587_v30 = vadd.f32 %v581_v28, %v530_v25 }
  0xf3   : > { %3332 = vtanh.f32 %v666_v27  ;;  %v3065_v31 = vpop.f32.mrf.mxu0  ;;  %v667_v38 = vmul.f32 0.5, %v666_v27 }
  0xf4   : > { %v663_v32 = vpop.f32.mrf.mxu1  ;;  %3334 = vtanh.f32 %v587_v30  ;;  %v588_v39 = vmul.f32 0.5, %v587_v30 }
  0xf5   : > { %v584_v33 = vpop.f32.mrf.mxu0  ;;  %3336 = vtanh.f32 %v667_v38 }
  0xf6   : > { %v3074_v34 = vpop.f32.mrf.mxu1  ;;  %3338 = vtanh.f32 %v588_v39 }
  0xf7   : > { %v3066_v35 = vpop.f32.mrf.mxu0 }
 0x100   : > { %v3333_v36 = vpop.eup %3332 }
 0x101   : > { %674 = vrot.lane.b32.xlu0 %v3333_v36, %s3503_s13  ;;  %v3335_v37 = vpop.eup %3334 }
 0x102   : > { %v3337_v40 = vpop.eup %3336 }
 0x103   : > { %v669_v41 = vmul.f32 0.5, %v3337_v40  ;;  %v3339_v42 = vpop.eup %3338 }
 0x104   : > { %v590_v43 = vmul.f32 0.5, %v3339_v42 }
 0x105   : > { %595 = vrot.lane.b32.xlu0 %v3335_v37, %s3503_s13  ;;  %v670_v44 = vadd.f32 0.5, %v669_v41 }
 0x106   : > { %v591_v47 = vadd.f32 0.5, %v590_v43 }
 0x107   : > { %v672_v50 = vmul.f32 0.0, %v670_v44 }
 0x108   : > { %v593_v53 = vmul.f32 0.0, %v591_v47 }
 0x173   : > { %v675_v45 = vpop.permute.xlu0 %674 }
 0x174   : > { %v677_v46 = vmul.f32 %v675_v45, %v670_v44 }
 0x176   : > { %679 = vrot.lane.b32.xlu1 %v677_v46, %s3504_s19 }
 0x177   : > { %v596_v48 = vpop.permute.xlu0 %595 }
 0x178   : > { %v598_v49 = vmul.f32 %v596_v48, %v591_v47 }
 0x17a   : > { %600 = vrot.lane.b32.xlu1 %v598_v49, %s3504_s19 }
 0x1e8   : > { %v680_v51 = vpop.permute.xlu1 %679 }
 0x1e9   : > { %v3674_v52 = vadd.f32 %v680_v51, %v672_v50  ;;  %v3743_v50 = vld [vmem:[%s3658_s12 + $0x10] sm:$0xff]  }
 0x1ea   : > { %v940_v51 = vunpack.c.h.bf16 %v3743_v50 }
 0x1eb   : > { %3340 = vtanh.f32 %v3674_v52 }
 0x1ec   : > { %v601_v54 = vpop.permute.xlu1 %600 }
 0x1ed   : > { %v3677_v55 = vadd.f32 %v601_v54, %v593_v53 }
 0x1ef   : > { %3342 = vtanh.f32 %v3677_v55 }
 0x1f8   : > { %v3341_v56 = vpop.eup %3340 }
 0x1f9   : > { %685 = vrot.lane.b32.xlu0 %v3341_v56, %s3503_s13 }
 0x1fc   : > { %v3343_v57 = vpop.eup %3342 }
 0x1fd   : > { %606 = vrot.lane.b32.xlu1 %v3343_v57, %s3503_s13 }
 0x26b   : > { %v686_v58 = vpop.permute.xlu0 %685 }
 0x26c   : > { %v688_v59 = vmul.f32 %v686_v58, %v670_v44 }
 0x26e   : > { %v3682_v60 = vpack.c.bf16 %v688_v59, %v688_v59 }
 0x26f   : > { %v607_v61 = vpop.permute.xlu1 %606 }
 0x270   : > { %v609_v62 = vmul.f32 %v607_v61, %v591_v47  ;;  %781 = vrot.lane.b32.xlu0 %v3682_v60, %s3504_s19 }
 0x272   : > { %v3686_v63 = vpack.c.bf16 %v609_v62, %v609_v62 }
 0x274   : > { %709 = vrot.lane.b32.xlu1 %v3686_v63, %s3504_s19 }
 0x2e2   : > { %v782_v0 = vpop.permute.xlu0 %781 }
 0x2e3   : > { %3088 = vmatmul.mubr.msk.bf16.vlgmr.msra.gmra.mxu1 %vm543_vm1, %v782_v0 }
 0x2e4   : > { %3100 = vmatpush3.bf16.msra.mxu1 %v3612_v16  ;;  %3103 = vmatprep.mubr.msk.bf16.mxu1 %vm3501_vm0, %v3500_v17 }
 0x2e5   : > { %3101 = vmatprep.subr.bf16.mxu1 %v3500_v17 }
 0x2e6   : > { %v710_v1 = vpop.permute.xlu1 %709 }
 0x2e7   : > { %3080 = vmatmul.mubr.msk.bf16.vlgmr.msra.gmra.mxu0 %vm543_vm1, %v710_v1 }
 0x2e8   : > { %3102 = vmatpush3.bf16.msra.mxu1 %v3625_v19  ;;  %3092 = vmatpush3.bf16.msra.mxu0 %v3619_v18 }
 0x2e9   : > { %3093 = vmatprep.subr.bf16.mxu0 %v3500_v17  ;;  %3095 = vmatprep.mubr.msk.bf16.mxu0 %vm3501_vm0, %v3500_v17 }
 0x2ea   : > { %3115 = vmatprep.subr.bf16.mxu1 %v3500_v17 }
 0x2ec   : > { %3094 = vmatpush3.bf16.msra.mxu0 %v3634_v20 }
 0x2ed   : > { %3107 = vmatprep.subr.bf16.mxu0 %v3500_v17 }
 0x3a3   : > { %v820_v3 = vpop.f32.mrf.mxu1 }
 0x3a4   : > { %v826_v4 = vadd.f32 %v820_v3, %v780_v2 }
 0x3a5   : > { %v3089_v6 = vpop.f32.mrf.mxu1 }
 0x3a6   : > { %3344 = vtanh.f32 %v826_v4  ;;  %v827_v22 = vmul.f32 0.5, %v826_v4 }
 0x3a7   : > { %v748_v7 = vpop.f32.mrf.mxu0  ;;  %v823_v8 = vpop.f32.mrf.mxu1 }
 0x3a8   : > { %v754_v9 = vadd.f32 %v748_v7, %v708_v5 }
 0x3a9   : > { %v3081_v10 = vpop.f32.mrf.mxu0  ;;  %v3090_v11 = vpop.f32.mrf.mxu1 }
 0x3aa   : > { %3346 = vtanh.f32 %v754_v9  ;;  %v755_v24 = vmul.f32 0.5, %v754_v9 }
 0x3ab   : > { %v751_v12 = vpop.f32.mrf.mxu0  ;;  %3348 = vtanh.f32 %v827_v22 }
 0x3ac   : > { %3350 = vtanh.f32 %v755_v24 }
 0x3ad   : > { %v3082_v13 = vpop.f32.mrf.mxu0 }
 0x3b3   : > { %v3345_v14 = vpop.eup %3344 }
 0x3b4   : > { %834 = vrot.lane.b32.xlu0 %v3345_v14, %s3503_s13 }
 0x3b7   : > { %v3347_v15 = vpop.eup %3346 }
 0x3b8   : > { %762 = vrot.lane.b32.xlu1 %v3347_v15, %s3503_s13  ;;  %v3349_v23 = vpop.eup %3348 }
 0x3b9   : > { %v829_v25 = vmul.f32 0.5, %v3349_v23  ;;  %v3351_v26 = vpop.eup %3350 }
 0x3ba   : > { %v757_v27 = vmul.f32 0.5, %v3351_v26 }
 0x3bb   : > { %v830_v28 = vadd.f32 0.5, %v829_v25 }
 0x3bc   : > { %v758_v31 = vadd.f32 0.5, %v757_v27 }
 0x3bd   : > { %v832_v34 = vmul.f32 %v830_v28, %v3674_v52  ;;  %v3747_v52 = vld [vmem:[%s3663_s18 + $0x8] sm:$0xff]  }
 0x3be   : > { %v760_v37 = vmul.f32 %v758_v31, %v3677_v55  ;;  %v868_v55 = vunpack.c.l.bf16 %v3747_v52 }
 0x426   : > { %v835_v29 = vpop.permute.xlu0 %834 }
 0x427   : > { %v837_v30 = vmul.f32 %v835_v29, %v830_v28 }
 0x429   : > { %839 = vrot.lane.b32.xlu0 %v837_v30, %s3504_s19 }
 0x42a   : > { %v763_v32 = vpop.permute.xlu1 %762 }
 0x42b   : > { %v765_v33 = vmul.f32 %v763_v32, %v758_v31 }
 0x42d   : > { %767 = vrot.lane.b32.xlu1 %v765_v33, %s3504_s19 }
 0x49b   : > { %v840_v35 = vpop.permute.xlu0 %839 }
 0x49c   : > { %v3711_v36 = vadd.f32 %v840_v35, %v832_v34 }
 0x49e   : > { %3352 = vtanh.f32 %v3711_v36 }
 0x49f   : > { %v768_v38 = vpop.permute.xlu1 %767 }
 0x4a0   : > { %v3715_v39 = vadd.f32 %v768_v38, %v760_v37  ;;  %v1100_v38 = vunpack.c.l.bf16 %v3743_v50 }
 0x4a2   : > { %3354 = vtanh.f32 %v3715_v39 }
 0x4ab   : > { %v3353_v40 = vpop.eup %3352 }
 0x4ac   : > { %845 = vrot.lane.b32.xlu0 %v3353_v40, %s3503_s13 }
 0x4af   : > { %v3355_v41 = vpop.eup %3354 }
 0x4b0   : > { %773 = vrot.lane.b32.xlu1 %v3355_v41, %s3503_s13  ;;  %v1028_v41 = vunpack.c.h.bf16 %v3747_v52 }
 0x51e   : > { %v846_v42 = vpop.permute.xlu0 %845 }
 0x51f   : > { %v848_v43 = vmul.f32 %v846_v42, %v830_v28 }
 0x521   : > { %v3720_v44 = vpack.c.bf16 %v848_v43, %v848_v43 }
 0x522   : > { %v774_v45 = vpop.permute.xlu1 %773 }
 0x523   : > { %v776_v46 = vmul.f32 %v774_v45, %v758_v31  ;;  %941 = vrot.lane.b32.xlu0 %v3720_v44, %s3504_s19 }
 0x525   : > { %v3724_v47 = vpack.c.bf16 %v776_v46, %v776_v46 }
 0x527   : > { %869 = vrot.lane.b32.xlu1 %v3724_v47, %s3504_s19 }
 0x595   : > { %v942_v48 = vpop.permute.xlu0 %941 }
 0x596   : > { %3104 = vmatmul.mubr.msk.bf16.vlgmr.msra.gmra.mxu1 %vm543_vm1, %v942_v48 }
 0x597   : > { %3116 = vmatpush3.bf16.msra.mxu1 %v3612_v16  ;;  %3119 = vmatprep.mubr.msk.bf16.mxu1 %vm3501_vm0, %v3500_v17 }
 0x598   : > { %3117 = vmatprep.subr.bf16.mxu1 %v3500_v17 }
 0x599   : > { %v870_v49 = vpop.permute.xlu1 %869 }
 0x59a   : > { %3096 = vmatmul.mubr.msk.bf16.vlgmr.msra.gmra.mxu0 %vm543_vm1, %v870_v49 }
 0x59b   : > { %3118 = vmatpush3.bf16.msra.mxu1 %v3625_v19  ;;  %3108 = vmatpush3.bf16.msra.mxu0 %v3619_v18 }
 0x59c   : > { %3109 = vmatprep.subr.bf16.mxu0 %v3500_v17  ;;  %3111 = vmatprep.mubr.msk.bf16.mxu0 %vm3501_vm0, %v3500_v17 }
 0x59d   : > { %3131 = vmatprep.subr.bf16.mxu1 %v3500_v17 }
 0x59f   : > { %3110 = vmatpush3.bf16.msra.mxu0 %v3634_v20 }
 0x5a0   : > { %3123 = vmatprep.subr.bf16.mxu0 %v3500_v17 }
 0x656   : > { %v980_v53 = vpop.f32.mrf.mxu1 }
 0x657   : > { %v986_v54 = vadd.f32 %v980_v53, %v940_v51 }
 0x658   : > { %v3105_v56 = vpop.f32.mrf.mxu1 }
 0x659   : > { %3356 = vtanh.f32 %v986_v54  ;;  %v987_v4 = vmul.f32 0.5, %v986_v54 }
 0x65a   : > { %v908_v57 = vpop.f32.mrf.mxu0  ;;  %v983_v58 = vpop.f32.mrf.mxu1 }
 0x65b   : > { %v914_v59 = vadd.f32 %v908_v57, %v868_v55 }
 0x65c   : > { %v3097_v61 = vpop.f32.mrf.mxu0  ;;  %v3106_v62 = vpop.f32.mrf.mxu1 }
 0x65d   : > { %3358 = vtanh.f32 %v914_v59  ;;  %v915_v5 = vmul.f32 0.5, %v914_v59 }
 0x65e   : > { %v911_v0 = vpop.f32.mrf.mxu0  ;;  %3360 = vtanh.f32 %v987_v4 }
 0x65f   : > { %3362 = vtanh.f32 %v915_v5 }
 0x660   : > { %v3098_v1 = vpop.f32.mrf.mxu0 }
 0x666   : > { %v3357_v2 = vpop.eup %3356 }
 0x667   : > { %994 = vrot.lane.b32.xlu0 %v3357_v2, %s3503_s13 }
 0x66a   : > { %v3359_v3 = vpop.eup %3358 }
 0x66b   : > { %922 = vrot.lane.b32.xlu1 %v3359_v3, %s3503_s13  ;;  %v3361_v6 = vpop.eup %3360 }
 0x66c   : > { %v989_v7 = vmul.f32 0.5, %v3361_v6  ;;  %v3363_v8 = vpop.eup %3362 }
 0x66d   : > { %v917_v10 = vmul.f32 0.5, %v3363_v8 }
 0x66e   : > { %v990_v9 = vadd.f32 0.5, %v989_v7 }
 0x66f   : > { %v918_v13 = vadd.f32 0.5, %v917_v10 }
 0x670   : > { %v992_v22 = vmul.f32 %v990_v9, %v3711_v36 }
 0x671   : > { %v920_v25 = vmul.f32 %v918_v13, %v3715_v39 }
 0x6d9   : > { %v995_v11 = vpop.permute.xlu0 %994 }
 0x6da   : > { %v997_v12 = vmul.f32 %v995_v11, %v990_v9 }
 0x6dc   : > { %999 = vrot.lane.b32.xlu0 %v997_v12, %s3504_s19 }
 0x6dd   : > { %v923_v14 = vpop.permute.xlu1 %922 }
 0x6de   : > { %v925_v15 = vmul.f32 %v923_v14, %v918_v13 }
 0x6e0   : > { %927 = vrot.lane.b32.xlu1 %v925_v15, %s3504_s19 }
 0x74e   : > { %v1000_v24 = vpop.permute.xlu0 %999 }
 0x74f   : > { %v3755_v23 = vadd.f32 %v1000_v24, %v992_v22 }
 0x751   : > { %3364 = vtanh.f32 %v3755_v23 }
 0x752   : > { %v928_v26 = vpop.permute.xlu1 %927 }
 0x753   : > { %v3759_v27 = vadd.f32 %v928_v26, %v920_v25  ;;  %v3825_v26 = vld [vmem:[%s3658_s12 + $0x8] sm:$0xff]  }
 0x755   : > { %3366 = vtanh.f32 %v3759_v27 }
 0x75e   : > { %v3365_v28 = vpop.eup %3364 }
 0x75f   : > { %1005 = vrot.lane.b32.xlu0 %v3365_v28, %s3503_s13  ;;  %v3829_v28 = vld [vmem:[%s3663_s18 + $0x10] sm:$0xff]  }
 0x762   : > { %v3367_v29 = vpop.eup %3366 }
 0x763   : > { %933 = vrot.lane.b32.xlu1 %v3367_v29, %s3503_s13 }
 0x7d1   : > { %v1006_v30 = vpop.permute.xlu0 %1005 }
 0x7d2   : > { %v1008_v31 = vmul.f32 %v1006_v30, %v990_v9 }
 0x7d4   : > { %v3764_v32 = vpack.c.bf16 %v1008_v31, %v1008_v31  ;;  %v1188_v31 = vunpack.c.l.bf16 %v3829_v28 }
 0x7d5   : > { %v934_v33 = vpop.permute.xlu1 %933 }
 0x7d6   : > { %v936_v34 = vmul.f32 %v934_v33, %v918_v13  ;;  %1101 = vrot.lane.b32.xlu0 %v3764_v32, %s3504_s19 }
 0x7d8   : > { %v3768_v35 = vpack.c.bf16 %v936_v34, %v936_v34 }
 0x7da   : > { %1029 = vrot.lane.b32.xlu1 %v3768_v35, %s3504_s19 }
 0x848   : > { %v1102_v36 = vpop.permute.xlu0 %1101 }
 0x849   : > { %3120 = vmatmul.mubr.msk.bf16.vlgmr.msra.gmra.mxu1 %vm543_vm1, %v1102_v36 }
 0x84a   : > { %3132 = vmatpush3.bf16.msra.mxu1 %v3612_v16  ;;  %3135 = vmatprep.mubr.msk.bf16.mxu1 %vm3501_vm0, %v3500_v17 }
 0x84b   : > { %3133 = vmatprep.subr.bf16.mxu1 %v3500_v17 }
 0x84c   : > { %v1030_v37 = vpop.permute.xlu1 %1029 }
 0x84d   : > { %3112 = vmatmul.mubr.msk.bf16.vlgmr.msra.gmra.mxu0 %vm543_vm1, %v1030_v37 }
 0x84e   : > { %3134 = vmatpush3.bf16.msra.mxu1 %v3625_v19  ;;  %3124 = vmatpush3.bf16.msra.mxu0 %v3619_v18 }
 0x84f   : > { %3125 = vmatprep.subr.bf16.mxu0 %v3500_v17  ;;  %3127 = vmatprep.mubr.msk.bf16.mxu0 %vm3501_vm0, %v3500_v17 }
 0x850   : > { %3147 = vmatprep.subr.bf16.mxu1 %v3500_v17 }
 0x852   : > { %3126 = vmatpush3.bf16.msra.mxu0 %v3634_v20 }
 0x853   : > { %3139 = vmatprep.subr.bf16.mxu0 %v3500_v17 }
 0x909   : > { %v1140_v39 = vpop.f32.mrf.mxu1 }
 0x90a   : > { %v1146_v40 = vadd.f32 %v1140_v39, %v1100_v38 }
 0x90b   : > { %v3121_v42 = vpop.f32.mrf.mxu1 }
 0x90c   : > { %3368 = vtanh.f32 %v1146_v40  ;;  %v1147_v50 = vmul.f32 0.5, %v1146_v40 }
 0x90d   : > { %v1068_v43 = vpop.f32.mrf.mxu0  ;;  %v1143_v45 = vpop.f32.mrf.mxu1 }
 0x90e   : > { %v1074_v46 = vadd.f32 %v1068_v43, %v1028_v41 }
 0x90f   : > { %v3113_v48 = vpop.f32.mrf.mxu0  ;;  %v3122_v49 = vpop.f32.mrf.mxu1 }
 0x910   : > { %3370 = vtanh.f32 %v1074_v46  ;;  %v1075_v56 = vmul.f32 0.5, %v1074_v46 }
 0x911   : > { %v1071_v51 = vpop.f32.mrf.mxu0  ;;  %3372 = vtanh.f32 %v1147_v50 }
 0x912   : > { %3374 = vtanh.f32 %v1075_v56 }
 0x913   : > { %v3114_v53 = vpop.f32.mrf.mxu0 }
 0x919   : > { %v3369_v54 = vpop.eup %3368 }
 0x91a   : > { %1154 = vrot.lane.b32.xlu0 %v3369_v54, %s3503_s13 }
 0x91d   : > { %v3371_v55 = vpop.eup %3370 }
 0x91e   : > { %1082 = vrot.lane.b32.xlu1 %v3371_v55, %s3503_s13  ;;  %v3373_v52 = vpop.eup %3372 }
 0x91f   : > { %v1149_v57 = vmul.f32 0.5, %v3373_v52  ;;  %v3375_v58 = vpop.eup %3374 }
 0x920   : > { %v1077_v61 = vmul.f32 0.5, %v3375_v58 }
 0x921   : > { %v1150_v59 = vadd.f32 0.5, %v1149_v57 }
 0x922   : > { %v1078_v1 = vadd.f32 0.5, %v1077_v61 }
 0x923   : > { %v1152_v4 = vmul.f32 %v1150_v59, %v3755_v23 }
 0x924   : > { %v1080_v7 = vmul.f32 %v1078_v1, %v3759_v27  ;;  %v1260_v27 = vunpack.c.h.bf16 %v3825_v26 }
 0x98c   : > { %v1155_v62 = vpop.permute.xlu0 %1154 }
 0x98d   : > { %v1157_v0 = vmul.f32 %v1155_v62, %v1150_v59 }
 0x98f   : > { %1159 = vrot.lane.b32.xlu0 %v1157_v0, %s3504_s19 }
 0x990   : > { %v1083_v2 = vpop.permute.xlu1 %1082 }
 0x991   : > { %v1085_v3 = vmul.f32 %v1083_v2, %v1078_v1 }
 0x993   : > { %1087 = vrot.lane.b32.xlu1 %v1085_v3, %s3504_s19 }
 0xa01   : > { %v1160_v5 = vpop.permute.xlu0 %1159 }
 0xa02   : > { %v3793_v6 = vadd.f32 %v1160_v5, %v1152_v4 }
 0xa04   : > { %3376 = vtanh.f32 %v3793_v6 }
 0xa05   : > { %v1088_v8 = vpop.permute.xlu1 %1087 }
 0xa06   : > { %v3797_v9 = vadd.f32 %v1088_v8, %v1080_v7 }
 0xa08   : > { %3378 = vtanh.f32 %v3797_v9 }
 0xa11   : > { %v3377_v10 = vpop.eup %3376 }
 0xa12   : > { %1165 = vrot.lane.b32.xlu0 %v3377_v10, %s3503_s13 }
 0xa15   : > { %v3379_v11 = vpop.eup %3378 }
 0xa16   : > { %1093 = vrot.lane.b32.xlu1 %v3379_v11, %s3503_s13 }
 0xa84   : > { %v1166_v12 = vpop.permute.xlu0 %1165 }
 0xa85   : > { %v1168_v13 = vmul.f32 %v1166_v12, %v1150_v59  ;;  %v1420_v12 = vunpack.c.l.bf16 %v3825_v26 }
 0xa87   : > { %v3802_v14 = vpack.c.bf16 %v1168_v13, %v1168_v13 }
 0xa88   : > { %v1094_v15 = vpop.permute.xlu1 %1093 }
 0xa89   : > { %v1096_v22 = vmul.f32 %v1094_v15, %v1078_v1  ;;  %1261 = vrot.lane.b32.xlu0 %v3802_v14, %s3504_s19 }
 0xa8b   : > { %v3806_v24 = vpack.c.bf16 %v1096_v22, %v1096_v22  ;;  %v1348_v22 = vunpack.c.h.bf16 %v3829_v28 }
 0xa8d   : > { %1189 = vrot.lane.b32.xlu1 %v3806_v24, %s3504_s19 }
 0xafb   : > { %v1262_v23 = vpop.permute.xlu0 %1261 }
 0xafc   : > { %3136 = vmatmul.mubr.msk.bf16.vlgmr.msra.gmra.mxu1 %vm543_vm1, %v1262_v23 }
 0xafd   : > { %3148 = vmatpush3.bf16.msra.mxu1 %v3612_v16  ;;  %3151 = vmatprep.mubr.msk.bf16.mxu1 %vm3501_vm0, %v3500_v17 }
 0xafe   : > { %3149 = vmatprep.subr.bf16.mxu1 %v3500_v17 }
 0xaff   : > { %v1190_v25 = vpop.permute.xlu1 %1189 }
 0xb00   : > { %3128 = vmatmul.mubr.msk.bf16.vlgmr.msra.gmra.mxu0 %vm543_vm1, %v1190_v25 }
 0xb01   : > { %3150 = vmatpush3.bf16.msra.mxu1 %v3625_v19  ;;  %3140 = vmatpush3.bf16.msra.mxu0 %v3619_v18 }
 0xb02   : > { %3141 = vmatprep.subr.bf16.mxu0 %v3500_v17  ;;  %3143 = vmatprep.mubr.msk.bf16.mxu0 %vm3501_vm0, %v3500_v17 }
 0xb03   : > { %3163 = vmatprep.subr.bf16.mxu1 %v3500_v17 }
 0xb05   : > { %3142 = vmatpush3.bf16.msra.mxu0 %v3634_v20 }
 0xb06   : > { %3155 = vmatprep.subr.bf16.mxu0 %v3500_v17 }
 0xbbc   : > { %v1300_v29 = vpop.f32.mrf.mxu1 }
 0xbbd   : > { %v1306_v30 = vadd.f32 %v1300_v29, %v1260_v27 }
 0xbbe   : > { %v3137_v33 = vpop.f32.mrf.mxu1 }
 0xbbf   : > { %3380 = vtanh.f32 %v1306_v30  ;;  %v1307_v45 = vmul.f32 0.5, %v1306_v30 }
 0xbc0   : > { %v1228_v34 = vpop.f32.mrf.mxu0  ;;  %v1303_v36 = vpop.f32.mrf.mxu1 }
 0xbc1   : > { %v1234_v37 = vadd.f32 %v1228_v34, %v1188_v31 }
 0xbc2   : > { %v3129_v38 = vpop.f32.mrf.mxu0  ;;  %v3138_v39 = vpop.f32.mrf.mxu1 }
 0xbc3   : > { %3382 = vtanh.f32 %v1234_v37  ;;  %v1235_v46 = vmul.f32 0.5, %v1234_v37 }
 0xbc4   : > { %v1231_v40 = vpop.f32.mrf.mxu0  ;;  %3384 = vtanh.f32 %v1307_v45 }
 0xbc5   : > { %3386 = vtanh.f32 %v1235_v46 }
 0xbc6   : > { %v3130_v41 = vpop.f32.mrf.mxu0 }
 0xbcc   : > { %v3381_v42 = vpop.eup %3380 }
 0xbcd   : > { %1314 = vrot.lane.b32.xlu0 %v3381_v42, %s3503_s13 }
 0xbd0   : > { %v3383_v43 = vpop.eup %3382 }
 0xbd1   : > { %1242 = vrot.lane.b32.xlu1 %v3383_v43, %s3503_s13  ;;  %v3385_v48 = vpop.eup %3384 }
 0xbd2   : > { %v1309_v49 = vmul.f32 0.5, %v3385_v48  ;;  %v3387_v51 = vpop.eup %3386 }
 0xbd3   : > { %v1237_v54 = vmul.f32 0.5, %v3387_v51 }
 0xbd4   : > { %v1310_v53 = vadd.f32 0.5, %v1309_v49 }
 0xbd5   : > { %v1238_v56 = vadd.f32 0.5, %v1237_v54 }
 0xbd6   : > { %v1312_v58 = vmul.f32 %v1310_v53, %v3793_v6 }
 0xbd7   : > { %v1240_v62 = vmul.f32 %v1238_v56, %v3797_v9 }
 0xc3f   : > { %v1315_v55 = vpop.permute.xlu0 %1314 }
 0xc40   : > { %v1317_v50 = vmul.f32 %v1315_v55, %v1310_v53 }
 0xc42   : > { %1319 = vrot.lane.b32.xlu0 %v1317_v50, %s3504_s19 }
 0xc43   : > { %v1243_v52 = vpop.permute.xlu1 %1242 }
 0xc44   : > { %v1245_v57 = vmul.f32 %v1243_v52, %v1238_v56 }
 0xc46   : > { %1247 = vrot.lane.b32.xlu1 %v1245_v57, %s3504_s19 }
 0xcb4   : > { %v1320_v59 = vpop.permute.xlu0 %1319 }
 0xcb5   : > { %v3837_v61 = vadd.f32 %v1320_v59, %v1312_v58 }
 0xcb7   : > { %3388 = vtanh.f32 %v3837_v61 }
 0xcb8   : > { %v1248_v0 = vpop.permute.xlu1 %1247 }
 0xcb9   : > { %v3841_v1 = vadd.f32 %v1248_v0, %v1240_v62 }
 0xcbb   : > { %3390 = vtanh.f32 %v3841_v1 }
 0xcc4   : > { %v3389_v2 = vpop.eup %3388 }
 0xcc5   : > { %1325 = vrot.lane.b32.xlu0 %v3389_v2, %s3503_s13 }
 0xcc8   : > { %v3391_v3 = vpop.eup %3390 }
 0xcc9   : > { %1253 = vrot.lane.b32.xlu1 %v3391_v3, %s3503_s13 }
 0xd37   : > { %v1326_v4 = vpop.permute.xlu0 %1325 }
 0xd38   : > { %v1328_v5 = vmul.f32 %v1326_v4, %v1310_v53 }
 0xd3a   : > { %v3846_v6 = vpack.c.bf16 %v1328_v5, %v1328_v5  ;;  %v3909_v5 = vld [vmem:[%s3663_s18 + $0x18] sm:$0xff]  }
 0xd3b   : > { %v1254_v7 = vpop.permute.xlu1 %1253 }
 0xd3c   : > { %v1256_v8 = vmul.f32 %v1254_v7, %v1238_v56  ;;  %1421 = vrot.lane.b32.xlu0 %v3846_v6, %s3504_s19 }
 0xd3e   : > { %v3850_v9 = vpack.c.bf16 %v1256_v8, %v1256_v8 }
 0xd40   : > { %1349 = vrot.lane.b32.xlu1 %v3850_v9, %s3504_s19 }
 0xdae   : > { %v1422_v10 = vpop.permute.xlu0 %1421 }
 0xdaf   : > { %3152 = vmatmul.mubr.msk.bf16.vlgmr.msra.gmra.mxu1 %vm543_vm1, %v1422_v10  ;;  %v1508_v10 = vunpack.c.l.bf16 %v3909_v5 }
 0xdb0   : > { %3164 = vmatpush3.bf16.msra.mxu1 %v3612_v16  ;;  %3167 = vmatprep.mubr.msk.bf16.mxu1 %vm3501_vm0, %v3500_v17 }
 0xdb1   : > { %3165 = vmatprep.subr.bf16.mxu1 %v3500_v17 }
 0xdb2   : > { %v1350_v11 = vpop.permute.xlu1 %1349 }
 0xdb3   : > { %3144 = vmatmul.mubr.msk.bf16.vlgmr.msra.gmra.mxu0 %vm543_vm1, %v1350_v11 }
 0xdb4   : > { %3166 = vmatpush3.bf16.msra.mxu1 %v3625_v19  ;;  %3156 = vmatpush3.bf16.msra.mxu0 %v3619_v18 }
 0xdb5   : > { %3157 = vmatprep.subr.bf16.mxu0 %v3500_v17  ;;  %3159 = vmatprep.mubr.msk.bf16.mxu0 %vm3501_vm0, %v3500_v17 }
 0xdb6   : > { %3179 = vmatprep.subr.bf16.mxu1 %v3500_v17 }
 0xdb8   : > { %3158 = vmatpush3.bf16.msra.mxu0 %v3634_v20 }
 0xdb9   : > { %3171 = vmatprep.subr.bf16.mxu0 %v3500_v17 }
 0xe6f   : > { %v1460_v13 = vpop.f32.mrf.mxu1 }
 0xe70   : > { %v1466_v15 = vadd.f32 %v1460_v13, %v1420_v12 }
 0xe71   : > { %v3153_v23 = vpop.f32.mrf.mxu1 }
 0xe72   : > { %3392 = vtanh.f32 %v1466_v15  ;;  %v1467_v26 = vmul.f32 0.5, %v1466_v15 }
 0xe73   : > { %v1388_v25 = vpop.f32.mrf.mxu0  ;;  %v1463_v27 = vpop.f32.mrf.mxu1 }
 0xe74   : > { %v1394_v29 = vadd.f32 %v1388_v25, %v1348_v22 }
 0xe75   : > { %v3145_v30 = vpop.f32.mrf.mxu0  ;;  %v3154_v31 = vpop.f32.mrf.mxu1 }
 0xe76   : > { %3394 = vtanh.f32 %v1394_v29  ;;  %v1395_v38 = vmul.f32 0.5, %v1394_v29 }
 0xe77   : > { %v1391_v33 = vpop.f32.mrf.mxu0  ;;  %3396 = vtanh.f32 %v1467_v26 }
 0xe78   : > { %3398 = vtanh.f32 %v1395_v38 }
 0xe79   : > { %v3146_v34 = vpop.f32.mrf.mxu0 }
 0xe7f   : > { %v3393_v36 = vpop.eup %3392 }
 0xe80   : > { %1474 = vrot.lane.b32.xlu0 %v3393_v36, %s3503_s13 }
 0xe83   : > { %v3395_v37 = vpop.eup %3394 }
 0xe84   : > { %1402 = vrot.lane.b32.xlu1 %v3395_v37, %s3503_s13  ;;  %v3397_v28 = vpop.eup %3396 }
 0xe85   : > { %v1469_v39 = vmul.f32 0.5, %v3397_v28  ;;  %v3399_v40 = vpop.eup %3398 }
 0xe86   : > { %v1397_v42 = vmul.f32 0.5, %v3399_v40 }
 0xe87   : > { %v1470_v41 = vadd.f32 0.5, %v1469_v39 }
 0xe88   : > { %v1398_v46 = vadd.f32 0.5, %v1397_v42 }
 0xe89   : > { %v1472_v51 = vmul.f32 %v1470_v41, %v3837_v61 }
 0xe8a   : > { %v1400_v55 = vmul.f32 %v1398_v46, %v3841_v1 }
 0xef2   : > { %v1475_v43 = vpop.permute.xlu0 %1474 }
 0xef3   : > { %v1477_v45 = vmul.f32 %v1475_v43, %v1470_v41 }
 0xef5   : > { %1479 = vrot.lane.b32.xlu0 %v1477_v45, %s3504_s19 }
 0xef6   : > { %v1403_v48 = vpop.permute.xlu1 %1402 }
 0xef7   : > { %v1405_v49 = vmul.f32 %v1403_v48, %v1398_v46 }
 0xef9   : > { %1407 = vrot.lane.b32.xlu1 %v1405_v49, %s3504_s19 }
 0xf67   : > { %v1480_v53 = vpop.permute.xlu0 %1479 }
 0xf68   : > { %v3875_v54 = vadd.f32 %v1480_v53, %v1472_v51 }
 0xf6a   : > { %3400 = vtanh.f32 %v3875_v54 }
 0xf6b   : > { %v1408_v50 = vpop.permute.xlu1 %1407 }
 0xf6c   : > { %v3879_v56 = vadd.f32 %v1408_v50, %v1400_v55 }
 0xf6e   : > { %3402 = vtanh.f32 %v3879_v56 }
 0xf77   : > { %v3401_v52 = vpop.eup %3400 }
 0xf78   : > { %1485 = vrot.lane.b32.xlu0 %v3401_v52, %s3503_s13 }
 0xf7b   : > { %v3403_v57 = vpop.eup %3402 }
 0xf7c   : > { %1413 = vrot.lane.b32.xlu1 %v3403_v57, %s3503_s13 }
 0xfea   : > { %v1486_v58 = vpop.permute.xlu0 %1485 }
 0xfeb   : > { %v1488_v59 = vmul.f32 %v1486_v58, %v1470_v41 }
 0xfed   : > { %v3884_v61 = vpack.c.bf16 %v1488_v59, %v1488_v59 }
 0xfee   : > { %v1414_v62 = vpop.permute.xlu1 %1413 }
 0xfef   : > { %v1416_v0 = vmul.f32 %v1414_v62, %v1398_v46  ;;  %1581 = vrot.lane.b32.xlu0 %v3884_v61, %s3504_s19 }
 0xff1   : > { %v3888_v1 = vpack.c.bf16 %v1416_v0, %v1416_v0  ;;  %v1668_v0 = vunpack.c.h.bf16 %v3909_v5 }
 0xff3   : > { %1509 = vrot.lane.b32.xlu1 %v3888_v1, %s3504_s19 }
0x1061   : > { %v1582_v2 = vpop.permute.xlu0 %1581 }
0x1062   : > { %3168 = vmatmul.mubr.msk.bf16.vlgmr.msra.gmra.mxu1 %vm543_vm1, %v1582_v2 }
0x1063   : > { %3180 = vmatpush3.bf16.msra.mxu1 %v3612_v16  ;;  %3183 = vmatprep.mubr.msk.bf16.mxu1 %vm3501_vm0, %v3500_v17  ;;  %v3905_v16 = vld [vmem:[%s3658_s12] sm:$0xff]  }
0x1064   : > { %3181 = vmatprep.subr.bf16.mxu1 %v3500_v17  ;;  %v1580_v4 = vunpack.c.h.bf16 %v3905_v16  ;;  %v1739_v58 = vunpack.c.l.bf16 %v3905_v16 }
0x1065   : > { %v1510_v3 = vpop.permute.xlu1 %1509 }
0x1066   : > { %3160 = vmatmul.mubr.msk.bf16.vlgmr.msra.gmra.mxu0 %vm543_vm1, %v1510_v3 }
0x1067   : > { %3182 = vmatpush3.bf16.msra.mxu1 %v3625_v19  ;;  %3172 = vmatpush3.bf16.msra.mxu0 %v3619_v18 }
0x1068   : > { %3173 = vmatprep.subr.bf16.mxu0 %v3500_v17  ;;  %3175 = vmatprep.mubr.msk.bf16.mxu0 %vm3501_vm0, %v3500_v17 }
0x106b   : > { %3174 = vmatpush3.bf16.msra.mxu0 %v3634_v20 }
0x1122   : > { %v1620_v7 = vpop.f32.mrf.mxu1 }
0x1123   : > { %v1626_v8 = vadd.f32 %v1620_v7, %v1580_v4 }
0x1124   : > { %v3169_v19 = vpop.f32.mrf.mxu1 }
0x1125   : > { %3404 = vtanh.f32 %v1626_v8  ;;  %v1627_v27 = vmul.f32 0.5, %v1626_v8 }
0x1126   : > { %v1548_v18 = vpop.f32.mrf.mxu0  ;;  %v1623_v11 = vpop.f32.mrf.mxu1 }
0x1127   : > { %v1554_v12 = vadd.f32 %v1548_v18, %v1508_v10 }
0x1128   : > { %v3161_v13 = vpop.f32.mrf.mxu0  ;;  %v3170_v15 = vpop.f32.mrf.mxu1 }
0x1129   : > { %3406 = vtanh.f32 %v1554_v12  ;;  %v1555_v29 = vmul.f32 0.5, %v1554_v12 }
0x112a   : > { %v1551_v22 = vpop.f32.mrf.mxu0  ;;  %3408 = vtanh.f32 %v1627_v27 }
0x112b   : > { %3410 = vtanh.f32 %v1555_v29 }
0x112c   : > { %v3162_v20 = vpop.f32.mrf.mxu0 }
0x1132   : > { %v3405_v23 = vpop.eup %3404 }
0x1133   : > { %1634 = vrot.lane.b32.xlu0 %v3405_v23, %s3503_s13 }
0x1136   : > { %v3407_v25 = vpop.eup %3406 }
0x1137   : > { %1562 = vrot.lane.b32.xlu1 %v3407_v25, %s3503_s13  ;;  %v3409_v30 = vpop.eup %3408 }
0x1138   : > { %v1629_v31 = vmul.f32 0.5, %v3409_v30  ;;  %v3411_v33 = vpop.eup %3410 }
0x1139   : > { %v1557_v36 = vmul.f32 0.5, %v3411_v33 }
0x113a   : > { %v1630_v34 = vadd.f32 0.5, %v1629_v31 }
0x113b   : > { %v1558_v38 = vadd.f32 0.5, %v1557_v36 }
0x113c   : > { %v1632_v40 = vmul.f32 %v1630_v34, %v3875_v54 }
0x113d   : > { %v1560_v43 = vmul.f32 %v1558_v38, %v3879_v56 }
0x11a5   : > { %v1635_v37 = vpop.permute.xlu0 %1634 }
0x11a6   : > { %v1637_v26 = vmul.f32 %v1635_v37, %v1630_v34 }
0x11a8   : > { %1639 = vrot.lane.b32.xlu0 %v1637_v26, %s3504_s19 }
0x11a9   : > { %v1563_v28 = vpop.permute.xlu1 %1562 }
0x11aa   : > { %v1565_v39 = vmul.f32 %v1563_v28, %v1558_v38  ;;  %v3316_v28 = vld [vmem:[%s4140_s4 + $0x8] sm:$0xff]  }
0x11ab   : > { %3199 = vmatprep.subr.bf16.mxu1 %v3316_v28 }
0x11ac   : > { %1567 = vrot.lane.b32.xlu1 %v1565_v39, %s3504_s19 }
0x121a   : > { %v1640_v41 = vpop.permute.xlu0 %1639 }
0x121b   : > { %v1642_v42 = vadd.f32 %v1640_v41, %v1632_v40  ;;  %v3317_v40 = vld [vmem:[%s4140_s4] sm:$0xff]  }
0x121d   : > { %3412 = vtanh.f32 %v1642_v42 }
0x121e   : > { %v1568_v45 = vpop.permute.xlu1 %1567 }
0x121f   : > { %v1570_v46 = vadd.f32 %v1568_v45, %v1560_v43 }
0x1221   : > { %3414 = vtanh.f32 %v1570_v46 }
0x122a   : > { %v3413_v48 = vpop.eup %3412 }
0x122b   : > { %1645 = vrot.lane.b32.xlu0 %v3413_v48, %s3503_s13 }
0x122e   : > { %v3415_v49 = vpop.eup %3414 }
0x122f   : > { %1573 = vrot.lane.b32.xlu1 %v3415_v49, %s3503_s13 }
0x129d   : > { %v1646_v51 = vpop.permute.xlu0 %1645 }
0x129e   : > { %v1648_v53 = vmul.f32 %v1646_v51, %v1630_v34 }
0x12a0   : > { %v3920_v55 = vpack.c.bf16 %v1648_v53, %v1648_v53 }
0x12a1   : > { %v1574_v50 = vpop.permute.xlu1 %1573 }
0x12a2   : > { %v1576_v54 = vmul.f32 %v1574_v50, %v1558_v38  ;;  %1740 = vrot.lane.b32.xlu0 %v3920_v55, %s3504_s19  ;;  %v4004_v50 = vld [vmem:[%s4143_s7] sm:$0xff]  }
0x12a4   : > { %v3924_v52 = vpack.c.bf16 %v1576_v54, %v1576_v54 }
0x12a6   : > { %1669 = vrot.lane.b32.xlu1 %v3924_v52, %s3504_s19 }
0x1314   : > { %v1741_v56 = vpop.permute.xlu0 %1740 }
0x1315   : > { %3184 = vmatmul.mubr.msk.bf16.vlgmr.msra.gmra.mxu1 %vm543_vm1, %v1741_v56 }
0x1316   : > { %3200 = vmatpush3.bf16.msra.mxu1 %v3316_v28 }
0x1317   : > { %3201 = vmatprep.subr.bf16.mxu1 %v3317_v40 }
0x1318   : > { %v1670_v57 = vpop.permute.xlu1 %1669 }
0x1319   : > { %3176 = vmatmul.mubr.msk.bf16.vlgmr.msra.gmra.mxu0 %vm543_vm1, %v1670_v57 }
0x131a   : > { %3202 = vmatpush3.bf16.msra.mxu1 %v3317_v40 }
0x131b   : > { %3219 = vmatprep.subr.bf16.mxu1 %v3500_v17 }
0x13d5   : > { %v1779_v59 = vpop.f32.mrf.mxu1 }
0x13d6   : > { %v1785_v62 = vadd.f32 %v1779_v59, %v1739_v58 }
0x13d7   : > { %v3185_v2 = vpop.f32.mrf.mxu1 }
0x13d8   : > { %3416 = vtanh.f32 %v1785_v62  ;;  %v1786_v16 = vmul.f32 0.5, %v1785_v62 }
0x13d9   : > { %v1708_v3 = vpop.f32.mrf.mxu0  ;;  %v1782_v4 = vpop.f32.mrf.mxu1 }
0x13da   : > { %v1714_v7 = vadd.f32 %v1708_v3, %v1668_v0 }
0x13db   : > { %v3177_v8 = vpop.f32.mrf.mxu0  ;;  %v3186_v10 = vpop.f32.mrf.mxu1 }
0x13dc   : > { %3418 = vtanh.f32 %v1714_v7  ;;  %v1715_v13 = vmul.f32 0.5, %v1714_v7 }
0x13dd   : > { %v1711_v19 = vpop.f32.mrf.mxu0  ;;  %3420 = vtanh.f32 %v1786_v16 }
0x13de   : > { %3422 = vtanh.f32 %v1715_v13 }
0x13df   : > { %v3178_v18 = vpop.f32.mrf.mxu0 }
0x13e5   : > { %v3417_v11 = vpop.eup %3416 }
0x13e6   : > { %1793 = vrot.lane.b32.xlu0 %v3417_v11, %s3503_s13 }
0x13e9   : > { %v3419_v12 = vpop.eup %3418 }
0x13ea   : > { %1722 = vrot.lane.b32.xlu1 %v3419_v12, %s3503_s13  ;;  %v3421_v5 = vpop.eup %3420 }
0x13eb   : > { %v1788_v15 = vmul.f32 0.5, %v3421_v5  ;;  %v3423_v22 = vpop.eup %3422 }
0x13ec   : > { %v1717_v23 = vmul.f32 0.5, %v3423_v22 }
0x13ed   : > { %v1789_v20 = vadd.f32 0.5, %v1788_v15 }
0x13ee   : > { %v1718_v29 = vadd.f32 0.5, %v1717_v23 }
0x13ef   : > { %v1791_v33 = vmul.f32 %v1789_v20, %v1642_v42 }
0x13f0   : > { %v1720_v37 = vmul.f32 %v1718_v29, %v1570_v46 }
0x1458   : > { %v1794_v25 = vpop.permute.xlu0 %1793 }
0x1459   : > { %v1796_v27 = vmul.f32 %v1794_v25, %v1789_v20 }
0x145b   : > { %1798 = vrot.lane.b32.xlu0 %v1796_v27, %s3504_s19 }
0x145c   : > { %v1723_v30 = vpop.permute.xlu1 %1722 }
0x145d   : > { %v1725_v31 = vmul.f32 %v1723_v30, %v1718_v29 }
0x145f   : > { %1727 = vrot.lane.b32.xlu1 %v1725_v31, %s3504_s19 }
0x14cd   : > { %v1799_v34 = vpop.permute.xlu0 %1798 }
0x14ce   : > { %v1801_v36 = vadd.f32 %v1799_v34, %v1791_v33 }
0x14d0   : > { %3424 = vtanh.f32 %v1801_v36 }
0x14d1   : > { %v1728_v26 = vpop.permute.xlu1 %1727 }
0x14d2   : > { %v1730_v38 = vadd.f32 %v1728_v26, %v1720_v37 }
0x14d4   : > { %3426 = vtanh.f32 %v1730_v38 }
0x14dd   : > { %v3425_v39 = vpop.eup %3424 }
0x14de   : > { %1804 = vrot.lane.b32.xlu0 %v3425_v39, %s3503_s13 }
0x14e1   : > { %v3427_v41 = vpop.eup %3426 }
0x14e2   : > { %693 = vrot.lane.b32.xlu0 %v3686_v63, %s3504_s19  ;;  %1733 = vrot.lane.b32.xlu1 %v3427_v41, %s3503_s13  ;;  %v3320_v63 = vld [vmem:[%s4141_s5 + $0x8] sm:$0xff]  }
0x14e3   : > { %3187 = vmatprep.subr.bf16.mxu0 %v3320_v63 }
0x14e4   : > { %3188 = vmatpush3.bf16.msra.mxu0 %v3320_v63 }
0x14e6   : > { %1661 = vrot.lane.b32.xlu0 %v3920_v55, %s3504_s19  ;;  %853 = vrot.lane.b32.xlu1 %v3724_v47, %s3504_s19  ;;  %v3321_v47 = vld [vmem:[%s4141_s5] sm:$0xff]  }
0x14e7   : > { %3189 = vmatprep.subr.bf16.mxu0 %v3321_v47 }
0x14e8   : > { %3190 = vmatpush3.bf16.msra.mxu0 %v3321_v47 }
0x14e9   : > { %3211 = vmatprep.subr.bf16.mxu0 %v3500_v17 }
0x14ea   : > { %1013 = vrot.lane.b32.xlu0 %v3768_v35, %s3504_s19  ;;  %1173 = vrot.lane.b32.xlu1 %v3806_v24, %s3504_s19 }
0x14ee   : > { %1341 = vrot.lane.b32.xlu0 %v3846_v6, %s3504_s19  ;;  %1501 = vrot.lane.b32.xlu1 %v3884_v61, %s3504_s19 }
0x14f2   : > { %1021 = vrot.lane.b32.xlu0 %v3764_v32, %s3504_s19  ;;  %1181 = vrot.lane.b32.xlu1 %v3802_v14, %s3504_s19 }
0x14f6   : > { %1333 = vrot.lane.b32.xlu0 %v3850_v9, %s3504_s19 }
0x14fa   : > { %701 = vrot.lane.b32.xlu0 %v3682_v60, %s3504_s19 }
0x14fe   : > { %1653 = vrot.lane.b32.xlu0 %v3924_v52, %s3504_s19 }
0x1550   : > { %v1805_v32 = vpop.permute.xlu0 %1804 }
0x1551   : > { %v1807_v35 = vmul.f32 %v1805_v32, %v1789_v20 }
0x1553   : > { %v2948_v60 = vpack.c.bf16 %v1807_v35, %v1807_v35 }
0x1554   : > { %v694_v14 = vpop.permute.xlu0 %693  ;;  %v1734_v24 = vpop.permute.xlu1 %1733 }
0x1555   : > { %697 = vst.msk [vmem:[#allocation2] sm:$0xf] %vm696_vm2, %v694_v14  ;;  %1820 = vrot.lane.b32.xlu1 %v2948_v60, %s3504_s19  ;;  %v1736_v61 = vmul.f32 %v1734_v24, %v1718_v29 }
0x1557   : > { %v2947_v45 = vpack.c.bf16 %v1736_v61, %v1736_v61 }
0x1558   : > { %v1662_v6 = vpop.permute.xlu0 %1661  ;;  %v854_v9 = vpop.permute.xlu1 %853 }
0x1559   : > { %1665 = vst.msk [vmem:[#allocation3 + $0x4] sm:$0xf] %vm696_vm2, %v1662_v6  ;;  %857 = vst.msk [vmem:[#allocation2 + $0x4] sm:$0xf] %vm696_vm2, %v854_v9  ;;  %1493 = vrot.lane.b32.xlu1 %v3888_v1, %s3504_s19 }
0x155c   : > { %v1014_v42 = vpop.permute.xlu0 %1013  ;;  %v1174_v43 = vpop.permute.xlu1 %1173 }
0x155d   : > { %1017 = vst.msk [vmem:[#allocation2 + $0x8] sm:$0xf] %vm696_vm2, %v1014_v42  ;;  %1177 = vst.msk [vmem:[#allocation2 + $0xc] sm:$0xf] %vm696_vm2, %v1174_v43  ;;  %861 = vrot.lane.b32.xlu1 %v3720_v44, %s3504_s19  ;;  %v3995_v44 = vld [vmem:[%s4143_s7 + $0x8] sm:$0xff]  }
0x1560   : > { %v1342_v46 = vpop.permute.xlu0 %1341  ;;  %v1502_v48 = vpop.permute.xlu1 %1501  ;;  %v3318_v49 = vld [vmem:[#allocation2] sm:$0xff]  }
0x1561   : > { %1345 = vst.msk [vmem:[#allocation3 + $0xc] sm:$0xf] %vm696_vm2, %v1342_v46  ;;  %1505 = vst.msk [vmem:[#allocation3 + $0x8] sm:$0xf] %vm696_vm2, %v1502_v48  ;;  %1812 = vrot.lane.b32.xlu1 %v2947_v45, %s3504_s19  ;;  %3203 = vmatprep.mubr.msk.bf16.mxu1 %vm543_vm1, %v3318_v49 }
0x1564   : > { %v1022_v1 = vpop.permute.xlu0 %1021  ;;  %v1182_v51 = vpop.permute.xlu1 %1181  ;;  %v3319_v53 = vld [vmem:[#allocation2 + $0x8] sm:$0xff]  }
0x1565   : > { %1025 = vst.msk [vmem:[#allocation3 + $0x14] sm:$0xf] %vm696_vm2, %v1022_v1  ;;  %1185 = vst.msk [vmem:[#allocation3 + $0x10] sm:$0xf] %vm696_vm2, %v1182_v51  ;;  %3204 = vmatmul.mubr.msk.bf16.vlgmr.msra.gmra.mxu1 %vm543_vm1, %v3319_v53 }
0x1566   : > { %3220 = vmatpush3.bf16.msra.mxu1 %v3995_v44 }
0x1567   : > { %3221 = vmatprep.subr.bf16.mxu1 %v3500_v17 }
0x1568   : > { %v1334_v55 = vpop.permute.xlu0 %1333  ;;  %v3323_v62 = vld [vmem:[#allocation3 + $0x8] sm:$0xff]  }
0x1569   : > { %1337 = vst.msk [vmem:[#allocation2 + $0x10] sm:$0xf] %vm696_vm2, %v1334_v55 }
0x156a   : > { %3222 = vmatpush3.bf16.msra.mxu1 %v4004_v50 }
0x156b   : > { %3235 = vmatprep.subr.bf16.mxu1 %v3500_v17 }
0x156c   : > { %v702_v54 = vpop.permute.xlu0 %701  ;;  %v3324_v0 = vld [vmem:[#allocation3 + $0x10] sm:$0xff]  }
0x156d   : > { %705 = vst.msk [vmem:[#allocation3 + $0x1c] sm:$0xf] %vm696_vm2, %v702_v54 }
0x1570   : > { %v1654_v52 = vpop.permute.xlu0 %1653 }
0x1571   : > { %1657 = vst.msk [vmem:[#allocation2 + $0x18] sm:$0xf] %vm696_vm2, %v1654_v52 }
0x15c7   : > { %v1821_v56 = vpop.permute.xlu1 %1820 }
0x15c8   : > { %1823 = vst.msk [vmem:[#allocation3] sm:$0xf] %vm696_vm2, %v1821_v56 }
0x15cb   : > { %v1494_v57 = vpop.permute.xlu1 %1493 }
0x15cc   : > { %1497 = vst.msk [vmem:[#allocation2 + $0x14] sm:$0xf] %vm696_vm2, %v1494_v57 }
0x15cf   : > { %v862_v58 = vpop.permute.xlu1 %861  ;;  %v3322_v59 = vld [vmem:[#allocation3] sm:$0xff]  }
0x15d0   : > { %865 = vst.msk [vmem:[#allocation3 + $0x18] sm:$0xf] %vm696_vm2, %v862_v58  ;;  %3191 = vmatprep.mubr.msk.bf16.mxu0 %vm543_vm1, %v3322_v59 }
0x15d1   : > { %3192 = vmatmul.mubr.msk.bf16.vlgmr.msra.gmra.mxu0 %vm543_vm1, %v3323_v62 }
0x15d2   : > { %3195 = vmatprep.mubr.msk.bf16.mxu0 %vm543_vm1, %v3324_v0  ;;  %3212 = vmatpush3.bf16.msra.mxu0 %v3995_v44 }
0x15d3   : > { %v1813_v2 = vpop.permute.xlu1 %1812  ;;  %v3325_v3 = vld [vmem:[#allocation2 + $0x10] sm:$0xff]   ;;  %3213 = vmatprep.subr.bf16.mxu0 %v3500_v17 }
0x15d4   : > { %1816 = vst.msk [vmem:[#allocation2 + $0x1c] sm:$0xf] %vm696_vm2, %v1813_v2  ;;  %3207 = vmatprep.mubr.msk.bf16.mxu1 %vm543_vm1, %v3325_v3 }
0x15d6   : > { %3214 = vmatpush3.bf16.msra.mxu0 %v4004_v50 }
0x15d7   : > { %v3326_v4 = vld [vmem:[#allocation3 + $0x18] sm:$0xff]   ;;  %3227 = vmatprep.subr.bf16.mxu0 %v3500_v17 }
0x15d9   : > { %3196 = vmatmul.mubr.msk.bf16.gmra.mxu0 %vm543_vm1, %v3326_v4 }
0x15da   : > { %3215 = vmatprep.mubr.msk.bf16.mxu0 %vm3501_vm0, %v3500_v17 }
0x15db   : > { %v3327_v7 = vld [vmem:[#allocation2 + $0x18] sm:$0xff]  }
0x15dc   : > { %3208 = vmatmul.mubr.msk.bf16.gmra.mxu1 %vm543_vm1, %v3327_v7 }
0x15dd   : > { %3223 = vmatprep.mubr.msk.bf16.mxu1 %vm3501_vm0, %v3500_v17 }
0x15e1   : > { %3216 = vmatmul.mubr.bf16.vlgmr.msra.gmra.mxu0 %v3502_v21  ;;  %v2917_v21 = vld [vmem:[%s4142_s6] ss:$0 sm:$0xff] }
0x15e2   : > { %3228 = vmatpush3.bf16.msra.mxu0 %v3995_v44  ;;  %3231 = vmatprep.mubr.msk.bf16.mxu0 %vm3501_vm0, %v3500_v17 }
0x15e3   : > { %3229 = vmatprep.subr.bf16.mxu0 %v3500_v17 }
0x15e6   : > { %3230 = vmatpush3.bf16.msra.mxu0 %v4004_v50 }
0x15e7   : > { %3243 = vmatprep.subr.bf16.mxu0 %v3500_v17 }
0x1625   : > { %v3205_v8 = vpop.f32.mrf.mxu1 }
0x1627   : > { %v2035_v10 = vpop.f32.mrf.mxu1 }
0x1629   : > { %v3206_v18 = vpop.f32.mrf.mxu1 }
0x162b   : > { %v2038_v15 = vpop.f32.mrf.mxu1 }
0x1691   : > { %v3193_v19 = vpop.f32.mrf.mxu0 }
0x1692   : > { %v2044_v12 = vadd.f32 %v3205_v8, %v3193_v19 }
0x1693   : > { %v1926_v11 = vpop.f32.mrf.mxu0 }
0x1694   : > { %v2036_v13 = vadd.f32 %v2035_v10, %v1926_v11  ;;  %v2075_v20 = vadd.f32 %v2917_v21, %v2044_v12 }
0x1695   : > { %v3194_v16 = vpop.f32.mrf.mxu0 }
0x1696   : > { %v2047_v5 = vadd.f32 %v3206_v18, %v3194_v16  ;;  %v2073_v29 = vadd.f32 %v2917_v21, %v2036_v13 }
0x1697   : > { %v1929_v22 = vpop.f32.mrf.mxu0 }
0x1698   : > { %v2076_v23 = vadd.f32 %v2917_v21, %v2047_v5  ;;  %v2039_v25 = vadd.f32 %v2038_v15, %v1929_v22 }
0x1699   : > { %v3197_v27 = vpop.f32.mrf.mxu0 }
0x169a   : > { %v2957_v30 = vpack.c.bf16 %v2076_v23, %v2075_v20  ;;  %v2074_v31 = vadd.f32 %v2917_v21, %v2039_v25 }
0x169b   : > { %v1942_v33 = vpop.f32.mrf.mxu0 }
0x169c   : > { %2969 = vst [vmem:[#allocation4 + $0x8] sm:$0xff] %v2957_v30   ;;  %v2952_v34 = vpack.c.bf16 %v2074_v31, %v2073_v29  ;;  %v3209_v36 = vpop.f32.mrf.mxu1 }
0x169d   : > { %v3198_v37 = vpop.f32.mrf.mxu0  ;;  %v2060_v38 = vadd.f32 %v3209_v36, %v3197_v27 }
0x169e   : > { %2953 = vst [vmem:[#allocation4] sm:$0xff] %v2952_v34   ;;  %v2051_v26 = vpop.f32.mrf.mxu1 }
0x169f   : > { %v1945_v28 = vpop.f32.mrf.mxu0  ;;  %v2052_v40 = vadd.f32 %v2051_v26, %v1942_v33  ;;  %v2079_v32 = vadd.f32 %v2917_v21, %v2060_v38 }
0x16a0   : > { %v3210_v39 = vpop.f32.mrf.mxu1 }
0x16a1   : > { %v2063_v41 = vadd.f32 %v3210_v39, %v3198_v37  ;;  %v2150_v63 = vpop.f32.mrf.mxu0  ;;  %v2077_v24 = vadd.f32 %v2917_v21, %v2052_v40 }
0x16a2   : > { %v2054_v47 = vpop.f32.mrf.mxu1 }
0x16a3   : > { %v2080_v35 = vadd.f32 %v2917_v21, %v2063_v41  ;;  %v2055_v60 = vadd.f32 %v2054_v47, %v1945_v28  ;;  %v3217_v14 = vpop.f32.mrf.mxu0 }
0x16a5   : > { %v2967_v6 = vpack.c.bf16 %v2080_v35, %v2079_v32  ;;  %v2078_v9 = vadd.f32 %v2917_v21, %v2055_v60  ;;  %v2153_v61 = vpop.f32.mrf.mxu0 }
0x16a7   : > { %2971 = vst [vmem:[#allocation4 + $0x18] sm:$0xff] %v2967_v6   ;;  %v2962_v42 = vpack.c.bf16 %v2078_v9, %v2077_v24  ;;  %v3218_v43 = vpop.f32.mrf.mxu0 }
0x16a9   : > { %2970 = vst [vmem:[#allocation4 + $0x10] sm:$0xff] %v2962_v42  }
0x16ae   : > { %v2102_v45 = vld [vmem:[#allocation4 + $0x18] sm:$0xff]  }
0x16af   : > { %v2103_v46 = vunpack.c.h.bf16 %v2102_v45  ;;  %v2182_v4 = vunpack.c.l.bf16 %v2102_v45 }
0x16b0   : > { %v2254_v33 = vld [vmem:[#allocation4 + $0x10] sm:$0xff]  }
0x16b1   : > { %v2156_v48 = vadd.f32 %v2150_v63, %v2103_v46  ;;  %v2255_v34 = vunpack.c.h.bf16 %v2254_v33  ;;  %v2328_v45 = vunpack.c.l.bf16 %v2254_v33 }
0x16b3   : > { %3428 = vtanh.f32 %v2156_v48  ;;  %v2157_v1 = vmul.f32 0.5, %v2156_v48 }
0x16b5   : > { %3430 = vtanh.f32 %v2157_v1 }
0x16c0   : > { %v3429_v49 = vpop.eup %3428 }
0x16c1   : > { %2164 = vrot.lane.b32.xlu0 %v3429_v49, %s3503_s13 }
0x16c2   : > { %v3431_v51 = vpop.eup %3430 }
0x16c3   : > { %v2159_v53 = vmul.f32 0.5, %v3431_v51 }
0x16c5   : > { %v2160_v55 = vadd.f32 0.5, %v2159_v53 }
0x16c7   : > { %v2162_v56 = vmul.f32 0.0, %v2160_v55 }
0x1733   : > { %v2165_v54 = vpop.permute.xlu0 %2164 }
0x1734   : > { %v2167_v52 = vmul.f32 %v2165_v54, %v2160_v55 }
0x1736   : > { %2169 = vrot.lane.b32.xlu1 %v2167_v52, %s3504_s19 }
0x17a8   : > { %v2170_v57 = vpop.permute.xlu1 %2169 }
0x17a9   : > { %v2172_v58 = vadd.f32 %v2170_v57, %v2162_v56 }
0x17ab   : > { %3432 = vtanh.f32 %v2172_v58 }
0x17b8   : > { %v3433_v59 = vpop.eup %3432 }
0x17b9   : > { %2175 = vrot.lane.b32.xlu0 %v3433_v59, %s3503_s13 }
0x182b   : > { %v2176_v62 = vpop.permute.xlu0 %2175 }
0x182c   : > { %v2178_v0 = vmul.f32 %v2176_v62, %v2160_v55 }
0x182e   : > { %v2179_v2 = vpack.c.bf16 %v2178_v0, %v2178_v0 }
0x1830   : > { %2184 = vrot.lane.b32.xlu1 %v2179_v2, %s3504_s19 }
0x18a2   : > { %v2185_v3 = vpop.permute.xlu1 %2184 }
0x18a3   : > { %3224 = vmatmul.mubr.msk.bf16.vlgmr.msra.gmra.mxu1 %vm543_vm1, %v2185_v3 }
0x18a4   : > { %3236 = vmatpush3.bf16.msra.mxu1 %v3995_v44  ;;  %3239 = vmatprep.mubr.msk.bf16.mxu1 %vm3501_vm0, %v3500_v17 }
0x18a5   : > { %3237 = vmatprep.subr.bf16.mxu1 %v3500_v17 }
0x18a8   : > { %3238 = vmatpush3.bf16.msra.mxu1 %v4004_v50 }
0x18a9   : > { %3251 = vmatprep.subr.bf16.mxu1 %v3500_v17 }
0x1963   : > { %v2223_v7 = vpop.f32.mrf.mxu1 }
0x1964   : > { %v2229_v8 = vadd.f32 %v2223_v7, %v2182_v4 }
0x1965   : > { %v3225_v10 = vpop.f32.mrf.mxu1 }
0x1966   : > { %3434 = vtanh.f32 %v2229_v8  ;;  %v2230_v12 = vmul.f32 0.5, %v2229_v8  ;;  %v2400_v10 = vld [vmem:[#allocation4 + $0x8] sm:$0xff]  }
0x1967   : > { %v2226_v19 = vpop.f32.mrf.mxu1 }
0x1968   : > { %3436 = vtanh.f32 %v2230_v12  ;;  %v2401_v19 = vunpack.c.h.bf16 %v2400_v10 }
0x1969   : > { %v3226_v18 = vpop.f32.mrf.mxu1 }
0x1973   : > { %v3435_v11 = vpop.eup %3434 }
0x1974   : > { %2237 = vrot.lane.b32.xlu0 %v3435_v11, %s3503_s13 }
0x1975   : > { %v3437_v21 = vpop.eup %3436 }
0x1976   : > { %v2232_v16 = vmul.f32 0.5, %v3437_v21 }
0x1978   : > { %v2233_v13 = vadd.f32 0.5, %v2232_v16 }
0x197a   : > { %v2235_v22 = vmul.f32 %v2233_v13, %v2172_v58 }
0x19e6   : > { %v2238_v5 = vpop.permute.xlu0 %2237 }
0x19e7   : > { %v2240_v15 = vmul.f32 %v2238_v5, %v2233_v13 }
0x19e9   : > { %2242 = vrot.lane.b32.xlu1 %v2240_v15, %s3504_s19 }
0x1a5b   : > { %v2243_v20 = vpop.permute.xlu1 %2242 }
0x1a5c   : > { %v2245_v23 = vadd.f32 %v2243_v20, %v2235_v22 }
0x1a5e   : > { %3438 = vtanh.f32 %v2245_v23 }
0x1a6b   : > { %v3439_v25 = vpop.eup %3438 }
0x1a6c   : > { %2248 = vrot.lane.b32.xlu0 %v3439_v25, %s3503_s13 }
0x1ade   : > { %v2249_v27 = vpop.permute.xlu0 %2248 }
0x1adf   : > { %v2251_v29 = vmul.f32 %v2249_v27, %v2233_v13 }
0x1ae1   : > { %v2252_v30 = vpack.c.bf16 %v2251_v29, %v2251_v29 }
0x1ae3   : > { %2257 = vrot.lane.b32.xlu1 %v2252_v30, %s3504_s19 }
0x1b55   : > { %v2258_v31 = vpop.permute.xlu1 %2257 }
0x1b56   : > { %3232 = vmatmul.mubr.msk.bf16.vlgmr.msra.gmra.mxu0 %vm543_vm1, %v2258_v31 }
0x1b57   : > { %3244 = vmatpush3.bf16.msra.mxu0 %v3995_v44  ;;  %3247 = vmatprep.mubr.msk.bf16.mxu0 %vm3501_vm0, %v3500_v17 }
0x1b58   : > { %3245 = vmatprep.subr.bf16.mxu0 %v3500_v17 }
0x1b5b   : > { %3246 = vmatpush3.bf16.msra.mxu0 %v4004_v50 }
0x1b5c   : > { %3259 = vmatprep.subr.bf16.mxu0 %v3500_v17 }
0x1c16   : > { %v2296_v36 = vpop.f32.mrf.mxu0 }
0x1c17   : > { %v2302_v37 = vadd.f32 %v2296_v36, %v2255_v34 }
0x1c18   : > { %v3233_v26 = vpop.f32.mrf.mxu0 }
0x1c19   : > { %3440 = vtanh.f32 %v2302_v37  ;;  %v2303_v40 = vmul.f32 0.5, %v2302_v37  ;;  %v2474_v26 = vunpack.c.l.bf16 %v2400_v10 }
0x1c1a   : > { %v2299_v38 = vpop.f32.mrf.mxu0 }
0x1c1b   : > { %3442 = vtanh.f32 %v2303_v40 }
0x1c1c   : > { %v3234_v28 = vpop.f32.mrf.mxu0 }
0x1c26   : > { %v3441_v39 = vpop.eup %3440 }
0x1c27   : > { %2310 = vrot.lane.b32.xlu0 %v3441_v39, %s3503_s13 }
0x1c28   : > { %v3443_v41 = vpop.eup %3442 }
0x1c29   : > { %v2305_v63 = vmul.f32 0.5, %v3443_v41 }
0x1c2b   : > { %v2306_v47 = vadd.f32 0.5, %v2305_v63 }
0x1c2d   : > { %v2308_v60 = vmul.f32 %v2306_v47, %v2245_v23 }
0x1c99   : > { %v2311_v32 = vpop.permute.xlu0 %2310 }
0x1c9a   : > { %v2313_v35 = vmul.f32 %v2311_v32, %v2306_v47 }
0x1c9c   : > { %2315 = vrot.lane.b32.xlu1 %v2313_v35, %s3504_s19 }
0x1d0e   : > { %v2316_v14 = vpop.permute.xlu1 %2315 }
0x1d0f   : > { %v2318_v24 = vadd.f32 %v2316_v14, %v2308_v60 }
0x1d11   : > { %3444 = vtanh.f32 %v2318_v24 }
0x1d1e   : > { %v3445_v6 = vpop.eup %3444 }
0x1d1f   : > { %2321 = vrot.lane.b32.xlu0 %v3445_v6, %s3503_s13 }
0x1d91   : > { %v2322_v9 = vpop.permute.xlu0 %2321 }
0x1d92   : > { %v2324_v61 = vmul.f32 %v2322_v9, %v2306_v47 }
0x1d94   : > { %v2325_v42 = vpack.c.bf16 %v2324_v61, %v2324_v61 }
0x1d96   : > { %2330 = vrot.lane.b32.xlu1 %v2325_v42, %s3504_s19 }
0x1e08   : > { %v2331_v43 = vpop.permute.xlu1 %2330 }
0x1e09   : > { %3240 = vmatmul.mubr.msk.bf16.vlgmr.msra.gmra.mxu1 %vm543_vm1, %v2331_v43 }
0x1e0a   : > { %3252 = vmatpush3.bf16.msra.mxu1 %v3995_v44  ;;  %3255 = vmatprep.mubr.msk.bf16.mxu1 %vm3501_vm0, %v3500_v17 }
0x1e0b   : > { %3253 = vmatprep.subr.bf16.mxu1 %v3500_v17 }
0x1e0e   : > { %3254 = vmatpush3.bf16.msra.mxu1 %v4004_v50 }
0x1e0f   : > { %3267 = vmatprep.subr.bf16.mxu1 %v3500_v17 }
0x1ec9   : > { %v2369_v46 = vpop.f32.mrf.mxu1 }
0x1eca   : > { %v2375_v48 = vadd.f32 %v2369_v46, %v2328_v45  ;;  %v2546_v46 = vld [vmem:[#allocation4] sm:$0xff]  }
0x1ecb   : > { %v3241_v49 = vpop.f32.mrf.mxu1 }
0x1ecc   : > { %3446 = vtanh.f32 %v2375_v48  ;;  %v2376_v55 = vmul.f32 0.5, %v2375_v48  ;;  %v2547_v48 = vunpack.c.h.bf16 %v2546_v46 }
0x1ecd   : > { %v2372_v1 = vpop.f32.mrf.mxu1 }
0x1ece   : > { %3448 = vtanh.f32 %v2376_v55 }
0x1ecf   : > { %v3242_v51 = vpop.f32.mrf.mxu1 }
0x1ed9   : > { %v3447_v53 = vpop.eup %3446 }
0x1eda   : > { %2383 = vrot.lane.b32.xlu0 %v3447_v53, %s3503_s13 }
0x1edb   : > { %v3449_v54 = vpop.eup %3448 }
0x1edc   : > { %v2378_v52 = vmul.f32 0.5, %v3449_v54 }
0x1ede   : > { %v2379_v56 = vadd.f32 0.5, %v2378_v52 }
0x1ee0   : > { %v2381_v59 = vmul.f32 %v2379_v56, %v2318_v24 }
0x1f4c   : > { %v2384_v57 = vpop.permute.xlu0 %2383 }
0x1f4d   : > { %v2386_v58 = vmul.f32 %v2384_v57, %v2379_v56 }
0x1f4f   : > { %2388 = vrot.lane.b32.xlu1 %v2386_v58, %s3504_s19 }
0x1fc1   : > { %v2389_v62 = vpop.permute.xlu1 %2388 }
0x1fc2   : > { %v2391_v0 = vadd.f32 %v2389_v62, %v2381_v59 }
0x1fc4   : > { %3450 = vtanh.f32 %v2391_v0 }
0x1fd1   : > { %v3451_v2 = vpop.eup %3450 }
0x1fd2   : > { %2394 = vrot.lane.b32.xlu0 %v3451_v2, %s3503_s13 }
0x2044   : > { %v2395_v3 = vpop.permute.xlu0 %2394 }
0x2045   : > { %v2397_v4 = vmul.f32 %v2395_v3, %v2379_v56 }
0x2047   : > { %v2398_v7 = vpack.c.bf16 %v2397_v4, %v2397_v4 }
0x2049   : > { %2403 = vrot.lane.b32.xlu1 %v2398_v7, %s3504_s19 }
0x20bb   : > { %v2404_v8 = vpop.permute.xlu1 %2403 }
0x20bc   : > { %3248 = vmatmul.mubr.msk.bf16.vlgmr.msra.gmra.mxu0 %vm543_vm1, %v2404_v8 }
0x20bd   : > { %3260 = vmatpush3.bf16.msra.mxu0 %v3995_v44  ;;  %3263 = vmatprep.mubr.msk.bf16.mxu0 %vm3501_vm0, %v3500_v17 }
0x20be   : > { %3261 = vmatprep.subr.bf16.mxu0 %v3500_v17 }
0x20c1   : > { %3262 = vmatpush3.bf16.msra.mxu0 %v4004_v50 }
0x20c2   : > { %3275 = vmatprep.subr.bf16.mxu0 %v3500_v17 }
0x217c   : > { %v2442_v18 = vpop.f32.mrf.mxu0 }
0x217d   : > { %v2448_v11 = vadd.f32 %v2442_v18, %v2401_v19  ;;  %v2619_v18 = vunpack.c.l.bf16 %v2546_v46 }
0x217e   : > { %v3249_v12 = vpop.f32.mrf.mxu0 }
0x217f   : > { %3452 = vtanh.f32 %v2448_v11  ;;  %v2449_v5 = vmul.f32 0.5, %v2448_v11 }
0x2180   : > { %v2445_v21 = vpop.f32.mrf.mxu0 }
0x2181   : > { %3454 = vtanh.f32 %v2449_v5 }
0x2182   : > { %v3250_v16 = vpop.f32.mrf.mxu0 }
0x218c   : > { %v3453_v13 = vpop.eup %3452 }
0x218d   : > { %2456 = vrot.lane.b32.xlu0 %v3453_v13, %s3503_s13 }
0x218e   : > { %v3455_v15 = vpop.eup %3454 }
0x218f   : > { %v2451_v22 = vmul.f32 0.5, %v3455_v15 }
0x2191   : > { %v2452_v20 = vadd.f32 0.5, %v2451_v22 }
0x2193   : > { %v2454_v27 = vmul.f32 %v2452_v20, %v2391_v0 }
0x21ff   : > { %v2457_v23 = vpop.permute.xlu0 %2456 }
0x2200   : > { %v2459_v25 = vmul.f32 %v2457_v23, %v2452_v20 }
0x2202   : > { %2461 = vrot.lane.b32.xlu1 %v2459_v25, %s3504_s19 }
0x2274   : > { %v2462_v29 = vpop.permute.xlu1 %2461 }
0x2275   : > { %v2464_v30 = vadd.f32 %v2462_v29, %v2454_v27 }
0x2277   : > { %3456 = vtanh.f32 %v2464_v30 }
0x2284   : > { %v3457_v31 = vpop.eup %3456 }
0x2285   : > { %2467 = vrot.lane.b32.xlu0 %v3457_v31, %s3503_s13 }
0x22f7   : > { %v2468_v33 = vpop.permute.xlu0 %2467 }
0x22f8   : > { %v2470_v34 = vmul.f32 %v2468_v33, %v2452_v20  ;;  %v3330_v33 = vld [vmem:[%s4144_s8 + $0x8] sm:$0xff]  }
0x22fa   : > { %v2471_v36 = vpack.c.bf16 %v2470_v34, %v2470_v34  ;;  %v3331_v34 = vld [vmem:[%s4144_s8] sm:$0xff]  }
0x22fc   : > { %2476 = vrot.lane.b32.xlu1 %v2471_v36, %s3504_s19 }
0x236e   : > { %v2477_v37 = vpop.permute.xlu1 %2476 }
0x236f   : > { %3256 = vmatmul.mubr.msk.bf16.vlgmr.msra.gmra.mxu1 %vm543_vm1, %v2477_v37 }
0x2370   : > { %3268 = vmatpush3.bf16.msra.mxu1 %v3995_v44  ;;  %3271 = vmatprep.mubr.msk.bf16.mxu1 %vm3501_vm0, %v3500_v17 }
0x2371   : > { %3269 = vmatprep.subr.bf16.mxu1 %v3500_v17 }
0x2374   : > { %3270 = vmatpush3.bf16.msra.mxu1 %v4004_v50 }
0x242f   : > { %v2515_v38 = vpop.f32.mrf.mxu1 }
0x2430   : > { %v2521_v28 = vadd.f32 %v2515_v38, %v2474_v26 }
0x2431   : > { %v3257_v39 = vpop.f32.mrf.mxu1 }
0x2432   : > { %3458 = vtanh.f32 %v2521_v28  ;;  %v2522_v47 = vmul.f32 0.5, %v2521_v28 }
0x2433   : > { %v2518_v40 = vpop.f32.mrf.mxu1 }
0x2434   : > { %3460 = vtanh.f32 %v2522_v47 }
0x2435   : > { %v3258_v41 = vpop.f32.mrf.mxu1 }
0x243f   : > { %v3459_v63 = vpop.eup %3458 }
0x2440   : > { %2529 = vrot.lane.b32.xlu0 %v3459_v63, %s3503_s13 }
0x2441   : > { %v3461_v44 = vpop.eup %3460 }
0x2442   : > { %v2524_v32 = vmul.f32 0.5, %v3461_v44 }
0x2444   : > { %v2525_v35 = vadd.f32 0.5, %v2524_v32 }
0x2446   : > { %v2527_v50 = vmul.f32 %v2525_v35, %v2464_v30 }
0x24b2   : > { %v2530_v60 = vpop.permute.xlu0 %2529 }
0x24b3   : > { %v2532_v14 = vmul.f32 %v2530_v60, %v2525_v35 }
0x24b5   : > { %2534 = vrot.lane.b32.xlu1 %v2532_v14, %s3504_s19 }
0x2527   : > { %v2535_v24 = vpop.permute.xlu1 %2534 }
0x2528   : > { %v2537_v6 = vadd.f32 %v2535_v24, %v2527_v50 }
0x252a   : > { %3462 = vtanh.f32 %v2537_v6 }
0x2537   : > { %v3463_v9 = vpop.eup %3462 }
0x2538   : > { %2540 = vrot.lane.b32.xlu0 %v3463_v9, %s3503_s13 }
0x25aa   : > { %v2541_v61 = vpop.permute.xlu0 %2540 }
0x25ab   : > { %v2543_v42 = vmul.f32 %v2541_v61, %v2525_v35 }
0x25ad   : > { %v2544_v43 = vpack.c.bf16 %v2543_v42, %v2543_v42 }
0x25af   : > { %2549 = vrot.lane.b32.xlu1 %v2544_v43, %s3504_s19 }
0x2621   : > { %v2550_v45 = vpop.permute.xlu1 %2549 }
0x2622   : > { %3264 = vmatmul.mubr.msk.bf16.vlgmr.msra.gmra.mxu0 %vm543_vm1, %v2550_v45 }
0x2623   : > { %3279 = vmatprep.mubr.msk.bf16.mxu0 %vm3501_vm0, %v3500_v17  ;;  %3276 = vmatpush3.bf16.msra.mxu0 %v3330_v33 }
0x2624   : > { %3277 = vmatprep.subr.bf16.mxu0 %v3500_v17  ;;  %v2927_v17 = vld [vmem:[%s4145_s9] ss:$0 sm:$0xff] }
0x2627   : > { %3278 = vmatpush3.bf16.msra.mxu0 %v3331_v34 }
0x26e2   : > { %v2588_v49 = vpop.f32.mrf.mxu0 }
0x26e3   : > { %v2594_v1 = vadd.f32 %v2588_v49, %v2547_v48 }
0x26e4   : > { %v3265_v51 = vpop.f32.mrf.mxu0 }
0x26e5   : > { %3464 = vtanh.f32 %v2594_v1  ;;  %v2595_v52 = vmul.f32 0.5, %v2594_v1 }
0x26e6   : > { %v2591_v53 = vpop.f32.mrf.mxu0 }
0x26e7   : > { %3466 = vtanh.f32 %v2595_v52 }
0x26e8   : > { %v3266_v55 = vpop.f32.mrf.mxu0 }
0x26f2   : > { %v3465_v54 = vpop.eup %3464 }
0x26f3   : > { %2602 = vrot.lane.b32.xlu0 %v3465_v54, %s3503_s13 }
0x26f4   : > { %v3467_v56 = vpop.eup %3466 }
0x26f5   : > { %v2597_v57 = vmul.f32 0.5, %v3467_v56 }
0x26f7   : > { %v2598_v58 = vadd.f32 0.5, %v2597_v57 }
0x26f9   : > { %v2600_v0 = vmul.f32 %v2598_v58, %v2537_v6 }
0x2765   : > { %v2603_v59 = vpop.permute.xlu0 %2602 }
0x2766   : > { %v2605_v62 = vmul.f32 %v2603_v59, %v2598_v58 }
0x2768   : > { %2607 = vrot.lane.b32.xlu1 %v2605_v62, %s3504_s19 }
0x27da   : > { %v2608_v2 = vpop.permute.xlu1 %2607 }
0x27db   : > { %v2610_v3 = vadd.f32 %v2608_v2, %v2600_v0 }
0x27dd   : > { %3468 = vtanh.f32 %v2610_v3 }
0x27ea   : > { %v3469_v4 = vpop.eup %3468 }
0x27eb   : > { %2613 = vrot.lane.b32.xlu0 %v3469_v4, %s3503_s13 }
0x285d   : > { %v2614_v7 = vpop.permute.xlu0 %2613 }
0x285e   : > { %v2616_v8 = vmul.f32 %v2614_v7, %v2598_v58 }
0x2860   : > { %v2617_v10 = vpack.c.bf16 %v2616_v8, %v2616_v8 }
0x2862   : > { %2621 = vrot.lane.b32.xlu1 %v2617_v10, %s3504_s19 }
0x28d4   : > { %v2622_v19 = vpop.permute.xlu1 %2621 }
0x28d5   : > { %3272 = vmatmul.mubr.msk.bf16.vlgmr.msra.gmra.mxu1 %vm543_vm1, %v2622_v19 }
0x2995   : > { %v2660_v11 = vpop.f32.mrf.mxu1 }
0x2996   : > { %v2666_v12 = vadd.f32 %v2660_v11, %v2619_v18 }
0x2997   : > { %v3273_v21 = vpop.f32.mrf.mxu1 }
0x2998   : > { %3470 = vtanh.f32 %v2666_v12  ;;  %v2667_v15 = vmul.f32 0.5, %v2666_v12 }
0x2999   : > { %v2663_v16 = vpop.f32.mrf.mxu1 }
0x299a   : > { %3472 = vtanh.f32 %v2667_v15 }
0x299b   : > { %v3274_v13 = vpop.f32.mrf.mxu1 }
0x29a5   : > { %v3471_v5 = vpop.eup %3470 }
0x29a6   : > { %2674 = vrot.lane.b32.xlu0 %v3471_v5, %s3503_s13 }
0x29a7   : > { %v3473_v22 = vpop.eup %3472 }
0x29a8   : > { %v2669_v20 = vmul.f32 0.5, %v3473_v22 }
0x29aa   : > { %v2670_v23 = vadd.f32 0.5, %v2669_v20 }
0x29ac   : > { %v2672_v29 = vmul.f32 %v2670_v23, %v2610_v3 }
0x2a18   : > { %v2675_v25 = vpop.permute.xlu0 %2674 }
0x2a19   : > { %v2677_v27 = vmul.f32 %v2675_v25, %v2670_v23 }
0x2a1b   : > { %2679 = vrot.lane.b32.xlu1 %v2677_v27, %s3504_s19 }
0x2a8d   : > { %v2680_v30 = vpop.permute.xlu1 %2679 }
0x2a8e   : > { %v2682_v31 = vadd.f32 %v2680_v30, %v2672_v29 }
0x2a90   : > { %3474 = vtanh.f32 %v2682_v31 }
0x2a9d   : > { %v3475_v36 = vpop.eup %3474 }
0x2a9e   : > { %2685 = vrot.lane.b32.xlu0 %v3475_v36, %s3503_s13  ;;  %s519_s13 = scalar_lea.vmem %s4146_s10, %s2848_s26 }
0x2b10   : > { %v2686_v37 = vpop.permute.xlu0 %2685 }
0x2b11   : > { %v2688_v26 = vmul.f32 %v2686_v37, %v2670_v23 }
0x2b13   : > { %v2689_v38 = vpack.c.bf16 %v2688_v26, %v2688_v26 }
0x2b15   : > { %2702 = vrot.lane.b32.xlu1 %v2689_v38, %s3504_s19 }
0x2b87   : > { %v2703_v28 = vpop.permute.xlu1 %2702 }
0x2b88   : > { %3280 = vmatmul.mubr.msk.bf16.vlgmr.msra.gmra.mxu0 %vm543_vm1, %v2703_v28 }
0x2c48   : > { %v2753_v39 = vpop.f32.mrf.mxu0 }
0x2c49   : > { %v2754_v40 = vadd.f32 %v2927_v17, %v2753_v39 }
0x2c4a   : > { %v3281_v41 = vpop.f32.mrf.mxu0 }
0x2c4b   : > { %2759 = vst [vmem:[%s519_s13] sm:$0xff] %v2754_v40 }
0x2c4c   : > { %v2756_v63 = vpop.f32.mrf.mxu0 }
0x2c4e   : > { %v3282_v47 = vpop.f32.mrf.mxu0 }
0x2c4f PF: > { %p17_p9 = scmp.ge.s32.totalorder %s3577_s17, 4   ;;  %s4148_s13 = smov %s3494_s14 }
0x2c50   : > { %s4149_s14 = smov %s3586_s20  ;;  %s4150_s15 = smov %s3577_s17 }
0x2c51   :  { %19 = sbr.rel (!%p17_p9) target bundleno = 2 (0x2), region = 220 }

</bundles_post_ra>
